<compile_context>
chip_gen: v6e
topology: v6e:2x2x1
jax: 0.10.0
libtpu: 0.0.40
codegen_flags: <defaults>
</compile_context>

<pallas_src>
import jax
import jax.numpy as jnp
from jax.experimental import pallas as pl
from jax.experimental.pallas import tpu as pltpu

BN_EPS = 1e-5
K = 5                    # conv kernel size
PAD = 2                  # conv padding
H1 = W1 = 28             # layer-1 spatial size
H2 = W2 = 14             # layer-2 spatial size (after pool 1)
H3 = W3 = 7              # spatial size after pool 2
C1, C2 = 16, 32          # conv output channels
HALF = 256               # lanes per pooling-column parity (224 used + 32 pad)
LANES = 2 * HALF         # conv-output lane width (512)
HP1 = H1 + 2 * PAD       # 32 padded rows / image (layer-1 input)
HP2 = H2 + 2 * PAD       # 18 padded rows / image (layer-2 input)
NCLS_PAD = 128           # FC output lanes (padded from num_classes)


# ----------------------------------------------------------------------------
# Fused Pallas kernel: conv1+BN+ReLU+pool -> conv2+BN+ReLU+pool -> FC
# ----------------------------------------------------------------------------
def _convnetb_kernel(xp_ref, w1_ref, s1_ref, h1_ref, w2_ref, s2_ref, h2_ref,
                     wfc_ref, bfc_ref, o_ref, y1_s, a1_s, y2_s):
    B = o_ref.shape[0]                       # images per block

    # Layer-2 H-padding rows (cheap, re-written every step: safe under
    # megacore "parallel" partitioning where program_id 0 may never run on
    # the second core's private scratch).
    zpad = jnp.zeros((PAD * B, W2 * C1), jnp.bfloat16)
    a1_s[0:PAD * B, :] = zpad
    a1_s[(PAD + H2) * B:HP2 * B, :] = zpad

    # ---- layer 1: 5x5 conv (pad 2) as 5 batched Toeplitz matmuls ----------
    # Rows are image-interleaved (r = h*B + b), so tap kh is a uniform row
    # shift of kh*B and every matmul has M = 28*B.
    y1 = jnp.dot(xp_ref[0:H1 * B, :], w1_ref[0],
                 preferred_element_type=jnp.float32)
    for kh in range(1, K):
        y1 = y1 + jnp.dot(xp_ref[kh * B:(kh + H1) * B, :], w1_ref[kh],
                          preferred_element_type=jnp.float32)
    # BN (eval mode, conv bias folded) + ReLU, stored once as bf16 (the
    # layer-2 matmul input dtype).
    y1_s[...] = jnp.maximum(y1 * s1_ref[...] + h1_ref[...],
                            0.0).astype(jnp.bfloat16)

    # 2x2 max pool: row pairs = adjacent B-row blocks, column pairs = the two
    # lane halves.  Pooled rows land directly in layer-2's (h*B+b, w*C) layout.
    for j in range(H2):
        r0 = y1_s[(2 * j) * B:(2 * j + 1) * B, :]
        r1 = y1_s[(2 * j + 1) * B:(2 * j + 2) * B, :]
        hp = jnp.maximum(r0, r1)
        a1_s[(PAD + j) * B:(PAD + j + 1) * B, :] = jnp.maximum(
            hp[:, 0:W2 * C1], hp[:, HALF:HALF + W2 * C1])

    # ---- layer 2: same structure, M = 14*B ---------------------------------
    y2 = jnp.dot(a1_s[0:H2 * B, :], w2_ref[0],
                 preferred_element_type=jnp.float32)
    for kh in range(1, K):
        y2 = y2 + jnp.dot(a1_s[kh * B:(kh + H2) * B, :], w2_ref[kh],
                          preferred_element_type=jnp.float32)
    y2_s[...] = jnp.maximum(y2 * s2_ref[...] + h2_ref[...], 0.0)

    # ---- 2x2 max pool fused with the FC (7 batched (B,224)x(224,128) dots) -
    acc = jnp.zeros((B, NCLS_PAD), jnp.float32)
    for j in range(H3):
        r0 = y2_s[(2 * j) * B:(2 * j + 1) * B, :]
        r1 = y2_s[(2 * j + 1) * B:(2 * j + 2) * B, :]
        hp = jnp.maximum(r0, r1)
        p = jnp.maximum(hp[:, 0:W3 * C2], hp[:, HALF:HALF + W3 * C2])
        acc = acc + jnp.dot(p, wfc_ref[j], preferred_element_type=jnp.float32)
    o_ref[...] = acc + bfc_ref[...]


def _fused_forward(xp, w1t, s1t, h1t, w2t, s2t, h2t, wfc, bfc, *,
                   block_b, n_blocks):
    B = block_b
    grid_spec = pltpu.PrefetchScalarGridSpec(
        num_scalar_prefetch=0,
        grid=(n_blocks,),
        in_specs=[
            pl.BlockSpec((HP1 * B, W1), lambda n: (n, 0)),              # input
            pl.BlockSpec((K, W1, LANES), lambda n: (0, 0, 0)),          # w1
            pl.BlockSpec((1, LANES), lambda n: (0, 0)),                 # bn1 s
            pl.BlockSpec((1, LANES), lambda n: (0, 0)),                 # bn1 h
            pl.BlockSpec((K, W2 * C1, LANES), lambda n: (0, 0, 0)),     # w2
            pl.BlockSpec((1, LANES), lambda n: (0, 0)),                 # bn2 s
            pl.BlockSpec((1, LANES), lambda n: (0, 0)),                 # bn2 h
            pl.BlockSpec((H3, W3 * C2, NCLS_PAD), lambda n: (0, 0, 0)), # fc w
            pl.BlockSpec((1, NCLS_PAD), lambda n: (0, 0)),              # fc b
        ],
        out_specs=pl.BlockSpec((B, NCLS_PAD), lambda n: (n, 0)),
        scratch_shapes=[
            pltpu.VMEM((H1 * B, LANES), jnp.bfloat16),      # conv1 out (BN/ReLU)
            pltpu.VMEM((HP2 * B, W2 * C1), jnp.bfloat16),   # padded layer-2 in
            pltpu.VMEM((H2 * B, LANES), jnp.float32),       # conv2 out (BN/ReLU)
        ],
    )
    return pl.pallas_call(
        _convnetb_kernel,
        out_shape=jax.ShapeDtypeStruct((n_blocks * B, NCLS_PAD), jnp.float32),
        grid_spec=grid_spec,
        compiler_params=pltpu.CompilerParams(
            dimension_semantics=("parallel",),
            vmem_limit_bytes=40 * 1024 * 1024),
    )(xp, w1t, s1t, h1t, w2t, s2t, h2t, wfc, bfc)


# ----------------------------------------------------------------------------
# Wrapper-side (one-time, tiny) weight folding
# ----------------------------------------------------------------------------
def _bn_fold(bias, gamma, beta, mean, var):
    scale = gamma / jnp.sqrt(var + BN_EPS)
    shift = (bias - mean) * scale + beta
    return scale, shift


def _lane_tile(vec, reps):
    """Tile a per-channel vector to the conv-output lane layout (1, 512)."""
    vec = vec.astype(jnp.float32)
    used = vec.shape[0] * reps
    half = jnp.concatenate([jnp.tile(vec, reps),
                            jnp.zeros((HALF - used,), jnp.float32)])
    return jnp.tile(half, 2).reshape(1, LANES)


def _toeplitz_w1(w1_oihw):
    """(16,1,5,5) -> (5, 28, 512): M[kh, w', pw*256 + j*16 + co]."""
    cout = w1_oihw.shape[0]
    wk = jnp.transpose(w1_oihw[:, 0], (1, 2, 0))             # (kh, kw, co)
    wp = jnp.arange(W1)                                       # input column
    wo = jnp.arange(W1)                                       # output column
    kw = wp[:, None] - wo[None, :] + PAD                      # (28, 28)
    valid = (kw >= 0) & (kw < K)
    band = jnp.where(valid[None, :, :, None],
                     wk[:, jnp.clip(kw, 0, K - 1), :], 0.0)   # (5,28,28,co)
    band = band.reshape(K, W1, W2, 2, cout)                   # [kh,p,j,pw,co]
    band = jnp.transpose(band, (0, 1, 3, 2, 4))               # [kh,p,pw,j,co]
    band = band.reshape(K, W1, 2, W2 * cout)
    band = jnp.pad(band, ((0, 0), (0, 0), (0, 0), (0, HALF - W2 * cout)))
    return band.reshape(K, W1, LANES)


def _toeplitz_w2(w2_oihw):
    """(32,16,5,5) -> (5, 224, 512): M[kh, w'*16+ci, pw*256 + j*32 + co]."""
    cout, cin = w2_oihw.shape[0], w2_oihw.shape[1]
    wk = jnp.transpose(w2_oihw, (2, 3, 1, 0))                 # (kh, kw, ci, co)
    wp = jnp.arange(W2)
    wo = jnp.arange(W2)
    kw = wp[:, None] - wo[None, :] + PAD
    valid = (kw >= 0) & (kw < K)
    band = jnp.where(valid[None, :, :, None, None],
                     wk[:, jnp.clip(kw, 0, K - 1), :, :], 0.0)  # (5,14,14,ci,co)
    band = jnp.transpose(band, (0, 1, 3, 2, 4))               # [kh, w', ci, w, co]
    band = band.reshape(K, W2 * cin, W2, cout)
    band = band.reshape(K, W2 * cin, W3, 2, cout)              # [kh,K,j,pw,co]
    band = jnp.transpose(band, (0, 1, 3, 2, 4))               # [kh,K,pw,j,co]
    band = band.reshape(K, W2 * cin, 2, W3 * cout)
    band = jnp.pad(band, ((0, 0), (0, 0), (0, 0), (0, HALF - W3 * cout)))
    return band.reshape(K, W2 * cin, LANES)


def _pick_batch_tile(n, max_b=32):
    """Largest divisor of n that is <= max_b and sublane-friendly."""
    best = 1
    for b in range(1, min(n, max_b) + 1):
        if n % b == 0 and (b % 8 == 0 or b == n):
            best = max(best, b)
    if best == 1:
        for b in range(1, min(n, max_b) + 1):
            if n % b == 0:
                best = b
    return best


def convnetb_forward(x_nchw, params, block_b=None):
    """ConvNetb forward pass, fully fused into one Pallas TPU kernel."""
    N, cin, H, W = x_nchw.shape
    assert (cin, H, W) == (1, H1, W1), "ConvNetb expects [N, 1, 28, 28] inputs"
    ncls = params["w_fc"].shape[0]
    assert ncls <= NCLS_PAD
    if block_b is None:
        block_b = _pick_batch_tile(N)
    assert N % block_b == 0
    Nb = N // block_b

    # Input: drop the singleton channel, zero-pad H by 2 (Toeplitz weights
    # absorb the W padding), interleave the images of each block along the
    # row dim (row r = h*block_b + b), cast to bf16 for the MXU.
    xp = jnp.pad(x_nchw[:, 0], ((0, 0), (PAD, PAD), (0, 0)))
    xp = xp.reshape(Nb, block_b, HP1, W1).transpose(0, 2, 1, 3)
    xp = xp.reshape(Nb * HP1 * block_b, W1).astype(jnp.bfloat16)

    # Weights / BN folding (tiny, done once).
    w1t = _toeplitz_w1(params["w1"]).astype(jnp.bfloat16)        # (5, 28, 512)
    w2t = _toeplitz_w2(params["w2"]).astype(jnp.bfloat16)        # (5, 224, 512)
    s1, h1 = _bn_fold(params["b1"], params["bn1_gamma"], params["bn1_beta"],
                      params["bn1_mean"], params["bn1_var"])
    s2, h2 = _bn_fold(params["b2"], params["bn2_gamma"], params["bn2_beta"],
                      params["bn2_mean"], params["bn2_var"])
    s1t, h1t = _lane_tile(s1, W2), _lane_tile(h1, W2)            # (1, 512)
    s2t, h2t = _lane_tile(s2, W3), _lane_tile(h2, W3)            # (1, 512)
    # FC weight permuted to the kernel's [row j, lane w*32+c] activation layout
    # (PyTorch flattens NCHW -> (C, H, W) order); padded to 128 output lanes.
    wfc = jnp.transpose(params["w_fc"].reshape(ncls, C2, H3, W3),
                        (2, 3, 1, 0)).reshape(H3, W3 * C2, ncls)
    wfc = jnp.pad(wfc, ((0, 0), (0, 0), (0, NCLS_PAD - ncls))).astype(jnp.float32)
    bfc = jnp.pad(params["b_fc"], (0, NCLS_PAD - ncls))
    bfc = bfc.reshape(1, NCLS_PAD).astype(jnp.float32)

    out = _fused_forward(xp, w1t, s1t, h1t, w2t, s2t, h2t, wfc, bfc,
                         block_b=block_b, n_blocks=Nb)
    return out[:, :ncls]


# ----------------------------------------------------------------------------
# Deterministic parameter init (shapes from ConvNetb.__init__)
# ----------------------------------------------------------------------------
def init_params(key, num_classes=10):
    ks = jax.random.split(key, 10)
    p = {}
    p["w1"] = 0.10 * jax.random.normal(ks[0], (16, 1, 5, 5), jnp.float32)
    p["b1"] = 0.10 * jax.random.normal(ks[1], (16,), jnp.float32)
    p["bn1_gamma"] = 1.0 + 0.10 * jax.random.normal(ks[2], (16,), jnp.float32)
    p["bn1_beta"] = 0.10 * jax.random.normal(ks[3], (16,), jnp.float32)
    p["bn1_mean"] = jnp.zeros((16,), jnp.float32)
    p["bn1_var"] = jnp.ones((16,), jnp.float32)
    p["w2"] = 0.05 * jax.random.normal(ks[4], (32, 16, 5, 5), jnp.float32)
    p["b2"] = 0.10 * jax.random.normal(ks[5], (32,), jnp.float32)
    p["bn2_gamma"] = 1.0 + 0.10 * jax.random.normal(ks[6], (32,), jnp.float32)
    p["bn2_beta"] = 0.10 * jax.random.normal(ks[7], (32,), jnp.float32)
    p["bn2_mean"] = jnp.zeros((32,), jnp.float32)
    p["bn2_var"] = jnp.ones((32,), jnp.float32)
    p["w_fc"] = 0.02 * jax.random.normal(ks[8], (num_classes, 7 * 7 * 32),
                                         jnp.float32)
    p["b_fc"] = 0.02 * jax.random.normal(ks[9], (num_classes,), jnp.float32)
    return p


# ----------------------------------------------------------------------------
# Pure-JAX reference (XLA conv / reduce_window) for verification
# ----------------------------------------------------------------------------
def ref_forward(x_nchw, p):
    x = jnp.transpose(x_nchw, (0, 2, 3, 1))

    def layer(x, w_oihw, b, gamma, beta, mean, var):
        w_hwio = jnp.transpose(w_oihw, (2, 3, 1, 0))
        y = jax.lax.conv_general_dilated(
            x, w_hwio, window_strides=(1, 1), padding=((PAD, PAD), (PAD, PAD)),
            dimension_numbers=("NHWC", "HWIO", "NHWC")) + b
        y = (y - mean) / jnp.sqrt(var + BN_EPS) * gamma + beta
        y = jnp.maximum(y, 0.0)
        return jax.lax.reduce_window(y, -jnp.inf, jax.lax.max,
                                     (1, 2, 2, 1), (1, 2, 2, 1), "VALID")

    x = layer(x, p["w1"], p["b1"], p["bn1_gamma"], p["bn1_beta"],
              p["bn1_mean"], p["bn1_var"])
    x = layer(x, p["w2"], p["b2"], p["bn2_gamma"], p["bn2_beta"],
              p["bn2_mean"], p["bn2_var"])
    N = x.shape[0]
    x = jnp.transpose(x, (0, 3, 1, 2)).reshape(N, -1)
    return x @ jnp.transpose(p["w_fc"]) + p["b_fc"]


if __name__ == "__main__":
    key = jax.random.PRNGKey(0)
    kx, kx16, kp = jax.random.split(key, 3)
    params = init_params(kp, num_classes=10)

    fwd = jax.jit(convnetb_forward, static_argnames=("block_b",))

    # Batch 2 -> block_b=2, grid=(1,): single-step path.
    x = jax.random.normal(kx, (2, 1, 28, 28), jnp.float32)
    out = jax.block_until_ready(fwd(x, params))
    assert out.shape == (2, 10), out.shape
    ref = ref_forward(x, params)
    if not bool(jnp.allclose(out, ref, rtol=2e-2, atol=2e-2)):
        raise AssertionError(
            f"Pallas output mismatch vs reference (N=2); max abs diff = "
            f"{float(jnp.max(jnp.abs(out - ref)))}")

    # Batch 16 with block_b=8 -> grid=(2,): multi-step (megacore-able) path.
    x16 = jax.random.normal(kx16, (16, 1, 28, 28), jnp.float32)
    out16 = jax.block_until_ready(fwd(x16, params, block_b=8))
    ref16 = ref_forward(x16, params)
    if not bool(jnp.allclose(out16, ref16, rtol=2e-2, atol=2e-2)):
        raise AssertionError(
            f"Pallas output mismatch vs reference (N=16); max abs diff = "
            f"{float(jnp.max(jnp.abs(out16 - ref16)))}")

    print("KERNEL_OK")
</pallas_src>

<mosaic_0001>
module attributes {stable_mosaic.version = 11 : i64} {
  func.func @_convnetb_kernel(%arg0: i32, %arg1: memref<64x28xbf16, #tpu.memory_space<vmem>>, %arg2: memref<5x28x512xbf16, #tpu.memory_space<vmem>>, %arg3: memref<1x512xf32, #tpu.memory_space<vmem>>, %arg4: memref<1x512xf32, #tpu.memory_space<vmem>>, %arg5: memref<5x224x512xbf16, #tpu.memory_space<vmem>>, %arg6: memref<1x512xf32, #tpu.memory_space<vmem>>, %arg7: memref<1x512xf32, #tpu.memory_space<vmem>>, %arg8: memref<7x224x128xf32, #tpu.memory_space<vmem>>, %arg9: memref<1x128xf32, #tpu.memory_space<vmem>>, %arg10: memref<2x128xf32, #tpu.memory_space<vmem>>, %arg11: memref<56x512xbf16, #tpu.memory_space<vmem>>, %arg12: memref<36x224xbf16, #tpu.memory_space<vmem>>, %arg13: memref<28x512xf32, #tpu.memory_space<vmem>>) attributes {dimension_semantics = [#tpu.dimension_semantics<parallel>], iteration_bounds = array<i64: 1>, scalar_prefetch = 0 : i64, scratch_operands = 3 : i64, tpu.core_type = #tpu.core_type<tc>, window_params = [{transform_indices = @transform_0, window_bounds = array<i64: 64, 28>}, {pipeline_mode = #tpu.pipeline_mode<synchronous>, transform_indices = @transform_1, window_bounds = array<i64: 5, 28, 512>}, {pipeline_mode = #tpu.pipeline_mode<synchronous>, transform_indices = @transform_2, window_bounds = array<i64: 1, 512>}, {pipeline_mode = #tpu.pipeline_mode<synchronous>, transform_indices = @transform_3, window_bounds = array<i64: 1, 512>}, {pipeline_mode = #tpu.pipeline_mode<synchronous>, transform_indices = @transform_4, window_bounds = array<i64: 5, 224, 512>}, {pipeline_mode = #tpu.pipeline_mode<synchronous>, transform_indices = @transform_5, window_bounds = array<i64: 1, 512>}, {pipeline_mode = #tpu.pipeline_mode<synchronous>, transform_indices = @transform_6, window_bounds = array<i64: 1, 512>}, {pipeline_mode = #tpu.pipeline_mode<synchronous>, transform_indices = @transform_7, window_bounds = array<i64: 7, 224, 128>}, {pipeline_mode = #tpu.pipeline_mode<synchronous>, transform_indices = @transform_8, window_bounds = array<i64: 1, 128>}, {transform_indices = @transform_9, window_bounds = array<i64: 2, 128>}]} {
    %cst = arith.constant 0.000000e+00 : bf16
    %0 = vector.broadcast %cst : bf16 to vector<4x224xbf16>
    %c0 = arith.constant 0 : index
    %c0_0 = arith.constant 0 : index
    %1 = vector.load %arg12[%c0, %c0_0] : memref<36x224xbf16, #tpu.memory_space<vmem>>, vector<4x224xbf16>
    tpu.vector_store %arg12[%c0, %c0_0], %0 {strides = array<i32>} : memref<36x224xbf16, #tpu.memory_space<vmem>>, vector<4x224xbf16>,
    %c32 = arith.constant 32 : index
    %c0_1 = arith.constant 0 : index
    %2 = vector.load %arg12[%c32, %c0_1] : memref<36x224xbf16, #tpu.memory_space<vmem>>, vector<4x224xbf16>
    tpu.vector_store %arg12[%c32, %c0_1], %0 {strides = array<i32>} : memref<36x224xbf16, #tpu.memory_space<vmem>>, vector<4x224xbf16>,
    %c0_2 = arith.constant 0 : index
    %c0_3 = arith.constant 0 : index
    %3 = vector.load %arg1[%c0_2, %c0_3] : memref<64x28xbf16, #tpu.memory_space<vmem>>, vector<56x28xbf16>
    %c0_4 = arith.constant 0 : index
    %c0_5 = arith.constant 0 : index
    %c0_6 = arith.constant 0 : index
    %4 = vector.load %arg2[%c0_4, %c0_5, %c0_6] : memref<5x28x512xbf16, #tpu.memory_space<vmem>>, vector<1x28x512xbf16>
    %5 = vector.shape_cast %4 : vector<1x28x512xbf16> to vector<28x512xbf16>
    %cst_7 = arith.constant dense<0.000000e+00> : vector<56x512xf32>
    %6 = tpu.matmul %3, %5, %cst_7 {dimension_numbers = #tpu.dot_dimension_numbers<[1], [0], [0], [1], [0, 0, 1, 1], [], []>} : vector<56x28xbf16>, vector<28x512xbf16>, vector<56x512xf32> -> vector<56x512xf32>
    %c2 = arith.constant 2 : index
    %c0_8 = arith.constant 0 : index
    %7 = vector.load %arg1[%c2, %c0_8] : memref<64x28xbf16, #tpu.memory_space<vmem>>, vector<56x28xbf16>
    %c1 = arith.constant 1 : index
    %c0_9 = arith.constant 0 : index
    %c0_10 = arith.constant 0 : index
    %8 = vector.load %arg2[%c1, %c0_9, %c0_10] : memref<5x28x512xbf16, #tpu.memory_space<vmem>>, vector<1x28x512xbf16>
    %9 = vector.shape_cast %8 : vector<1x28x512xbf16> to vector<28x512xbf16>
    %cst_11 = arith.constant dense<0.000000e+00> : vector<56x512xf32>
    %10 = tpu.matmul %7, %9, %cst_11 {dimension_numbers = #tpu.dot_dimension_numbers<[1], [0], [0], [1], [0, 0, 1, 1], [], []>} : vector<56x28xbf16>, vector<28x512xbf16>, vector<56x512xf32> -> vector<56x512xf32>
    %11 = arith.addf %6, %10 : vector<56x512xf32>
    %c4 = arith.constant 4 : index
    %c0_12 = arith.constant 0 : index
    %12 = vector.load %arg1[%c4, %c0_12] : memref<64x28xbf16, #tpu.memory_space<vmem>>, vector<56x28xbf16>
    %c2_13 = arith.constant 2 : index
    %c0_14 = arith.constant 0 : index
    %c0_15 = arith.constant 0 : index
    %13 = vector.load %arg2[%c2_13, %c0_14, %c0_15] : memref<5x28x512xbf16, #tpu.memory_space<vmem>>, vector<1x28x512xbf16>
    %14 = vector.shape_cast %13 : vector<1x28x512xbf16> to vector<28x512xbf16>
    %cst_16 = arith.constant dense<0.000000e+00> : vector<56x512xf32>
    %15 = tpu.matmul %12, %14, %cst_16 {dimension_numbers = #tpu.dot_dimension_numbers<[1], [0], [0], [1], [0, 0, 1, 1], [], []>} : vector<56x28xbf16>, vector<28x512xbf16>, vector<56x512xf32> -> vector<56x512xf32>
    %16 = arith.addf %11, %15 : vector<56x512xf32>
    %c6 = arith.constant 6 : index
    %c0_17 = arith.constant 0 : index
    %17 = vector.load %arg1[%c6, %c0_17] : memref<64x28xbf16, #tpu.memory_space<vmem>>, vector<56x28xbf16>
    %c3 = arith.constant 3 : index
    %c0_18 = arith.constant 0 : index
    %c0_19 = arith.constant 0 : index
    %18 = vector.load %arg2[%c3, %c0_18, %c0_19] : memref<5x28x512xbf16, #tpu.memory_space<vmem>>, vector<1x28x512xbf16>
    %19 = vector.shape_cast %18 : vector<1x28x512xbf16> to vector<28x512xbf16>
    %cst_20 = arith.constant dense<0.000000e+00> : vector<56x512xf32>
    %20 = tpu.matmul %17, %19, %cst_20 {dimension_numbers = #tpu.dot_dimension_numbers<[1], [0], [0], [1], [0, 0, 1, 1], [], []>} : vector<56x28xbf16>, vector<28x512xbf16>, vector<56x512xf32> -> vector<56x512xf32>
    %21 = arith.addf %16, %20 : vector<56x512xf32>
    %c8 = arith.constant 8 : index
    %c0_21 = arith.constant 0 : index
    %22 = vector.load %arg1[%c8, %c0_21] : memref<64x28xbf16, #tpu.memory_space<vmem>>, vector<56x28xbf16>
    %c4_22 = arith.constant 4 : index
    %c0_23 = arith.constant 0 : index
    %c0_24 = arith.constant 0 : index
    %23 = vector.load %arg2[%c4_22, %c0_23, %c0_24] : memref<5x28x512xbf16, #tpu.memory_space<vmem>>, vector<1x28x512xbf16>
    %24 = vector.shape_cast %23 : vector<1x28x512xbf16> to vector<28x512xbf16>
    %cst_25 = arith.constant dense<0.000000e+00> : vector<56x512xf32>
    %25 = tpu.matmul %22, %24, %cst_25 {dimension_numbers = #tpu.dot_dimension_numbers<[1], [0], [0], [1], [0, 0, 1, 1], [], []>} : vector<56x28xbf16>, vector<28x512xbf16>, vector<56x512xf32> -> vector<56x512xf32>
    %26 = arith.addf %21, %25 : vector<56x512xf32>
    %c0_26 = arith.constant 0 : index
    %c0_27 = arith.constant 0 : index
    %27 = vector.load %arg3[%c0_26, %c0_27] : memref<1x512xf32, #tpu.memory_space<vmem>>, vector<1x512xf32>
    %28 = vector.broadcast %27 : vector<1x512xf32> to vector<56x512xf32>
    %29 = arith.mulf %26, %28 : vector<56x512xf32>
    %c0_28 = arith.constant 0 : index
    %c0_29 = arith.constant 0 : index
    %30 = vector.load %arg4[%c0_28, %c0_29] : memref<1x512xf32, #tpu.memory_space<vmem>>, vector<1x512xf32>
    %31 = vector.broadcast %30 : vector<1x512xf32> to vector<56x512xf32>
    %32 = arith.addf %29, %31 : vector<56x512xf32>
    %cst_30 = arith.constant 0.000000e+00 : f32
    %33 = vector.broadcast %cst_30 : f32 to vector<56x512xf32>
    %34 = arith.maximumf %32, %33 : vector<56x512xf32>
    %35 = arith.truncf %34 : vector<56x512xf32> to vector<56x512xbf16>
    %c0_31 = arith.constant 0 : index
    %c0_32 = arith.constant 0 : index
    %36 = vector.load %arg11[%c0_31, %c0_32] : memref<56x512xbf16, #tpu.memory_space<vmem>>, vector<56x512xbf16>
    tpu.vector_store %arg11[%c0_31, %c0_32], %35 {strides = array<i32>} : memref<56x512xbf16, #tpu.memory_space<vmem>>, vector<56x512xbf16>,
    %c0_33 = arith.constant 0 : index
    %c0_34 = arith.constant 0 : index
    %37 = vector.load %arg11[%c0_33, %c0_34] : memref<56x512xbf16, #tpu.memory_space<vmem>>, vector<2x512xbf16>
    %c2_35 = arith.constant 2 : index
    %c0_36 = arith.constant 0 : index
    %38 = vector.load %arg11[%c2_35, %c0_36] : memref<56x512xbf16, #tpu.memory_space<vmem>>, vector<2x512xbf16>
    %39 = arith.maximumf %37, %38 : vector<2x512xbf16>
    %40 = vector.extract_strided_slice %39 {offsets = [0, 0], sizes = [2, 224], strides = [1, 1]} : vector<2x512xbf16> to vector<2x224xbf16>
    %41 = vector.extract_strided_slice %39 {offsets = [0, 256], sizes = [2, 224], strides = [1, 1]} : vector<2x512xbf16> to vector<2x224xbf16>
    %42 = arith.maximumf %40, %41 : vector<2x224xbf16>
    %c4_37 = arith.constant 4 : index
    %c0_38 = arith.constant 0 : index
    %43 = vector.load %arg12[%c4_37, %c0_38] : memref<36x224xbf16, #tpu.memory_space<vmem>>, vector<2x224xbf16>
    tpu.vector_store %arg12[%c4_37, %c0_38], %42 {strides = array<i32>} : memref<36x224xbf16, #tpu.memory_space<vmem>>, vector<2x224xbf16>,
    %c4_39 = arith.constant 4 : index
    %c0_40 = arith.constant 0 : index
    %44 = vector.load %arg11[%c4_39, %c0_40] : memref<56x512xbf16, #tpu.memory_space<vmem>>, vector<2x512xbf16>
    %c6_41 = arith.constant 6 : index
    %c0_42 = arith.constant 0 : index
    %45 = vector.load %arg11[%c6_41, %c0_42] : memref<56x512xbf16, #tpu.memory_space<vmem>>, vector<2x512xbf16>
    %46 = arith.maximumf %44, %45 : vector<2x512xbf16>
    %47 = vector.extract_strided_slice %46 {offsets = [0, 0], sizes = [2, 224], strides = [1, 1]} : vector<2x512xbf16> to vector<2x224xbf16>
    %48 = vector.extract_strided_slice %46 {offsets = [0, 256], sizes = [2, 224], strides = [1, 1]} : vector<2x512xbf16> to vector<2x224xbf16>
    %49 = arith.maximumf %47, %48 : vector<2x224xbf16>
    %c6_43 = arith.constant 6 : index
    %c0_44 = arith.constant 0 : index
    %50 = vector.load %arg12[%c6_43, %c0_44] : memref<36x224xbf16, #tpu.memory_space<vmem>>, vector<2x224xbf16>
    tpu.vector_store %arg12[%c6_43, %c0_44], %49 {strides = array<i32>} : memref<36x224xbf16, #tpu.memory_space<vmem>>, vector<2x224xbf16>,
    %c8_45 = arith.constant 8 : index
    %c0_46 = arith.constant 0 : index
    %51 = vector.load %arg11[%c8_45, %c0_46] : memref<56x512xbf16, #tpu.memory_space<vmem>>, vector<2x512xbf16>
    %c10 = arith.constant 10 : index
    %c0_47 = arith.constant 0 : index
    %52 = vector.load %arg11[%c10, %c0_47] : memref<56x512xbf16, #tpu.memory_space<vmem>>, vector<2x512xbf16>
    %53 = arith.maximumf %51, %52 : vector<2x512xbf16>
    %54 = vector.extract_strided_slice %53 {offsets = [0, 0], sizes = [2, 224], strides = [1, 1]} : vector<2x512xbf16> to vector<2x224xbf16>
    %55 = vector.extract_strided_slice %53 {offsets = [0, 256], sizes = [2, 224], strides = [1, 1]} : vector<2x512xbf16> to vector<2x224xbf16>
    %56 = arith.maximumf %54, %55 : vector<2x224xbf16>
    %c8_48 = arith.constant 8 : index
    %c0_49 = arith.constant 0 : index
    %57 = vector.load %arg12[%c8_48, %c0_49] : memref<36x224xbf16, #tpu.memory_space<vmem>>, vector<2x224xbf16>
    tpu.vector_store %arg12[%c8_48, %c0_49], %56 {strides = array<i32>} : memref<36x224xbf16, #tpu.memory_space<vmem>>, vector<2x224xbf16>,
    %c12 = arith.constant 12 : index
    %c0_50 = arith.constant 0 : index
    %58 = vector.load %arg11[%c12, %c0_50] : memref<56x512xbf16, #tpu.memory_space<vmem>>, vector<2x512xbf16>
    %c14 = arith.constant 14 : index
    %c0_51 = arith.constant 0 : index
    %59 = vector.load %arg11[%c14, %c0_51] : memref<56x512xbf16, #tpu.memory_space<vmem>>, vector<2x512xbf16>
    %60 = arith.maximumf %58, %59 : vector<2x512xbf16>
    %61 = vector.extract_strided_slice %60 {offsets = [0, 0], sizes = [2, 224], strides = [1, 1]} : vector<2x512xbf16> to vector<2x224xbf16>
    %62 = vector.extract_strided_slice %60 {offsets = [0, 256], sizes = [2, 224], strides = [1, 1]} : vector<2x512xbf16> to vector<2x224xbf16>
    %63 = arith.maximumf %61, %62 : vector<2x224xbf16>
    %c10_52 = arith.constant 10 : index
    %c0_53 = arith.constant 0 : index
    %64 = vector.load %arg12[%c10_52, %c0_53] : memref<36x224xbf16, #tpu.memory_space<vmem>>, vector<2x224xbf16>
    tpu.vector_store %arg12[%c10_52, %c0_53], %63 {strides = array<i32>} : memref<36x224xbf16, #tpu.memory_space<vmem>>, vector<2x224xbf16>,
    %c16 = arith.constant 16 : index
    %c0_54 = arith.constant 0 : index
    %65 = vector.load %arg11[%c16, %c0_54] : memref<56x512xbf16, #tpu.memory_space<vmem>>, vector<2x512xbf16>
    %c18 = arith.constant 18 : index
    %c0_55 = arith.constant 0 : index
    %66 = vector.load %arg11[%c18, %c0_55] : memref<56x512xbf16, #tpu.memory_space<vmem>>, vector<2x512xbf16>
    %67 = arith.maximumf %65, %66 : vector<2x512xbf16>
    %68 = vector.extract_strided_slice %67 {offsets = [0, 0], sizes = [2, 224], strides = [1, 1]} : vector<2x512xbf16> to vector<2x224xbf16>
    %69 = vector.extract_strided_slice %67 {offsets = [0, 256], sizes = [2, 224], strides = [1, 1]} : vector<2x512xbf16> to vector<2x224xbf16>
    %70 = arith.maximumf %68, %69 : vector<2x224xbf16>
    %c12_56 = arith.constant 12 : index
    %c0_57 = arith.constant 0 : index
    %71 = vector.load %arg12[%c12_56, %c0_57] : memref<36x224xbf16, #tpu.memory_space<vmem>>, vector<2x224xbf16>
    tpu.vector_store %arg12[%c12_56, %c0_57], %70 {strides = array<i32>} : memref<36x224xbf16, #tpu.memory_space<vmem>>, vector<2x224xbf16>,
    %c20 = arith.constant 20 : index
    %c0_58 = arith.constant 0 : index
    %72 = vector.load %arg11[%c20, %c0_58] : memref<56x512xbf16, #tpu.memory_space<vmem>>, vector<2x512xbf16>
    %c22 = arith.constant 22 : index
    %c0_59 = arith.constant 0 : index
    %73 = vector.load %arg11[%c22, %c0_59] : memref<56x512xbf16, #tpu.memory_space<vmem>>, vector<2x512xbf16>
    %74 = arith.maximumf %72, %73 : vector<2x512xbf16>
    %75 = vector.extract_strided_slice %74 {offsets = [0, 0], sizes = [2, 224], strides = [1, 1]} : vector<2x512xbf16> to vector<2x224xbf16>
    %76 = vector.extract_strided_slice %74 {offsets = [0, 256], sizes = [2, 224], strides = [1, 1]} : vector<2x512xbf16> to vector<2x224xbf16>
    %77 = arith.maximumf %75, %76 : vector<2x224xbf16>
    %c14_60 = arith.constant 14 : index
    %c0_61 = arith.constant 0 : index
    %78 = vector.load %arg12[%c14_60, %c0_61] : memref<36x224xbf16, #tpu.memory_space<vmem>>, vector<2x224xbf16>
    tpu.vector_store %arg12[%c14_60, %c0_61], %77 {strides = array<i32>} : memref<36x224xbf16, #tpu.memory_space<vmem>>, vector<2x224xbf16>,
    %c24 = arith.constant 24 : index
    %c0_62 = arith.constant 0 : index
    %79 = vector.load %arg11[%c24, %c0_62] : memref<56x512xbf16, #tpu.memory_space<vmem>>, vector<2x512xbf16>
    %c26 = arith.constant 26 : index
    %c0_63 = arith.constant 0 : index
    %80 = vector.load %arg11[%c26, %c0_63] : memref<56x512xbf16, #tpu.memory_space<vmem>>, vector<2x512xbf16>
    %81 = arith.maximumf %79, %80 : vector<2x512xbf16>
    %82 = vector.extract_strided_slice %81 {offsets = [0, 0], sizes = [2, 224], strides = [1, 1]} : vector<2x512xbf16> to vector<2x224xbf16>
    %83 = vector.extract_strided_slice %81 {offsets = [0, 256], sizes = [2, 224], strides = [1, 1]} : vector<2x512xbf16> to vector<2x224xbf16>
    %84 = arith.maximumf %82, %83 : vector<2x224xbf16>
    %c16_64 = arith.constant 16 : index
    %c0_65 = arith.constant 0 : index
    %85 = vector.load %arg12[%c16_64, %c0_65] : memref<36x224xbf16, #tpu.memory_space<vmem>>, vector<2x224xbf16>
    tpu.vector_store %arg12[%c16_64, %c0_65], %84 {strides = array<i32>} : memref<36x224xbf16, #tpu.memory_space<vmem>>, vector<2x224xbf16>,
    %c28 = arith.constant 28 : index
    %c0_66 = arith.constant 0 : index
    %86 = vector.load %arg11[%c28, %c0_66] : memref<56x512xbf16, #tpu.memory_space<vmem>>, vector<2x512xbf16>
    %c30 = arith.constant 30 : index
    %c0_67 = arith.constant 0 : index
    %87 = vector.load %arg11[%c30, %c0_67] : memref<56x512xbf16, #tpu.memory_space<vmem>>, vector<2x512xbf16>
    %88 = arith.maximumf %86, %87 : vector<2x512xbf16>
    %89 = vector.extract_strided_slice %88 {offsets = [0, 0], sizes = [2, 224], strides = [1, 1]} : vector<2x512xbf16> to vector<2x224xbf16>
    %90 = vector.extract_strided_slice %88 {offsets = [0, 256], sizes = [2, 224], strides = [1, 1]} : vector<2x512xbf16> to vector<2x224xbf16>
    %91 = arith.maximumf %89, %90 : vector<2x224xbf16>
    %c18_68 = arith.constant 18 : index
    %c0_69 = arith.constant 0 : index
    %92 = vector.load %arg12[%c18_68, %c0_69] : memref<36x224xbf16, #tpu.memory_space<vmem>>, vector<2x224xbf16>
    tpu.vector_store %arg12[%c18_68, %c0_69], %91 {strides = array<i32>} : memref<36x224xbf16, #tpu.memory_space<vmem>>, vector<2x224xbf16>,
    %c32_70 = arith.constant 32 : index
    %c0_71 = arith.constant 0 : index
    %93 = vector.load %arg11[%c32_70, %c0_71] : memref<56x512xbf16, #tpu.memory_space<vmem>>, vector<2x512xbf16>
    %c34 = arith.constant 34 : index
    %c0_72 = arith.constant 0 : index
    %94 = vector.load %arg11[%c34, %c0_72] : memref<56x512xbf16, #tpu.memory_space<vmem>>, vector<2x512xbf16>
    %95 = arith.maximumf %93, %94 : vector<2x512xbf16>
    %96 = vector.extract_strided_slice %95 {offsets = [0, 0], sizes = [2, 224], strides = [1, 1]} : vector<2x512xbf16> to vector<2x224xbf16>
    %97 = vector.extract_strided_slice %95 {offsets = [0, 256], sizes = [2, 224], strides = [1, 1]} : vector<2x512xbf16> to vector<2x224xbf16>
    %98 = arith.maximumf %96, %97 : vector<2x224xbf16>
    %c20_73 = arith.constant 20 : index
    %c0_74 = arith.constant 0 : index
    %99 = vector.load %arg12[%c20_73, %c0_74] : memref<36x224xbf16, #tpu.memory_space<vmem>>, vector<2x224xbf16>
    tpu.vector_store %arg12[%c20_73, %c0_74], %98 {strides = array<i32>} : memref<36x224xbf16, #tpu.memory_space<vmem>>, vector<2x224xbf16>,
    %c36 = arith.constant 36 : index
    %c0_75 = arith.constant 0 : index
    %100 = vector.load %arg11[%c36, %c0_75] : memref<56x512xbf16, #tpu.memory_space<vmem>>, vector<2x512xbf16>
    %c38 = arith.constant 38 : index
    %c0_76 = arith.constant 0 : index
    %101 = vector.load %arg11[%c38, %c0_76] : memref<56x512xbf16, #tpu.memory_space<vmem>>, vector<2x512xbf16>
    %102 = arith.maximumf %100, %101 : vector<2x512xbf16>
    %103 = vector.extract_strided_slice %102 {offsets = [0, 0], sizes = [2, 224], strides = [1, 1]} : vector<2x512xbf16> to vector<2x224xbf16>
    %104 = vector.extract_strided_slice %102 {offsets = [0, 256], sizes = [2, 224], strides = [1, 1]} : vector<2x512xbf16> to vector<2x224xbf16>
    %105 = arith.maximumf %103, %104 : vector<2x224xbf16>
    %c22_77 = arith.constant 22 : index
    %c0_78 = arith.constant 0 : index
    %106 = vector.load %arg12[%c22_77, %c0_78] : memref<36x224xbf16, #tpu.memory_space<vmem>>, vector<2x224xbf16>
    tpu.vector_store %arg12[%c22_77, %c0_78], %105 {strides = array<i32>} : memref<36x224xbf16, #tpu.memory_space<vmem>>, vector<2x224xbf16>,
    %c40 = arith.constant 40 : index
    %c0_79 = arith.constant 0 : index
    %107 = vector.load %arg11[%c40, %c0_79] : memref<56x512xbf16, #tpu.memory_space<vmem>>, vector<2x512xbf16>
    %c42 = arith.constant 42 : index
    %c0_80 = arith.constant 0 : index
    %108 = vector.load %arg11[%c42, %c0_80] : memref<56x512xbf16, #tpu.memory_space<vmem>>, vector<2x512xbf16>
    %109 = arith.maximumf %107, %108 : vector<2x512xbf16>
    %110 = vector.extract_strided_slice %109 {offsets = [0, 0], sizes = [2, 224], strides = [1, 1]} : vector<2x512xbf16> to vector<2x224xbf16>
    %111 = vector.extract_strided_slice %109 {offsets = [0, 256], sizes = [2, 224], strides = [1, 1]} : vector<2x512xbf16> to vector<2x224xbf16>
    %112 = arith.maximumf %110, %111 : vector<2x224xbf16>
    %c24_81 = arith.constant 24 : index
    %c0_82 = arith.constant 0 : index
    %113 = vector.load %arg12[%c24_81, %c0_82] : memref<36x224xbf16, #tpu.memory_space<vmem>>, vector<2x224xbf16>
    tpu.vector_store %arg12[%c24_81, %c0_82], %112 {strides = array<i32>} : memref<36x224xbf16, #tpu.memory_space<vmem>>, vector<2x224xbf16>,
    %c44 = arith.constant 44 : index
    %c0_83 = arith.constant 0 : index
    %114 = vector.load %arg11[%c44, %c0_83] : memref<56x512xbf16, #tpu.memory_space<vmem>>, vector<2x512xbf16>
    %c46 = arith.constant 46 : index
    %c0_84 = arith.constant 0 : index
    %115 = vector.load %arg11[%c46, %c0_84] : memref<56x512xbf16, #tpu.memory_space<vmem>>, vector<2x512xbf16>
    %116 = arith.maximumf %114, %115 : vector<2x512xbf16>
    %117 = vector.extract_strided_slice %116 {offsets = [0, 0], sizes = [2, 224], strides = [1, 1]} : vector<2x512xbf16> to vector<2x224xbf16>
    %118 = vector.extract_strided_slice %116 {offsets = [0, 256], sizes = [2, 224], strides = [1, 1]} : vector<2x512xbf16> to vector<2x224xbf16>
    %119 = arith.maximumf %117, %118 : vector<2x224xbf16>
    %c26_85 = arith.constant 26 : index
    %c0_86 = arith.constant 0 : index
    %120 = vector.load %arg12[%c26_85, %c0_86] : memref<36x224xbf16, #tpu.memory_space<vmem>>, vector<2x224xbf16>
    tpu.vector_store %arg12[%c26_85, %c0_86], %119 {strides = array<i32>} : memref<36x224xbf16, #tpu.memory_space<vmem>>, vector<2x224xbf16>,
    %c48 = arith.constant 48 : index
    %c0_87 = arith.constant 0 : index
    %121 = vector.load %arg11[%c48, %c0_87] : memref<56x512xbf16, #tpu.memory_space<vmem>>, vector<2x512xbf16>
    %c50 = arith.constant 50 : index
    %c0_88 = arith.constant 0 : index
    %122 = vector.load %arg11[%c50, %c0_88] : memref<56x512xbf16, #tpu.memory_space<vmem>>, vector<2x512xbf16>
    %123 = arith.maximumf %121, %122 : vector<2x512xbf16>
    %124 = vector.extract_strided_slice %123 {offsets = [0, 0], sizes = [2, 224], strides = [1, 1]} : vector<2x512xbf16> to vector<2x224xbf16>
    %125 = vector.extract_strided_slice %123 {offsets = [0, 256], sizes = [2, 224], strides = [1, 1]} : vector<2x512xbf16> to vector<2x224xbf16>
    %126 = arith.maximumf %124, %125 : vector<2x224xbf16>
    %c28_89 = arith.constant 28 : index
    %c0_90 = arith.constant 0 : index
    %127 = vector.load %arg12[%c28_89, %c0_90] : memref<36x224xbf16, #tpu.memory_space<vmem>>, vector<2x224xbf16>
    tpu.vector_store %arg12[%c28_89, %c0_90], %126 {strides = array<i32>} : memref<36x224xbf16, #tpu.memory_space<vmem>>, vector<2x224xbf16>,
    %c52 = arith.constant 52 : index
    %c0_91 = arith.constant 0 : index
    %128 = vector.load %arg11[%c52, %c0_91] : memref<56x512xbf16, #tpu.memory_space<vmem>>, vector<2x512xbf16>
    %c54 = arith.constant 54 : index
    %c0_92 = arith.constant 0 : index
    %129 = vector.load %arg11[%c54, %c0_92] : memref<56x512xbf16, #tpu.memory_space<vmem>>, vector<2x512xbf16>
    %130 = arith.maximumf %128, %129 : vector<2x512xbf16>
    %131 = vector.extract_strided_slice %130 {offsets = [0, 0], sizes = [2, 224], strides = [1, 1]} : vector<2x512xbf16> to vector<2x224xbf16>
    %132 = vector.extract_strided_slice %130 {offsets = [0, 256], sizes = [2, 224], strides = [1, 1]} : vector<2x512xbf16> to vector<2x224xbf16>
    %133 = arith.maximumf %131, %132 : vector<2x224xbf16>
    %c30_93 = arith.constant 30 : index
    %c0_94 = arith.constant 0 : index
    %134 = vector.load %arg12[%c30_93, %c0_94] : memref<36x224xbf16, #tpu.memory_space<vmem>>, vector<2x224xbf16>
    tpu.vector_store %arg12[%c30_93, %c0_94], %133 {strides = array<i32>} : memref<36x224xbf16, #tpu.memory_space<vmem>>, vector<2x224xbf16>,
    %c0_95 = arith.constant 0 : index
    %c0_96 = arith.constant 0 : index
    %135 = vector.load %arg12[%c0_95, %c0_96] : memref<36x224xbf16, #tpu.memory_space<vmem>>, vector<28x224xbf16>
    %c0_97 = arith.constant 0 : index
    %c0_98 = arith.constant 0 : index
    %c0_99 = arith.constant 0 : index
    %136 = vector.load %arg5[%c0_97, %c0_98, %c0_99] : memref<5x224x512xbf16, #tpu.memory_space<vmem>>, vector<1x224x512xbf16>
    %137 = vector.shape_cast %136 : vector<1x224x512xbf16> to vector<224x512xbf16>
    %cst_100 = arith.constant dense<0.000000e+00> : vector<28x512xf32>
    %138 = tpu.matmul %135, %137, %cst_100 {dimension_numbers = #tpu.dot_dimension_numbers<[1], [0], [0], [1], [0, 0, 1, 1], [], []>} : vector<28x224xbf16>, vector<224x512xbf16>, vector<28x512xf32> -> vector<28x512xf32>
    %c2_101 = arith.constant 2 : index
    %c0_102 = arith.constant 0 : index
    %139 = vector.load %arg12[%c2_101, %c0_102] : memref<36x224xbf16, #tpu.memory_space<vmem>>, vector<28x224xbf16>
    %c1_103 = arith.constant 1 : index
    %c0_104 = arith.constant 0 : index
    %c0_105 = arith.constant 0 : index
    %140 = vector.load %arg5[%c1_103, %c0_104, %c0_105] : memref<5x224x512xbf16, #tpu.memory_space<vmem>>, vector<1x224x512xbf16>
    %141 = vector.shape_cast %140 : vector<1x224x512xbf16> to vector<224x512xbf16>
    %cst_106 = arith.constant dense<0.000000e+00> : vector<28x512xf32>
    %142 = tpu.matmul %139, %141, %cst_106 {dimension_numbers = #tpu.dot_dimension_numbers<[1], [0], [0], [1], [0, 0, 1, 1], [], []>} : vector<28x224xbf16>, vector<224x512xbf16>, vector<28x512xf32> -> vector<28x512xf32>
    %143 = arith.addf %138, %142 : vector<28x512xf32>
    %c4_107 = arith.constant 4 : index
    %c0_108 = arith.constant 0 : index
    %144 = vector.load %arg12[%c4_107, %c0_108] : memref<36x224xbf16, #tpu.memory_space<vmem>>, vector<28x224xbf16>
    %c2_109 = arith.constant 2 : index
    %c0_110 = arith.constant 0 : index
    %c0_111 = arith.constant 0 : index
    %145 = vector.load %arg5[%c2_109, %c0_110, %c0_111] : memref<5x224x512xbf16, #tpu.memory_space<vmem>>, vector<1x224x512xbf16>
    %146 = vector.shape_cast %145 : vector<1x224x512xbf16> to vector<224x512xbf16>
    %cst_112 = arith.constant dense<0.000000e+00> : vector<28x512xf32>
    %147 = tpu.matmul %144, %146, %cst_112 {dimension_numbers = #tpu.dot_dimension_numbers<[1], [0], [0], [1], [0, 0, 1, 1], [], []>} : vector<28x224xbf16>, vector<224x512xbf16>, vector<28x512xf32> -> vector<28x512xf32>
    %148 = arith.addf %143, %147 : vector<28x512xf32>
    %c6_113 = arith.constant 6 : index
    %c0_114 = arith.constant 0 : index
    %149 = vector.load %arg12[%c6_113, %c0_114] : memref<36x224xbf16, #tpu.memory_space<vmem>>, vector<28x224xbf16>
    %c3_115 = arith.constant 3 : index
    %c0_116 = arith.constant 0 : index
    %c0_117 = arith.constant 0 : index
    %150 = vector.load %arg5[%c3_115, %c0_116, %c0_117] : memref<5x224x512xbf16, #tpu.memory_space<vmem>>, vector<1x224x512xbf16>
    %151 = vector.shape_cast %150 : vector<1x224x512xbf16> to vector<224x512xbf16>
    %cst_118 = arith.constant dense<0.000000e+00> : vector<28x512xf32>
    %152 = tpu.matmul %149, %151, %cst_118 {dimension_numbers = #tpu.dot_dimension_numbers<[1], [0], [0], [1], [0, 0, 1, 1], [], []>} : vector<28x224xbf16>, vector<224x512xbf16>, vector<28x512xf32> -> vector<28x512xf32>
    %153 = arith.addf %148, %152 : vector<28x512xf32>
    %c8_119 = arith.constant 8 : index
    %c0_120 = arith.constant 0 : index
    %154 = vector.load %arg12[%c8_119, %c0_120] : memref<36x224xbf16, #tpu.memory_space<vmem>>, vector<28x224xbf16>
    %c4_121 = arith.constant 4 : index
    %c0_122 = arith.constant 0 : index
    %c0_123 = arith.constant 0 : index
    %155 = vector.load %arg5[%c4_121, %c0_122, %c0_123] : memref<5x224x512xbf16, #tpu.memory_space<vmem>>, vector<1x224x512xbf16>
    %156 = vector.shape_cast %155 : vector<1x224x512xbf16> to vector<224x512xbf16>
    %cst_124 = arith.constant dense<0.000000e+00> : vector<28x512xf32>
    %157 = tpu.matmul %154, %156, %cst_124 {dimension_numbers = #tpu.dot_dimension_numbers<[1], [0], [0], [1], [0, 0, 1, 1], [], []>} : vector<28x224xbf16>, vector<224x512xbf16>, vector<28x512xf32> -> vector<28x512xf32>
    %158 = arith.addf %153, %157 : vector<28x512xf32>
    %c0_125 = arith.constant 0 : index
    %c0_126 = arith.constant 0 : index
    %159 = vector.load %arg6[%c0_125, %c0_126] : memref<1x512xf32, #tpu.memory_space<vmem>>, vector<1x512xf32>
    %160 = vector.broadcast %159 : vector<1x512xf32> to vector<28x512xf32>
    %161 = arith.mulf %158, %160 : vector<28x512xf32>
    %c0_127 = arith.constant 0 : index
    %c0_128 = arith.constant 0 : index
    %162 = vector.load %arg7[%c0_127, %c0_128] : memref<1x512xf32, #tpu.memory_space<vmem>>, vector<1x512xf32>
    %163 = vector.broadcast %162 : vector<1x512xf32> to vector<28x512xf32>
    %164 = arith.addf %161, %163 : vector<28x512xf32>
    %cst_129 = arith.constant 0.000000e+00 : f32
    %165 = vector.broadcast %cst_129 : f32 to vector<28x512xf32>
    %166 = arith.maximumf %164, %165 : vector<28x512xf32>
    %c0_130 = arith.constant 0 : index
    %c0_131 = arith.constant 0 : index
    %167 = vector.load %arg13[%c0_130, %c0_131] : memref<28x512xf32, #tpu.memory_space<vmem>>, vector<28x512xf32>
    tpu.vector_store %arg13[%c0_130, %c0_131], %166 {strides = array<i32>} : memref<28x512xf32, #tpu.memory_space<vmem>>, vector<28x512xf32>,
    %cst_132 = arith.constant 0.000000e+00 : f32
    %168 = vector.broadcast %cst_132 : f32 to vector<2x128xf32>
    %c0_133 = arith.constant 0 : index
    %c0_134 = arith.constant 0 : index
    %169 = vector.load %arg13[%c0_133, %c0_134] : memref<28x512xf32, #tpu.memory_space<vmem>>, vector<2x512xf32>
    %c2_135 = arith.constant 2 : index
    %c0_136 = arith.constant 0 : index
    %170 = vector.load %arg13[%c2_135, %c0_136] : memref<28x512xf32, #tpu.memory_space<vmem>>, vector<2x512xf32>
    %171 = arith.maximumf %169, %170 : vector<2x512xf32>
    %172 = vector.extract_strided_slice %171 {offsets = [0, 0], sizes = [2, 224], strides = [1, 1]} : vector<2x512xf32> to vector<2x224xf32>
    %173 = vector.extract_strided_slice %171 {offsets = [0, 256], sizes = [2, 224], strides = [1, 1]} : vector<2x512xf32> to vector<2x224xf32>
    %174 = arith.maximumf %172, %173 : vector<2x224xf32>
    %c0_137 = arith.constant 0 : index
    %c0_138 = arith.constant 0 : index
    %c0_139 = arith.constant 0 : index
    %175 = vector.load %arg8[%c0_137, %c0_138, %c0_139] : memref<7x224x128xf32, #tpu.memory_space<vmem>>, vector<1x224x128xf32>
    %176 = vector.shape_cast %175 : vector<1x224x128xf32> to vector<224x128xf32>
    %cst_140 = arith.constant dense<0.000000e+00> : vector<2x128xf32>
    %177 = tpu.matmul %174, %176, %cst_140 {dimension_numbers = #tpu.dot_dimension_numbers<[1], [0], [0], [1], [0, 0, 1, 1], [], []>} : vector<2x224xf32>, vector<224x128xf32>, vector<2x128xf32> -> vector<2x128xf32>
    %178 = arith.addf %168, %177 : vector<2x128xf32>
    %c4_141 = arith.constant 4 : index
    %c0_142 = arith.constant 0 : index
    %179 = vector.load %arg13[%c4_141, %c0_142] : memref<28x512xf32, #tpu.memory_space<vmem>>, vector<2x512xf32>
    %c6_143 = arith.constant 6 : index
    %c0_144 = arith.constant 0 : index
    %180 = vector.load %arg13[%c6_143, %c0_144] : memref<28x512xf32, #tpu.memory_space<vmem>>, vector<2x512xf32>
    %181 = arith.maximumf %179, %180 : vector<2x512xf32>
    %182 = vector.extract_strided_slice %181 {offsets = [0, 0], sizes = [2, 224], strides = [1, 1]} : vector<2x512xf32> to vector<2x224xf32>
    %183 = vector.extract_strided_slice %181 {offsets = [0, 256], sizes = [2, 224], strides = [1, 1]} : vector<2x512xf32> to vector<2x224xf32>
    %184 = arith.maximumf %182, %183 : vector<2x224xf32>
    %c1_145 = arith.constant 1 : index
    %c0_146 = arith.constant 0 : index
    %c0_147 = arith.constant 0 : index
    %185 = vector.load %arg8[%c1_145, %c0_146, %c0_147] : memref<7x224x128xf32, #tpu.memory_space<vmem>>, vector<1x224x128xf32>
    %186 = vector.shape_cast %185 : vector<1x224x128xf32> to vector<224x128xf32>
    %cst_148 = arith.constant dense<0.000000e+00> : vector<2x128xf32>
    %187 = tpu.matmul %184, %186, %cst_148 {dimension_numbers = #tpu.dot_dimension_numbers<[1], [0], [0], [1], [0, 0, 1, 1], [], []>} : vector<2x224xf32>, vector<224x128xf32>, vector<2x128xf32> -> vector<2x128xf32>
    %188 = arith.addf %178, %187 : vector<2x128xf32>
    %c8_149 = arith.constant 8 : index
    %c0_150 = arith.constant 0 : index
    %189 = vector.load %arg13[%c8_149, %c0_150] : memref<28x512xf32, #tpu.memory_space<vmem>>, vector<2x512xf32>
    %c10_151 = arith.constant 10 : index
    %c0_152 = arith.constant 0 : index
    %190 = vector.load %arg13[%c10_151, %c0_152] : memref<28x512xf32, #tpu.memory_space<vmem>>, vector<2x512xf32>
    %191 = arith.maximumf %189, %190 : vector<2x512xf32>
    %192 = vector.extract_strided_slice %191 {offsets = [0, 0], sizes = [2, 224], strides = [1, 1]} : vector<2x512xf32> to vector<2x224xf32>
    %193 = vector.extract_strided_slice %191 {offsets = [0, 256], sizes = [2, 224], strides = [1, 1]} : vector<2x512xf32> to vector<2x224xf32>
    %194 = arith.maximumf %192, %193 : vector<2x224xf32>
    %c2_153 = arith.constant 2 : index
    %c0_154 = arith.constant 0 : index
    %c0_155 = arith.constant 0 : index
    %195 = vector.load %arg8[%c2_153, %c0_154, %c0_155] : memref<7x224x128xf32, #tpu.memory_space<vmem>>, vector<1x224x128xf32>
    %196 = vector.shape_cast %195 : vector<1x224x128xf32> to vector<224x128xf32>
    %cst_156 = arith.constant dense<0.000000e+00> : vector<2x128xf32>
    %197 = tpu.matmul %194, %196, %cst_156 {dimension_numbers = #tpu.dot_dimension_numbers<[1], [0], [0], [1], [0, 0, 1, 1], [], []>} : vector<2x224xf32>, vector<224x128xf32>, vector<2x128xf32> -> vector<2x128xf32>
    %198 = arith.addf %188, %197 : vector<2x128xf32>
    %c12_157 = arith.constant 12 : index
    %c0_158 = arith.constant 0 : index
    %199 = vector.load %arg13[%c12_157, %c0_158] : memref<28x512xf32, #tpu.memory_space<vmem>>, vector<2x512xf32>
    %c14_159 = arith.constant 14 : index
    %c0_160 = arith.constant 0 : index
    %200 = vector.load %arg13[%c14_159, %c0_160] : memref<28x512xf32, #tpu.memory_space<vmem>>, vector<2x512xf32>
    %201 = arith.maximumf %199, %200 : vector<2x512xf32>
    %202 = vector.extract_strided_slice %201 {offsets = [0, 0], sizes = [2, 224], strides = [1, 1]} : vector<2x512xf32> to vector<2x224xf32>
    %203 = vector.extract_strided_slice %201 {offsets = [0, 256], sizes = [2, 224], strides = [1, 1]} : vector<2x512xf32> to vector<2x224xf32>
    %204 = arith.maximumf %202, %203 : vector<2x224xf32>
    %c3_161 = arith.constant 3 : index
    %c0_162 = arith.constant 0 : index
    %c0_163 = arith.constant 0 : index
    %205 = vector.load %arg8[%c3_161, %c0_162, %c0_163] : memref<7x224x128xf32, #tpu.memory_space<vmem>>, vector<1x224x128xf32>
    %206 = vector.shape_cast %205 : vector<1x224x128xf32> to vector<224x128xf32>
    %cst_164 = arith.constant dense<0.000000e+00> : vector<2x128xf32>
    %207 = tpu.matmul %204, %206, %cst_164 {dimension_numbers = #tpu.dot_dimension_numbers<[1], [0], [0], [1], [0, 0, 1, 1], [], []>} : vector<2x224xf32>, vector<224x128xf32>, vector<2x128xf32> -> vector<2x128xf32>
    %208 = arith.addf %198, %207 : vector<2x128xf32>
    %c16_165 = arith.constant 16 : index
    %c0_166 = arith.constant 0 : index
    %209 = vector.load %arg13[%c16_165, %c0_166] : memref<28x512xf32, #tpu.memory_space<vmem>>, vector<2x512xf32>
    %c18_167 = arith.constant 18 : index
    %c0_168 = arith.constant 0 : index
    %210 = vector.load %arg13[%c18_167, %c0_168] : memref<28x512xf32, #tpu.memory_space<vmem>>, vector<2x512xf32>
    %211 = arith.maximumf %209, %210 : vector<2x512xf32>
    %212 = vector.extract_strided_slice %211 {offsets = [0, 0], sizes = [2, 224], strides = [1, 1]} : vector<2x512xf32> to vector<2x224xf32>
    %213 = vector.extract_strided_slice %211 {offsets = [0, 256], sizes = [2, 224], strides = [1, 1]} : vector<2x512xf32> to vector<2x224xf32>
    %214 = arith.maximumf %212, %213 : vector<2x224xf32>
    %c4_169 = arith.constant 4 : index
    %c0_170 = arith.constant 0 : index
    %c0_171 = arith.constant 0 : index
    %215 = vector.load %arg8[%c4_169, %c0_170, %c0_171] : memref<7x224x128xf32, #tpu.memory_space<vmem>>, vector<1x224x128xf32>
    %216 = vector.shape_cast %215 : vector<1x224x128xf32> to vector<224x128xf32>
    %cst_172 = arith.constant dense<0.000000e+00> : vector<2x128xf32>
    %217 = tpu.matmul %214, %216, %cst_172 {dimension_numbers = #tpu.dot_dimension_numbers<[1], [0], [0], [1], [0, 0, 1, 1], [], []>} : vector<2x224xf32>, vector<224x128xf32>, vector<2x128xf32> -> vector<2x128xf32>
    %218 = arith.addf %208, %217 : vector<2x128xf32>
    %c20_173 = arith.constant 20 : index
    %c0_174 = arith.constant 0 : index
    %219 = vector.load %arg13[%c20_173, %c0_174] : memref<28x512xf32, #tpu.memory_space<vmem>>, vector<2x512xf32>
    %c22_175 = arith.constant 22 : index
    %c0_176 = arith.constant 0 : index
    %220 = vector.load %arg13[%c22_175, %c0_176] : memref<28x512xf32, #tpu.memory_space<vmem>>, vector<2x512xf32>
    %221 = arith.maximumf %219, %220 : vector<2x512xf32>
    %222 = vector.extract_strided_slice %221 {offsets = [0, 0], sizes = [2, 224], strides = [1, 1]} : vector<2x512xf32> to vector<2x224xf32>
    %223 = vector.extract_strided_slice %221 {offsets = [0, 256], sizes = [2, 224], strides = [1, 1]} : vector<2x512xf32> to vector<2x224xf32>
    %224 = arith.maximumf %222, %223 : vector<2x224xf32>
    %c5 = arith.constant 5 : index
    %c0_177 = arith.constant 0 : index
    %c0_178 = arith.constant 0 : index
    %225 = vector.load %arg8[%c5, %c0_177, %c0_178] : memref<7x224x128xf32, #tpu.memory_space<vmem>>, vector<1x224x128xf32>
    %226 = vector.shape_cast %225 : vector<1x224x128xf32> to vector<224x128xf32>
    %cst_179 = arith.constant dense<0.000000e+00> : vector<2x128xf32>
    %227 = tpu.matmul %224, %226, %cst_179 {dimension_numbers = #tpu.dot_dimension_numbers<[1], [0], [0], [1], [0, 0, 1, 1], [], []>} : vector<2x224xf32>, vector<224x128xf32>, vector<2x128xf32> -> vector<2x128xf32>
    %228 = arith.addf %218, %227 : vector<2x128xf32>
    %c24_180 = arith.constant 24 : index
    %c0_181 = arith.constant 0 : index
    %229 = vector.load %arg13[%c24_180, %c0_181] : memref<28x512xf32, #tpu.memory_space<vmem>>, vector<2x512xf32>
    %c26_182 = arith.constant 26 : index
    %c0_183 = arith.constant 0 : index
    %230 = vector.load %arg13[%c26_182, %c0_183] : memref<28x512xf32, #tpu.memory_space<vmem>>, vector<2x512xf32>
    %231 = arith.maximumf %229, %230 : vector<2x512xf32>
    %232 = vector.extract_strided_slice %231 {offsets = [0, 0], sizes = [2, 224], strides = [1, 1]} : vector<2x512xf32> to vector<2x224xf32>
    %233 = vector.extract_strided_slice %231 {offsets = [0, 256], sizes = [2, 224], strides = [1, 1]} : vector<2x512xf32> to vector<2x224xf32>
    %234 = arith.maximumf %232, %233 : vector<2x224xf32>
    %c6_184 = arith.constant 6 : index
    %c0_185 = arith.constant 0 : index
    %c0_186 = arith.constant 0 : index
    %235 = vector.load %arg8[%c6_184, %c0_185, %c0_186] : memref<7x224x128xf32, #tpu.memory_space<vmem>>, vector<1x224x128xf32>
    %236 = vector.shape_cast %235 : vector<1x224x128xf32> to vector<224x128xf32>
    %cst_187 = arith.constant dense<0.000000e+00> : vector<2x128xf32>
    %237 = tpu.matmul %234, %236, %cst_187 {dimension_numbers = #tpu.dot_dimension_numbers<[1], [0], [0], [1], [0, 0, 1, 1], [], []>} : vector<2x224xf32>, vector<224x128xf32>, vector<2x128xf32> -> vector<2x128xf32>
    %238 = arith.addf %228, %237 : vector<2x128xf32>
    %c0_188 = arith.constant 0 : index
    %c0_189 = arith.constant 0 : index
    %239 = vector.load %arg9[%c0_188, %c0_189] : memref<1x128xf32, #tpu.memory_space<vmem>>, vector<1x128xf32>
    %240 = vector.broadcast %239 : vector<1x128xf32> to vector<2x128xf32>
    %241 = arith.addf %238, %240 : vector<2x128xf32>
    %c0_190 = arith.constant 0 : index
    %c0_191 = arith.constant 0 : index
    %242 = vector.load %arg10[%c0_190, %c0_191] : memref<2x128xf32, #tpu.memory_space<vmem>>, vector<2x128xf32>
    tpu.vector_store %arg10[%c0_190, %c0_191], %241 {strides = array<i32>} : memref<2x128xf32, #tpu.memory_space<vmem>>, vector<2x128xf32>,
    return
  }
  func.func @transform_0(%arg0: i32) -> (i32, i32) {
    %c0_i32 = arith.constant 0 : i32
    %c0_i32_0 = arith.constant 0 : i32
    return %arg0, %c0_i32 : i32, i32
  }
  func.func @transform_1(%arg0: i32) -> (i32, i32, i32) {
    %c0_i32 = arith.constant 0 : i32
    %c0_i32_0 = arith.constant 0 : i32
    %c0_i32_1 = arith.constant 0 : i32
    %c0_i32_2 = arith.constant 0 : i32
    return %c0_i32, %c0_i32_0, %c0_i32_1 : i32, i32, i32
  }
  func.func @transform_2(%arg0: i32) -> (i32, i32) {
    %c0_i32 = arith.constant 0 : i32
    %c0_i32_0 = arith.constant 0 : i32
    %c0_i32_1 = arith.constant 0 : i32
    return %c0_i32, %c0_i32_0 : i32, i32
  }
  func.func @transform_3(%arg0: i32) -> (i32, i32) {
    %c0_i32 = arith.constant 0 : i32
    %c0_i32_0 = arith.constant 0 : i32
    %c0_i32_1 = arith.constant 0 : i32
    return %c0_i32, %c0_i32_0 : i32, i32
  }
  func.func @transform_4(%arg0: i32) -> (i32, i32, i32) {
    %c0_i32 = arith.constant 0 : i32
    %c0_i32_0 = arith.constant 0 : i32
    %c0_i32_1 = arith.constant 0 : i32
    %c0_i32_2 = arith.constant 0 : i32
    return %c0_i32, %c0_i32_0, %c0_i32_1 : i32, i32, i32
  }
  func.func @transform_5(%arg0: i32) -> (i32, i32) {
    %c0_i32 = arith.constant 0 : i32
    %c0_i32_0 = arith.constant 0 : i32
    %c0_i32_1 = arith.constant 0 : i32
    return %c0_i32, %c0_i32_0 : i32, i32
  }
  func.func @transform_6(%arg0: i32) -> (i32, i32) {
    %c0_i32 = arith.constant 0 : i32
    %c0_i32_0 = arith.constant 0 : i32
    %c0_i32_1 = arith.constant 0 : i32
    return %c0_i32, %c0_i32_0 : i32, i32
  }
  func.func @transform_7(%arg0: i32) -> (i32, i32, i32) {
    %c0_i32 = arith.constant 0 : i32
    %c0_i32_0 = arith.constant 0 : i32
    %c0_i32_1 = arith.constant 0 : i32
    %c0_i32_2 = arith.constant 0 : i32
    return %c0_i32, %c0_i32_0, %c0_i32_1 : i32, i32, i32
  }
  func.func @transform_8(%arg0: i32) -> (i32, i32) {
    %c0_i32 = arith.constant 0 : i32
    %c0_i32_0 = arith.constant 0 : i32
    %c0_i32_1 = arith.constant 0 : i32
    return %c0_i32, %c0_i32_0 : i32, i32
  }
  func.func @transform_9(%arg0: i32) -> (i32, i32) {
    %c0_i32 = arith.constant 0 : i32
    %c0_i32_0 = arith.constant 0 : i32
    return %arg0, %c0_i32 : i32, i32
  }
}

</mosaic_0001>

<bundles_post_ra>
// kernel: tile.43
= control target key start
LH: loop header
LB: loop body
LE: loop exit
PB: predicated region body
PF: predicated region fallthrough
CT: control target
= control target key end

     0   :  { %s28_s0 = inlined_call_operand.vmem [shape: f32[16], index: 0, kind: input, shape index: {}]   ;;  %s29_s1 = inlined_call_operand.vmem [shape: f32[14,16], index: 1, kind: output, shape index: {}]  }
   0x1   :  { %v4_v0 = vld [vmem:[%s28_s0] ss:$0 sm:$0xff] }
   0x2   :  { %5 = vst [vmem:[%s29_s1] sm:$0xff] %v4_v0  ;;  %8 = vst [vmem:[%s29_s1 + $0x8] sm:$0xff] %v4_v0 }

// kernel: tile.44
= control target key start
LH: loop header
LB: loop body
LE: loop exit
PB: predicated region body
PF: predicated region fallthrough
CT: control target
= control target key end

     0   :  { %s19_s8 = smov 3  ;;  %s75_s9 = smov 112   ;;  %vm4_vm0 = vcmask 130048   ;;  %vm10_vm1 = vcmask 1048448   ;;  %vm16_vm2 = vcmask 917248   ;;  %vm23_vm3 = vcmask 786048   ;;  %s119_s0 = inlined_call_operand.vmem [shape: f32[14,16], index: 0, kind: input, shape index: {}]   ;;  %s120_s1 = inlined_call_operand.vmem [shape: f32[224], index: 1, kind: output, shape index: {}]  }
   0x1   :  { %v61_v0 = vld [vmem:[%s119_s0 + $0x7] sm:$0x1]   ;;  %v63_v1 = vld [vmem:[%s119_s0 + $0x5] ss:$8 sm:%s19_s8]   ;;  %s76_s12 = smov 80   ;;  %s26_s15 = smov 3 }
   0x2   :  { %8 = vrot.lane.b32.xlu0 %v61_v0, %s75_s9  ;;  %21 = vrot.lane.b32.xlu1 %v63_v1, %s76_s12  ;;  %v62_v2 = vld [vmem:[%s119_s0 + $0x6] sm:$0x1]   ;;  %s33_s18 = smov 3  ;;  %s40_s19 = smov 3  ;;  %vm30_vm4 = vcmask 654848   ;;  %vm37_vm5 = vcmask 523648  }
   0x3   :  { %v64_v3 = vld [vmem:[%s119_s0 + $0x4] ss:$8 sm:%s26_s15]   ;;  %s77_s20 = smov 96   ;;  %s78_s21 = smov 64   ;;  %v65_v4 = vld [vmem:[%s119_s0 + $0x3] ss:$8 sm:%s33_s18]  }
   0x4   :  { %s2_s24 = smov 3  ;;  %v66_v5 = vld [vmem:[%s119_s0 + $0x2] ss:$8 sm:%s40_s19]   ;;  %s47_s27 = smov 3  ;;  %vm44_vm6 = vcmask 392448   ;;  %vm51_vm7 = vcmask 261248  }
   0x5   :  { %v3_v6 = vld [vmem:[%s119_s0] ss:$8 sm:%s2_s24]   ;;  %s79_s30 = smov 48   ;;  %s80_s2 = smov 32   ;;  %v67_v7 = vld [vmem:[%s119_s0 + $0x1] ss:$8 sm:%s47_s27]  }
   0x6   :  { %14 = vrot.lane.b32.xlu0 %v62_v2, %s77_s20  ;;  %28 = vrot.lane.b32.xlu1 %v64_v3, %s78_s21  ;;  %5 = vst.msk [vmem:[#allocation0] sm:$0x3] %vm4_vm0, %v3_v6   ;;  %s81_s0 = smov 16  }
   0xa   :  { %35 = vrot.lane.b32.xlu0 %v65_v4, %s79_s30  ;;  %42 = vrot.lane.b32.xlu1 %v66_v5, %s80_s2 }
   0xe   :  { %49 = vrot.lane.b32.xlu0 %v67_v7, %s81_s0 }
  0x74   :  { %v9_v8 = vpop.permute.xlu0 %8   ;;  %v22_v9 = vpop.permute.xlu1 %21  }
  0x75   :  { %11 = vst.msk [vmem:[#allocation0] sm:$0x1] %vm10_vm1, %v9_v8  }
  0x78   :  { %v15_v10 = vpop.permute.xlu0 %14   ;;  %v29_v11 = vpop.permute.xlu1 %28  }
  0x79   :  { %17 = vst.msk [vmem:[#allocation0] sm:$0x1] %vm16_vm2, %v15_v10  }
  0x7a   :  { %24 = vst.msk [vmem:[#allocation0] sm:$0x3] %vm23_vm3, %v22_v9  }
  0x7b   :  { %31 = vst.msk [vmem:[#allocation0] sm:$0x3] %vm30_vm4, %v29_v11  }
  0x7c   :  { %v36_v12 = vpop.permute.xlu0 %35   ;;  %v43_v13 = vpop.permute.xlu1 %42  }
  0x7d   :  { %38 = vst.msk [vmem:[#allocation0] sm:$0x3] %vm37_vm5, %v36_v12  }
  0x7e   :  { %45 = vst.msk [vmem:[#allocation0] sm:$0x3] %vm44_vm6, %v43_v13  }
  0x80   :  { %v50_v14 = vpop.permute.xlu0 %49  }
  0x81   :  { %52 = vst.msk [vmem:[#allocation0] sm:$0x3] %vm51_vm7, %v50_v14  }
  0x88   :  { %v57_v15 = vld [vmem:[#allocation0] sm:$0x3] }
  0x89   :  { %60 = vst [vmem:[%s120_s1] sm:$0x3] %v57_v15 }

// kernel: tile.63
= control target key start
LH: loop header
LB: loop body
LE: loop exit
PB: predicated region body
PF: predicated region fallthrough
CT: control target
= control target key end

     0   :  { %s22_s0 = inlined_call_operand.vmem [shape: f32[32], index: 0, kind: input, shape index: {}]   ;;  %s23_s1 = inlined_call_operand.vmem [shape: f32[7,32], index: 1, kind: output, shape index: {}]  }
   0x1   :  { %v4_v0 = vld [vmem:[%s22_s0] ss:$0 sm:$0xff] }
   0x2   :  { %5 = vst [vmem:[%s23_s1] sm:$0xff] %v4_v0 }

// kernel: tile.64
= control target key start
LH: loop header
LB: loop body
LE: loop exit
PB: predicated region body
PF: predicated region fallthrough
CT: control target
= control target key end

     0   :  { %s13_s8 = smov 3  ;;  %s40_s9 = smov 96   ;;  %vm4_vm0 = vcmask 261120   ;;  %vm10_vm1 = vcmask 1048320   ;;  %vm17_vm2 = vcmask 785920   ;;  %vm24_vm3 = vcmask 523520   ;;  %s68_s0 = inlined_call_operand.vmem [shape: f32[7,32], index: 0, kind: input, shape index: {}]   ;;  %s69_s1 = inlined_call_operand.vmem [shape: f32[224], index: 1, kind: output, shape index: {}]  }
   0x1   :  { %v34_v0 = vld [vmem:[%s68_s0 + $0x3] sm:$0x1]   ;;  %s20_s10 = smov 3  ;;  %v35_v1 = vld [vmem:[%s68_s0 + $0x2] ss:$4 sm:%s13_s8]   ;;  %s2_s15 = smov 3 }
   0x2   :  { %8 = vrot.lane.b32.xlu0 %v34_v0, %s40_s9  ;;  %v36_v2 = vld [vmem:[%s68_s0 + $0x1] ss:$4 sm:%s20_s10]   ;;  %s41_s16 = smov 32  }
   0x3   :  { %22 = vrot.lane.b32.xlu1 %v36_v2, %s41_s16  ;;  %v3_v3 = vld [vmem:[%s68_s0] ss:$4 sm:%s2_s15]   ;;  %s42_s0 = smov 64  }
   0x4   :  { %5 = vst.msk [vmem:[#allocation0] sm:$0x3] %vm4_vm0, %v3_v3  }
   0x6   :  { %15 = vrot.lane.b32.xlu0 %v35_v1, %s42_s0 }
  0x74   :  { %v9_v4 = vpop.permute.xlu0 %8  }
  0x75   :  { %11 = vst.msk [vmem:[#allocation0] sm:$0x1] %vm10_vm1, %v9_v4   ;;  %v23_v5 = vpop.permute.xlu1 %22  }
  0x78   :  { %v16_v6 = vpop.permute.xlu0 %15  }
  0x79   :  { %18 = vst.msk [vmem:[#allocation0] sm:$0x3] %vm17_vm2, %v16_v6  }
  0x7a   :  { %25 = vst.msk [vmem:[#allocation0] sm:$0x3] %vm24_vm3, %v23_v5  }
  0x81   :  { %v30_v7 = vld [vmem:[#allocation0] sm:$0x3] }
  0x82   :  { %33 = vst [vmem:[%s69_s1] sm:$0x3] %v30_v7 }

// kernel: convnetb_forward.1
= control target key start
LH: loop header
LB: loop body
LE: loop exit
PB: predicated region body
PF: predicated region fallthrough
CT: control target
= control target key end

     0   :  { %vm142_vm0 = vcmask 1045504   ;;  %v6652_v3 = vmov 0   ;;  %vm85_vm1 = vcmask 1046528   ;;  %vm129_vm2 = vcmask 228352   ;;  %s9359_s0 = inlined_call_operand.vmem [shape: bf16[64,28], index: 0, kind: input, shape index: {}]   ;;  %s9360_s1 = inlined_call_operand.vmem [shape: bf16[5,28,512], index: 1, kind: input, shape index: {}]   ;;  %s9361_s2 = inlined_call_operand.vmem [shape: f32[1,512], index: 2, kind: input, shape index: {}]   ;;  %s9362_s3 = inlined_call_operand.vmem [shape: f32[1,512], index: 3, kind: input, shape index: {}]   ;;  %s9363_s4 = inlined_call_operand.vmem [shape: bf16[5,224,512], index: 4, kind: input, shape index: {}]   ;;  %s9364_s5 = inlined_call_operand.vmem [shape: f32[1,512], index: 5, kind: input, shape index: {}]   ;;  %s9365_s6 = inlined_call_operand.vmem [shape: f32[1,512], index: 6, kind: input, shape index: {}]   ;;  %s9366_s7 = inlined_call_operand.vmem [shape: f32[7,224,128], index: 7, kind: input, shape index: {}]   ;;  %s9367_s8 = inlined_call_operand.vmem [shape: f32[1,128], index: 8, kind: input, shape index: {}]   ;;  %s9368_s9 = inlined_call_operand.hbm [shape: f32[2,128], index: 9, kind: output, shape index: {}]  }
   0x1   :  { %v6127_v0 = vld [vmem:[%s9360_s1 + $0x64] ss:$16 sps:$4 sm:$0x3f]   ;;  %v6131_v2 = vld [vmem:[%s9360_s1 + $0x60] ss:$16 sps:$4 sm:$0x3f]   ;;  %187 = vmatprep.mubr.bf16.mxu1 %v6652_v3  ;;  %393 = vmatprep.mubr.bf16.mxu0 %v6652_v3 }
   0x2   :  { %5227 = vmatprep.subr.msk.bf16.mxu1 %vm142_vm0, %v6127_v0  ;;  %v6129_v1 = vld [vmem:[%s9360_s1 + $0x24] ss:$16 sps:$4 sm:$0x3f]   ;;  %v6132_v4 = vld [vmem:[%s9360_s1 + $0x20] ss:$16 sps:$4 sm:$0x3f]  }
   0x3   :  { %v6133_v5 = vld [vmem:[%s9360_s1 + $0x44] ss:$16 sps:$4 sm:$0xff]   ;;  %5247 = vmatprep.subr.msk.bf16.mxu0 %vm142_vm0, %v6129_v1  ;;  %v144_v6 = vsel %vm142_vm0, %v6131_v2, 0  ;;  %v350_v8 = vsel %vm142_vm0, %v6132_v4, 0  ;;  %v6137_v9 = vld [vmem:[%s9360_s1 + $0x40] ss:$16 sps:$4 sm:$0xff]  }
   0x4   :  { %v6135_v7 = vld [vmem:[%s9360_s1 + $0x4] ss:$16 sps:$4 sm:$0xff]   ;;  %168 = vmatpush1.bf16.msra.mxu1 %v144_v6  ;;  %v6138_v10 = vld [vmem:[%s9360_s1] ss:$16 sps:$4 sm:$0xff]   ;;  %374 = vmatpush1.bf16.msra.mxu0 %v350_v8  ;;  %v41_v12 = vld [vmem:[%s9359_s0 + $0x8] sm:$0xf] }
   0x5   :  { %169 = vmatprep.subr.bf16.mxu1 %v6133_v5  ;;  %v6738_v11 = vld [vmem:[%s9359_s0 + $0x4] sm:$0xf]  ;;  %v42_v13 = vld [vmem:[%s9359_s0 + $0xc] sm:$0xf]  ;;  %375 = vmatprep.subr.bf16.mxu0 %v6135_v7  ;;  %v54_v14 = vld [vmem:[%s9359_s0] sm:$0xe] }
   0x6   :  { %v6749_v15 = vcombine.low %v41_v12, %v42_v13  ;;  %v6752_v16 = vcombine.low %v6738_v11, %v41_v12  ;;  %v5215_v17 = vcombine.low %v54_v14, %v6738_v11  ;;  %v6141_v18 = vld [vmem:[%s9360_s1 + $0x6c] ss:$16 sps:$4 sm:$0x3f]   ;;  %v39_v19 = vld [vmem:[%s9359_s0] sm:$0xf]  ;;  %vm775_vm3 = vcmask 1044480  }
   0x7   :  { %v6763_v21 = vcombine.low %v39_v19, %v6738_v11  ;;  %v6144_v22 = vld [vmem:[%s9360_s1 + $0x68] ss:$16 sps:$4 sm:$0x3f]   ;;  %v43_v23 = vld [vmem:[%s9359_s0 + $0x10] sm:$0xf] }
   0x8   :  { %170 = vmatpush1.bf16.msra.mxu1 %v6137_v9  ;;  %v87_v20 = vrot.slane %v6749_v15, 1  ;;  %376 = vmatpush1.bf16.msra.mxu0 %v6138_v10  ;;  %v86_v24 = vrot.slane %v5215_v17, 1  ;;  %v44_v25 = vld [vmem:[%s9359_s0 + $0x14] sm:$0xf]  ;;  %v6778_v26 = vld [vmem:[%s9359_s0 + $0x18] sm:$0xf]  ;;  %v6780_v27 = vcombine.low %v42_v13, %v43_v23 }
   0x9   :  { %5232 = vmatprep.subr.msk.bf16.mxu1 %vm142_vm0, %v6141_v18  ;;  %v150_v28 = vsel %vm142_vm0, %v6144_v22, 0  ;;  %v6783_v29 = vcombine.low %v43_v23, %v44_v25  ;;  %v6786_v30 = vcombine.low %v44_v25, %v6778_v26  ;;  %v6149_v32 = vld [vmem:[%s9360_s1 + $0x4c] ss:$16 sps:$4 sm:$0xff]   ;;  %v6151_v33 = vld [vmem:[%s9360_s1 + $0xa4] ss:$16 sps:$4 sm:$0x3f]   ;;  %v6844_v48 = vcombine.low %v6778_v26, %v6778_v26 }
   0xa   :  { %v88_v31 = vsel %vm85_vm1, %v86_v24, %v87_v20  ;;  %v6147_v35 = vld [vmem:[%s9360_s1 + $0x48] ss:$16 sps:$4 sm:$0xff]   ;;  %v6153_v36 = vld [vmem:[%s9360_s1 + $0xa0] ss:$16 sps:$4 sm:$0x3f]   ;;  %5275 = vmatprep.subr.msk.bf16.mxu0 %vm142_vm0, %v6151_v33  ;;  %v522_v52 = vrot.slane %v6749_v15, 2 }
   0xb   :  { %5228 = vmatmul.mubr.msk.bf16.vlgmr.msra.gmra.mxu1 %vm129_vm2, %v88_v31  ;;  %5248 = vmatmul.mubr.msk.bf16.vlgmr.msra.gmra.mxu0 %vm129_vm2, %v6763_v21  ;;  %v89_v34 = vrot.slane %v6783_v29, 1  ;;  %v55_v37 = vld [vmem:[%s9359_s0 + $0x1c] sm:$0x1]  ;;  %v6156_v38 = vld [vmem:[%s9360_s1 + $0x84] ss:$16 sps:$4 sm:$0xff]   ;;  %v577_v39 = vsel %vm142_vm0, %v6153_v36, 0 }
   0xc   :  { %239 = vmatpush1.bf16.msra.mxu1 %v150_v28  ;;  %197 = vmatprep.mubr.bf16.mxu1 %v6652_v3  ;;  %v6157_v40 = vld [vmem:[%s9360_s1 + $0x2c] ss:$16 sps:$4 sm:$0x3f]   ;;  %v5218_v42 = vcombine.low %v6778_v26, %v55_v37  ;;  %v6154_v43 = vld [vmem:[%s9360_s1 + $0x80] ss:$16 sps:$4 sm:$0xff]   ;;  %v524_v62 = vrot.slane %v6783_v29, 2 }
   0xd   :  { %403 = vmatprep.mubr.bf16.mxu0 %v6652_v3  ;;  %240 = vmatprep.subr.bf16.mxu1 %v6149_v32  ;;  %v90_v41 = vsel %vm85_vm1, %v87_v20, %v89_v34  ;;  %v6165_v44 = vld [vmem:[%s9360_s1 + $0xe4] ss:$16 sps:$4 sm:$0x3f]   ;;  %v503_v47 = vld [vmem:[%s9359_s0] sm:$0xc]  ;;  %v777_v10 = vrot.slane %v6749_v15, 3 }
   0xe   :  { %601 = vmatpush1.bf16.msra.mxu0 %v577_v39  ;;  %v91_v45 = vrot.slane %v5218_v42, 1  ;;  %v5265_v49 = vcombine.low %v503_v47, %v6738_v11  ;;  %v6160_v50 = vld [vmem:[%s9360_s1 + $0x28] ss:$16 sps:$4 sm:$0x3f]   ;;  %v6163_v54 = vld [vmem:[%s9360_s1 + $0xc] ss:$16 sps:$4 sm:$0xff]   ;;  %v6892_v1 = vsel %vm142_vm0, %v522_v52, %v524_v62 }
   0xf   :  { %602 = vmatprep.subr.bf16.mxu0 %v6156_v38  ;;  %v6167_v53 = vld [vmem:[%s9360_s1 + $0xe0] ss:$16 sps:$4 sm:$0x3f]   ;;  %v356_v56 = vsel %vm142_vm0, %v6160_v50, 0  ;;  %v6170_v57 = vld [vmem:[%s9360_s1 + $0xc4] ss:$16 sps:$4 sm:$0xff]  }
  0x10   :  { %241 = vmatpush1.bf16.msra.mxu1 %v6147_v35  ;;  %v92_v46 = vsel %vm85_vm1, %v89_v34, %v91_v45  ;;  %v521_v51 = vrot.slane %v5265_v49, 2  ;;  %v6161_v58 = vld [vmem:[%s9360_s1 + $0x8] ss:$16 sps:$4 sm:$0xff]   ;;  %v504_v59 = vld [vmem:[%s9359_s0 + $0x1c] sm:$0x3]  ;;  %v832_v60 = vsel %vm142_vm0, %v6167_v53, 0 }
  0x11   :  { %5252 = vmatprep.subr.msk.bf16.mxu1 %vm142_vm0, %v6157_v40  ;;  %v6171_v61 = vld [vmem:[%s9360_s1 + $0xac] ss:$16 sps:$4 sm:$0x3f]   ;;  %v6168_v63 = vld [vmem:[%s9360_s1 + $0xc0] ss:$16 sps:$4 sm:$0xff]   ;;  %v5266_v2 = vcombine.low %v6778_v26, %v504_v59  ;;  %v779_v23 = vrot.slane %v6783_v29, 3 }
  0x12   :  { %603 = vmatpush1.bf16.msra.mxu0 %v6154_v43  ;;  %v6863_v55 = vsel %vm142_vm0, %v521_v51, %v522_v52  ;;  %v6179_v0 = vld [vmem:[%s9360_s1 + $0x124] ss:$16 sps:$4 sm:$0x3f]   ;;  %v758_v6 = vld [vmem:[%s9359_s0] sm:$0x8] }
  0x13   :  { %5229 = vmatmul.mubr.msk.bf16.gmra.mxu1 %vm129_vm2, %v90_v41  ;;  %5249 = vmatmul.mubr.msk.bf16.gmra.mxu0 %vm129_vm2, %v6749_v15  ;;  %v6901_v4 = vrot.slane %v5266_v2, 2  ;;  %v5293_v7 = vcombine.low %v758_v6, %v6738_v11  ;;  %v6174_v8 = vld [vmem:[%s9360_s1 + $0xa8] ss:$16 sps:$4 sm:$0x3f]   ;;  %v6177_v12 = vld [vmem:[%s9360_s1 + $0x8c] ss:$16 sps:$4 sm:$0xff]   ;;  %v780_v24 = vsel %vm775_vm3, %v777_v10, %v779_v23 }
  0x14   :  { %207 = vmatprep.mubr.bf16.mxu1 %v6652_v3  ;;  %413 = vmatprep.mubr.bf16.mxu0 %v6652_v3  ;;  %v6181_v11 = vld [vmem:[%s9360_s1 + $0x120] ss:$16 sps:$4 sm:$0x3f]   ;;  %v583_v14 = vsel %vm142_vm0, %v6174_v8, 0  ;;  %v6184_v17 = vld [vmem:[%s9360_s1 + $0x104] ss:$16 sps:$4 sm:$0xff]  }
  0x15   :  { %5303 = vmatprep.subr.msk.bf16.mxu0 %vm142_vm0, %v6165_v44  ;;  %v6906_v5 = vsel %vm142_vm0, %v524_v62, %v6901_v4  ;;  %v776_v9 = vrot.slane %v5293_v7, 3  ;;  %v6175_v18 = vld [vmem:[%s9360_s1 + $0x88] ss:$16 sps:$4 sm:$0xff]   ;;  %v759_v19 = vld [vmem:[%s9359_s0 + $0x1c] sm:$0x7]  ;;  %v1078_v20 = vsel %vm142_vm0, %v6181_v11, 0 }
  0x16   :  { %v6185_v22 = vld [vmem:[%s9360_s1 + $0xec] ss:$16 sps:$4 sm:$0x3f]   ;;  %v5294_v25 = vcombine.low %v6778_v26, %v759_v19  ;;  %v6190_v32 = vld [vmem:[%s9360_s1 + $0xc8] ss:$16 sps:$4 sm:$0xff]  }
  0x17   :  { %v6933_v13 = vsel %vm775_vm3, %v776_v9, %v777_v10  ;;  %v6192_v26 = vld [vmem:[%s9360_s1 + $0xcc] ss:$16 sps:$4 sm:$0xff]  }
  0x18   :  { %v781_v28 = vrot.slane %v5294_v25, 3  ;;  %v6195_v33 = vld [vmem:[%s9360_s1 + $0x12c] ss:$16 sps:$4 sm:$0x3f]  }
  0x1b   :  { %5230 = vmatmul.mubr.msk.bf16.gmra.mxu1 %vm129_vm2, %v92_v46  ;;  %5250 = vmatmul.mubr.msk.bf16.gmra.mxu0 %vm129_vm2, %v6783_v29 }
  0x1c   :  { %217 = vmatprep.mubr.bf16.mxu1 %v6652_v3  ;;  %423 = vmatprep.mubr.bf16.mxu0 %v6652_v3 }
  0x23   :  { %5231 = vmatmul.mubr.msk.bf16.gmra.mxu1 %vm129_vm2, %v91_v45  ;;  %5251 = vmatmul.mubr.msk.bf16.gmra.mxu0 %vm129_vm2, %v6844_v48 }
  0x24   :  { %258 = vmatprep.mubr.bf16.mxu1 %v6652_v3  ;;  %620 = vmatprep.mubr.bf16.mxu0 %v6652_v3 }
  0x2b   :  { %5233 = vmatmul.mubr.msk.bf16.vlgmr.msra.gmra.mxu1 %vm129_vm2, %v88_v31  ;;  %5276 = vmatmul.mubr.msk.bf16.vlgmr.msra.gmra.mxu0 %vm129_vm2, %v6863_v55  ;;  %v782_v31 = vsel %vm775_vm3, %v779_v23, %v781_v28 }
  0x2c   :  { %445 = vmatpush1.bf16.msra.mxu1 %v356_v56  ;;  %268 = vmatprep.mubr.bf16.mxu1 %v6652_v3 }
  0x2d   :  { %630 = vmatprep.mubr.bf16.mxu0 %v6652_v3  ;;  %446 = vmatprep.subr.bf16.mxu1 %v6163_v54 }
  0x2e   :  { %856 = vmatpush1.bf16.msra.mxu0 %v832_v60 }
  0x2f   :  { %857 = vmatprep.subr.bf16.mxu0 %v6170_v57 }
  0x30   :  { %447 = vmatpush1.bf16.msra.mxu1 %v6161_v58 }
  0x31   :  { %5280 = vmatprep.subr.msk.bf16.mxu1 %vm142_vm0, %v6171_v61 }
  0x32   :  { %858 = vmatpush1.bf16.msra.mxu0 %v6168_v63 }
  0x33   :  { %5234 = vmatmul.mubr.msk.bf16.gmra.mxu1 %vm129_vm2, %v90_v41  ;;  %5277 = vmatmul.mubr.msk.bf16.gmra.mxu0 %vm129_vm2, %v6892_v1 }
  0x34   :  { %278 = vmatprep.mubr.bf16.mxu1 %v6652_v3  ;;  %640 = vmatprep.mubr.bf16.mxu0 %v6652_v3 }
  0x35   :  { %5333 = vmatprep.subr.msk.bf16.mxu0 %vm142_vm0, %v6179_v0 }
  0x3b   :  { %5235 = vmatmul.mubr.msk.bf16.gmra.mxu1 %vm129_vm2, %v92_v46  ;;  %5278 = vmatmul.mubr.msk.bf16.gmra.mxu0 %vm129_vm2, %v6906_v5 }
  0x3c   :  { %288 = vmatprep.mubr.bf16.mxu1 %v6652_v3  ;;  %650 = vmatprep.mubr.bf16.mxu0 %v6652_v3 }
  0x43   :  { %5236 = vmatmul.mubr.msk.bf16.gmra.mxu1 %vm129_vm2, %v91_v45  ;;  %5279 = vmatmul.mubr.msk.bf16.gmra.mxu0 %vm129_vm2, %v6901_v4 }
  0x44   :  { %464 = vmatprep.mubr.bf16.mxu1 %v6652_v3  ;;  %875 = vmatprep.mubr.bf16.mxu0 %v6652_v3 }
  0x4b   :  { %5253 = vmatmul.mubr.msk.bf16.vlgmr.msra.gmra.mxu1 %vm129_vm2, %v6763_v21  ;;  %5304 = vmatmul.mubr.msk.bf16.vlgmr.msra.gmra.mxu0 %vm129_vm2, %v6933_v13  ;;  %v6182_v21 = vld [vmem:[%s9360_s1 + $0x100] ss:$16 sps:$4 sm:$0xff]  }
  0x4c   :  { %672 = vmatpush1.bf16.msra.mxu1 %v583_v14  ;;  %474 = vmatprep.mubr.bf16.mxu1 %v6652_v3 }
  0x4d   :  { %885 = vmatprep.mubr.bf16.mxu0 %v6652_v3  ;;  %673 = vmatprep.subr.bf16.mxu1 %v6177_v12 }
  0x4e   :  { %1102 = vmatpush1.bf16.msra.mxu0 %v1078_v20 }
  0x4f   :  { %1103 = vmatprep.subr.bf16.mxu0 %v6184_v17 }
  0x50   :  { %674 = vmatpush1.bf16.msra.mxu1 %v6175_v18 }
  0x51   :  { %5308 = vmatprep.subr.msk.bf16.mxu1 %vm142_vm0, %v6185_v22 }
  0x52   :  { %1104 = vmatpush1.bf16.msra.mxu0 %v6182_v21 }
  0x53   :  { %5254 = vmatmul.mubr.msk.bf16.gmra.mxu1 %vm129_vm2, %v6749_v15  ;;  %5305 = vmatmul.mubr.msk.bf16.gmra.mxu0 %vm129_vm2, %v780_v24  ;;  %v6188_v15 = vld [vmem:[%s9360_s1 + $0xe8] ss:$16 sps:$4 sm:$0x3f]  }
  0x54   :  { %484 = vmatprep.mubr.bf16.mxu1 %v6652_v3  ;;  %895 = vmatprep.mubr.bf16.mxu0 %v6652_v3 }
  0x5b   :  { %5255 = vmatmul.mubr.msk.bf16.gmra.mxu1 %vm129_vm2, %v6783_v29  ;;  %5306 = vmatmul.mubr.msk.bf16.gmra.mxu0 %vm129_vm2, %v782_v31  ;;  %v838_v29 = vsel %vm142_vm0, %v6188_v15, 0 }
  0x5c   :  { %494 = vmatprep.mubr.bf16.mxu1 %v6652_v3  ;;  %905 = vmatprep.mubr.bf16.mxu0 %v6652_v3 }
  0x63   :  { %5256 = vmatmul.mubr.msk.bf16.gmra.mxu1 %vm129_vm2, %v6844_v48  ;;  %5307 = vmatmul.mubr.msk.bf16.gmra.mxu0 %vm129_vm2, %v781_v28 }
  0x64   :  { %691 = vmatprep.mubr.bf16.mxu1 %v6652_v3  ;;  %1121 = vmatprep.mubr.bf16.mxu0 %v6652_v3 }
  0x6b   :  { %5281 = vmatmul.mubr.msk.bf16.vlgmr.msra.gmra.mxu1 %vm129_vm2, %v6863_v55  ;;  %5334 = vmatmul.mubr.msk.bf16.vlgmr.msra.gmra.mxu0 %vm129_vm2, %v6752_v16 }
  0x6c   :  { %927 = vmatpush1.bf16.msra.mxu1 %v838_v29  ;;  %701 = vmatprep.mubr.bf16.mxu1 %v6652_v3 }
  0x6d   :  { %1131 = vmatprep.mubr.bf16.mxu0 %v6652_v3  ;;  %928 = vmatprep.subr.bf16.mxu1 %v6192_v26 }
  0x70   :  { %929 = vmatpush1.bf16.msra.mxu1 %v6190_v32 }
  0x71   :  { %5338 = vmatprep.subr.msk.bf16.mxu1 %vm142_vm0, %v6195_v33 }
  0x73   :  { %5282 = vmatmul.mubr.msk.bf16.gmra.mxu1 %vm129_vm2, %v6892_v1  ;;  %5335 = vmatmul.mubr.msk.bf16.gmra.mxu0 %vm129_vm2, %v6780_v27 }
  0x74   :  { %711 = vmatprep.mubr.bf16.mxu1 %v6652_v3  ;;  %1141 = vmatprep.mubr.bf16.mxu0 %v6652_v3 }
  0x7b   :  { %5283 = vmatmul.mubr.msk.bf16.gmra.mxu1 %vm129_vm2, %v6906_v5  ;;  %5336 = vmatmul.mubr.msk.bf16.gmra.mxu0 %vm129_vm2, %v6786_v30 }
  0x7c   :  { %721 = vmatprep.mubr.bf16.mxu1 %v6652_v3  ;;  %1151 = vmatprep.mubr.bf16.mxu0 %v6652_v3 }
  0x7d   :  { %14 = vsyncpa [#allocation6], 0  ;;  %v6194_v34 = vld [vmem:[%s9359_s0 + $0x1c] ss:$0 sps:$4 sm:$0xff]   ;;  %v6198_v38 = vld [vmem:[%s9360_s1 + $0x108] ss:$16 sps:$4 sm:$0xff]  }
  0x7e   :  { %v6197_v35 = vld [vmem:[%s9360_s1 + $0x128] ss:$16 sps:$4 sm:$0x3f]   ;;  %v6200_v37 = vld [vmem:[%s9360_s1 + $0x10c] ss:$16 sps:$4 sm:$0xff]   ;;  %vm34_vm4 = vcmask 1041408  }
  0x7f   :  { %v1084_v36 = vsel %vm142_vm0, %v6197_v35, 0  ;;  %v6203_v29 = vld [vmem:[%s9363_s4 + $0x2a4] ss:$16 sps:$4 sm:$0xff]   ;;  %v6206_v32 = vld [vmem:[%s9363_s4 + $0x2ac] ss:$16 sps:$4 sm:$0xff]   ;;  %vm35_vm5 = vcmask 783364  }
  0x80   :  { %v6201_v33 = vld [vmem:[%s9363_s4 + $0x2a0] ss:$16 sps:$4 sm:$0xff]   ;;  %2191 = vmatprep.subr.bf16.mxu0 %v6203_v29  ;;  %vm36_vm6 = vmor %vm35_vm5, %vm34_vm4  ;;  %vm1507_vm7 = vcmask 1042434   ;;  %vm1508_vm8 = vcmask 784390   ;;  %vm1529_vm9 = vcmask 1043459   ;;  %vm1530_vm10 = vcmask 785415  }
  0x81   :  { %2192 = vmatpush1.bf16.msra.mxu0 %v6201_v33  ;;  %v6225_v33 = vld [vmem:[%s9363_s4 + $0x220] ss:$16 sps:$4 sm:$0xff]   ;;  %37 = vst.msk [vmem:[#allocation3] sm:$0x33] %vm36_vm6, %v6652_v3  ;;  %38 = vst.msk [vmem:[#allocation3 + $0x20] sm:$0x33] %vm36_vm6, %v6652_v3 }
  0x82   :  { %vm1548_vm11 = vcmask 1040384   ;;  %vm1549_vm12 = vcmask 782340   ;;  %vm1571_vm13 = vcmask 1041409   ;;  %vm1572_vm14 = vcmask 783365   ;;  %vm7627_vm15 = vmor %vm1508_vm8, %vm1507_vm7 }
  0x83   :  { %5284 = vmatmul.mubr.msk.bf16.gmra.mxu1 %vm129_vm2, %v6901_v4  ;;  %5337 = vmatmul.mubr.msk.bf16.gmra.mxu0 %vm129_vm2, %v6194_v34  ;;  %vm7643_vm4 = vmor %vm1549_vm12, %vm1548_vm11  ;;  %vm2184_vm6 = vcmask 785408  }
  0x84   :  { %946 = vmatprep.mubr.bf16.mxu1 %v6652_v3  ;;  %vm7661_vm5 = vmor %vm1572_vm14, %vm1571_vm13 }
  0x8b   :  { %5309 = vmatmul.mubr.msk.bf16.vlgmr.msra.gmra.mxu1 %vm129_vm2, %v6933_v13 }
  0x8c   :  { %1173 = vmatpush1.bf16.msra.mxu1 %v1084_v36  ;;  %956 = vmatprep.mubr.bf16.mxu1 %v6652_v3 }
  0x8d   :  { %1174 = vmatprep.subr.bf16.mxu1 %v6200_v37 }
  0x90   :  { %1175 = vmatpush1.bf16.msra.mxu1 %v6198_v38 }
  0x91   :  { %2244 = vmatprep.subr.bf16.mxu1 %v6206_v32 }
  0x93   :  { %5310 = vmatmul.mubr.msk.bf16.gmra.mxu1 %vm129_vm2, %v780_v24 }
  0x94   :  { %966 = vmatprep.mubr.bf16.mxu1 %v6652_v3 }
  0x9b   :  { %5311 = vmatmul.mubr.msk.bf16.gmra.mxu1 %vm129_vm2, %v782_v31 }
  0x9c   :  { %976 = vmatprep.mubr.bf16.mxu1 %v6652_v3 }
  0xa3   :  { %5312 = vmatmul.mubr.msk.bf16.gmra.mxu1 %vm129_vm2, %v781_v28 }
  0xa4   :  { %1192 = vmatprep.mubr.bf16.mxu1 %v6652_v3 }
  0xab   :  { %5339 = vmatmul.mubr.msk.bf16.vlgmr.msra.gmra.mxu1 %vm129_vm2, %v6752_v16 }
  0xac   :  { %1202 = vmatprep.mubr.bf16.mxu1 %v6652_v3 }
  0xb3   :  { %5340 = vmatmul.mubr.msk.bf16.gmra.mxu1 %vm129_vm2, %v6780_v27 }
  0xb4   :  { %1212 = vmatprep.mubr.bf16.mxu1 %v6652_v3 }
  0xbb   :  { %5341 = vmatmul.mubr.msk.bf16.gmra.mxu1 %vm129_vm2, %v6786_v30 }
  0xbc   :  { %1222 = vmatprep.mubr.bf16.mxu1 %v6652_v3  ;;  %v6237_v3 = vld [vmem:[%s9363_s4 + $0x1e0] ss:$16 sps:$4 sm:$0xff]  }
  0xc3   :  { %5342 = vmatmul.mubr.msk.bf16.gmra.mxu1 %vm129_vm2, %v6194_v34  ;;  %v6204_v34 = vld [vmem:[%s9363_s4 + $0x2a8] ss:$16 sps:$4 sm:$0xff]   ;;  %vm7635_vm2 = vmor %vm1530_vm10, %vm1529_vm9 }
  0xc4   :  { %2245 = vmatpush1.bf16.msra.mxu1 %v6204_v34  ;;  %v6228_v34 = vld [vmem:[%s9363_s4 + $0x228] ss:$16 sps:$4 sm:$0xff]  }
  0xcb   :  { %v189_v39 = vpop.f32.mrf.mxu1  ;;  %v395_v40 = vpop.f32.mrf.mxu0 }
  0xcc   :  { %v7046_v41 = vadd.f32 %v395_v40, %v189_v39  ;;  %v6209_v39 = vld [vmem:[%s9363_s4 + $0x284] ss:$16 sps:$4 sm:$0xff]   ;;  %v6212_v40 = vld [vmem:[%s9363_s4 + $0x28c] ss:$16 sps:$4 sm:$0xff]  }
  0xcd   :  { %v191_v42 = vpop.f32.mrf.mxu1  ;;  %v397_v16 = vpop.f32.mrf.mxu0  ;;  %2193 = vmatprep.subr.bf16.mxu0 %v6209_v39  ;;  %2246 = vmatprep.subr.bf16.mxu1 %v6212_v40 }
  0xce   :  { %v7048_v43 = vadd.f32 %v397_v16, %v191_v42  ;;  %v6207_v42 = vld [vmem:[%s9363_s4 + $0x280] ss:$16 sps:$4 sm:$0xff]   ;;  %v6210_v16 = vld [vmem:[%s9363_s4 + $0x288] ss:$16 sps:$4 sm:$0xff]  }
  0xcf   :  { %v193_v44 = vpop.f32.mrf.mxu1  ;;  %v399_v45 = vpop.f32.mrf.mxu0  ;;  %2194 = vmatpush1.bf16.msra.mxu0 %v6207_v42  ;;  %2247 = vmatpush1.bf16.msra.mxu1 %v6210_v16  ;;  %v6233_v42 = vld [vmem:[%s9363_s4 + $0x204] ss:$16 sps:$4 sm:$0xff]   ;;  %v6236_v16 = vld [vmem:[%s9363_s4 + $0x20c] ss:$16 sps:$4 sm:$0xff]  }
  0xd0   :  { %v7050_v27 = vadd.f32 %v399_v45, %v193_v44 }
  0xd1   :  { %v7052_v46 = vpop.f32.mrf.mxu1  ;;  %v7054_v47 = vpop.f32.mrf.mxu0 }
  0xd3   :  { %v199_v30 = vpop.f32.mrf.mxu1  ;;  %v405_v48 = vpop.f32.mrf.mxu0 }
  0xd4   :  { %v7056_v49 = vadd.f32 %v405_v48, %v199_v30 }
  0xd5   :  { %v201_v50 = vpop.f32.mrf.mxu1  ;;  %v407_v51 = vpop.f32.mrf.mxu0 }
  0xd6   :  { %v7058_v52 = vadd.f32 %v407_v51, %v201_v50  ;;  %v6215_v50 = vld [vmem:[%s9363_s4 + $0x264] ss:$16 sps:$4 sm:$0xff]   ;;  %v6218_v51 = vld [vmem:[%s9363_s4 + $0x26c] ss:$16 sps:$4 sm:$0xff]  }
  0xd7   :  { %v203_v53 = vpop.f32.mrf.mxu1  ;;  %v409_v54 = vpop.f32.mrf.mxu0  ;;  %2195 = vmatprep.subr.bf16.mxu0 %v6215_v50  ;;  %2248 = vmatprep.subr.bf16.mxu1 %v6218_v51 }
  0xd8   :  { %v7060_v55 = vadd.f32 %v409_v54, %v203_v53  ;;  %v6213_v53 = vld [vmem:[%s9363_s4 + $0x260] ss:$16 sps:$4 sm:$0xff]   ;;  %v6216_v54 = vld [vmem:[%s9363_s4 + $0x268] ss:$16 sps:$4 sm:$0xff]  }
  0xd9   :  { %v7062_v56 = vpop.f32.mrf.mxu1  ;;  %v7064_v57 = vpop.f32.mrf.mxu0  ;;  %2196 = vmatpush1.bf16.msra.mxu0 %v6213_v53  ;;  %2249 = vmatpush1.bf16.msra.mxu1 %v6216_v54  ;;  %v6231_v53 = vld [vmem:[%s9363_s4 + $0x200] ss:$16 sps:$4 sm:$0xff]   ;;  %v6234_v54 = vld [vmem:[%s9363_s4 + $0x208] ss:$16 sps:$4 sm:$0xff]  }
  0xdb   :  { %v209_v58 = vpop.f32.mrf.mxu1  ;;  %v415_v59 = vpop.f32.mrf.mxu0 }
  0xdc   :  { %v7066_v60 = vadd.f32 %v415_v59, %v209_v58 }
  0xdd   :  { %v211_v61 = vpop.f32.mrf.mxu1  ;;  %v417_v62 = vpop.f32.mrf.mxu0 }
  0xde   :  { %v7068_v63 = vadd.f32 %v417_v62, %v211_v61 }
  0xdf   :  { %v213_v0 = vpop.f32.mrf.mxu1  ;;  %v419_v1 = vpop.f32.mrf.mxu0 }
  0xe0   :  { %v7070_v2 = vadd.f32 %v419_v1, %v213_v0  ;;  %v6221_v0 = vld [vmem:[%s9363_s4 + $0x244] ss:$16 sps:$4 sm:$0xff]   ;;  %v6224_v1 = vld [vmem:[%s9363_s4 + $0x24c] ss:$16 sps:$4 sm:$0xff]  }
  0xe1   :  { %v7072_v4 = vpop.f32.mrf.mxu1  ;;  %v7074_v5 = vpop.f32.mrf.mxu0  ;;  %2197 = vmatprep.subr.bf16.mxu0 %v6221_v0  ;;  %2250 = vmatprep.subr.bf16.mxu1 %v6224_v1 }
  0xe3   :  { %v219_v6 = vpop.f32.mrf.mxu1  ;;  %v425_v7 = vpop.f32.mrf.mxu0 }
  0xe4   :  { %v7076_v8 = vadd.f32 %v425_v7, %v219_v6  ;;  %v6219_v6 = vld [vmem:[%s9363_s4 + $0x240] ss:$16 sps:$4 sm:$0xff]   ;;  %v6222_v7 = vld [vmem:[%s9363_s4 + $0x248] ss:$16 sps:$4 sm:$0xff]  }
  0xe5   :  { %v221_v9 = vpop.f32.mrf.mxu1  ;;  %v427_v10 = vpop.f32.mrf.mxu0  ;;  %2198 = vmatpush1.bf16.msra.mxu0 %v6219_v6  ;;  %2251 = vmatpush1.bf16.msra.mxu1 %v6222_v7 }
  0xe6   :  { %v7078_v11 = vadd.f32 %v427_v10, %v221_v9 }
  0xe7   :  { %v223_v12 = vpop.f32.mrf.mxu1  ;;  %v429_v13 = vpop.f32.mrf.mxu0 }
  0xe9   :  { %v224_v14 = vpop.f32.mrf.mxu1  ;;  %v430_v17 = vpop.f32.mrf.mxu0 }
  0xea   :  { %v6227_v14 = vld [vmem:[%s9363_s4 + $0x224] ss:$16 sps:$4 sm:$0xff]   ;;  %v6230_v17 = vld [vmem:[%s9363_s4 + $0x22c] ss:$16 sps:$4 sm:$0xff]  }
  0xeb   :  { %v7080_v18 = vpop.f32.mrf.mxu1  ;;  %v7082_v19 = vpop.f32.mrf.mxu0  ;;  %2199 = vmatprep.subr.bf16.mxu0 %v6227_v14  ;;  %2252 = vmatprep.subr.bf16.mxu1 %v6230_v17  ;;  %v6239_v14 = vld [vmem:[%s9363_s4 + $0x1e4] ss:$16 sps:$4 sm:$0xff]  }
  0xec   :  { %2200 = vmatpush1.bf16.msra.mxu0 %v6225_v33  ;;  %2253 = vmatpush1.bf16.msra.mxu1 %v6228_v34 }
  0xed   :  { %v7084_v20 = vpop.f32.mrf.mxu1  ;;  %v7086_v22 = vpop.f32.mrf.mxu0  ;;  %2201 = vmatprep.subr.bf16.mxu0 %v6233_v42  ;;  %2254 = vmatprep.subr.bf16.mxu1 %v6236_v16 }
  0xef   :  { %v7088_v23 = vpop.f32.mrf.mxu1  ;;  %v7090_v21 = vpop.f32.mrf.mxu0 }
  0xf0   :  { %2202 = vmatpush1.bf16.msra.mxu0 %v6231_v53  ;;  %2255 = vmatpush1.bf16.msra.mxu1 %v6234_v54 }
  0xf1   :  { %v7092_v24 = vpop.f32.mrf.mxu1  ;;  %v7094_v25 = vpop.f32.mrf.mxu0  ;;  %2203 = vmatprep.subr.bf16.mxu0 %v6239_v14 }
  0xf2   :  { %9387 = vst [vmem:[#allocation8_spill] sm:$0xff] %v7092_v24 }
  0xf3   :  { %v7096_v28 = vpop.f32.mrf.mxu1  ;;  %v7098_v31 = vpop.f32.mrf.mxu0 }
  0xf4   :  { %2204 = vmatpush1.bf16.msra.mxu0 %v6237_v3 }
  0xf5   :  { %v7100_v15 = vpop.f32.mrf.mxu1  ;;  %v7102_v26 = vpop.f32.mrf.mxu0 }
  0xf7   :  { %v7116_v35 = vpop.f32.mrf.mxu1  ;;  %v7118_v36 = vpop.f32.mrf.mxu0 }
  0xf9   :  { %v7120_v37 = vpop.f32.mrf.mxu1  ;;  %v7122_v38 = vpop.f32.mrf.mxu0 }
  0xfa   :  { %9388 = vst [vmem:[#allocation9_spill] sm:$0xff] %v7120_v37  ;;  %v730_v37 = vadd.f32 %v7082_v19, %v7046_v41  ;;  %v6282_v41 = vld [vmem:[%s9363_s4 + $0x2c8] ss:$16 sps:$4 sm:$0xff]   ;;  %v731_v19 = vadd.f32 %v7086_v22, %v7048_v43 }
  0xfb   :  { %v7136_v44 = vpop.f32.mrf.mxu1  ;;  %v7138_v45 = vpop.f32.mrf.mxu0 }
  0xfd   :  { %v7140_v30 = vpop.f32.mrf.mxu1  ;;  %v7142_v48 = vpop.f32.mrf.mxu0 }
  0xfe   :  { %9389 = vst [vmem:[#allocation10_spill] sm:$0xff] %v7140_v30  ;;  %v6272_v30 = vld [vmem:[%s9363_s4 + $0x30c] ss:$16 sps:$4 sm:$0xff]  }
  0xff   :  { %v7156_v58 = vpop.f32.mrf.mxu1  ;;  %v7158_v59 = vpop.f32.mrf.mxu0 }
 0x101   :  { %v7160_v61 = vpop.f32.mrf.mxu1  ;;  %v7162_v62 = vpop.f32.mrf.mxu0 }
 0x102   :  { %9390 = vst [vmem:[#allocation11_spill] sm:$0xff] %v7160_v61 }
 0x103   :  { %v7176_v9 = vpop.f32.mrf.mxu1  ;;  %v7178_v10 = vpop.f32.mrf.mxu0 }
 0x105   :  { %v7180_v12 = vpop.f32.mrf.mxu1  ;;  %v7182_v13 = vpop.f32.mrf.mxu0 }
 0x106   :  { %9391 = vst [vmem:[#allocation12_spill] sm:$0xff] %v7180_v12  ;;  %v6266_v12 = vld [vmem:[%s9363_s4 + $0x32c] ss:$16 sps:$4 sm:$0xff]  }
 0x107   :  { %v294_v29 = vpop.f32.mrf.mxu1  ;;  %v656_v32 = vpop.f32.mrf.mxu0 }
 0x109   :  { %v295_v39 = vpop.f32.mrf.mxu1  ;;  %v657_v40 = vpop.f32.mrf.mxu0 }
 0x10a   :  { %v6245_v39 = vld [vmem:[%s9363_s4 + $0x1c4] ss:$16 sps:$4 sm:$0xff]   ;;  %v6248_v40 = vld [vmem:[%s9363_s4 + $0x1cc] ss:$16 sps:$4 sm:$0xff]  }
 0x10b   :  { %v466_v50 = vpop.f32.mrf.mxu1  ;;  %v7202_v51 = vpop.f32.mrf.mxu0  ;;  %2205 = vmatprep.subr.bf16.mxu0 %v6245_v39 }
 0x10c   :  { %v7211_v0 = vadd.f32 %v466_v50, %v7080_v18  ;;  %v6242_v18 = vld [vmem:[%s9363_s4 + $0x1ec] ss:$16 sps:$4 sm:$0xff]   ;;  %v6246_v50 = vld [vmem:[%s9363_s4 + $0x1c8] ss:$16 sps:$4 sm:$0xff]  }
 0x10d   :  { %v468_v1 = vpop.f32.mrf.mxu1  ;;  %v7215_v6 = vpop.f32.mrf.mxu0  ;;  %2256 = vmatprep.subr.bf16.mxu1 %v6242_v18  ;;  %v6251_v18 = vld [vmem:[%s9363_s4 + $0x364] ss:$16 sps:$4 sm:$0xff]  }
 0x10e   :  { %v7218_v7 = vadd.f32 %v468_v1, %v7084_v20  ;;  %v6240_v20 = vld [vmem:[%s9363_s4 + $0x1e8] ss:$16 sps:$4 sm:$0xff]   ;;  %v986_v43 = vadd.f32 %v7215_v6, %v731_v19  ;;  %v6291_v6 = vld [vmem:[%s9363_s4 + $0xe4] ss:$16 sps:$4 sm:$0xff]  }
 0x10f   :  { %v470_v17 = vpop.f32.mrf.mxu1  ;;  %v7226_v29 = vpop.f32.mrf.mxu0  ;;  %2257 = vmatpush1.bf16.msra.mxu1 %v6240_v20  ;;  %v6249_v20 = vld [vmem:[%s9363_s4 + $0x360] ss:$16 sps:$4 sm:$0xff]  }
 0x110   :  { %v7235_v32 = vadd.f32 %v470_v17, %v7088_v23  ;;  %v6243_v23 = vld [vmem:[%s9363_s4 + $0x1c0] ss:$16 sps:$4 sm:$0xff]   ;;  %2258 = vmatprep.subr.bf16.mxu1 %v6248_v40  ;;  %v6254_v17 = vld [vmem:[%s9363_s4 + $0x36c] ss:$16 sps:$4 sm:$0xff]  }
 0x111   :  { %v7237_v33 = vpop.f32.mrf.mxu1  ;;  %v7239_v34 = vpop.f32.mrf.mxu0  ;;  %2206 = vmatpush1.bf16.msra.mxu0 %v6243_v23  ;;  %v6257_v23 = vld [vmem:[%s9363_s4 + $0x344] ss:$16 sps:$4 sm:$0xff]  }
 0x112   :  { %9392 = vst [vmem:[#allocation13_spill] sm:$0xff] %v7235_v32  ;;  %9393 = vst [vmem:[#allocation14_spill] sm:$0xff] %v7237_v33  ;;  %2211 = vmatprep.subr.bf16.mxu0 %v6251_v18  ;;  %v6258_v18 = vld [vmem:[%s9363_s4 + $0x348] ss:$16 sps:$4 sm:$0xff]  }
 0x113   :  { %v476_v42 = vpop.f32.mrf.mxu1  ;;  %v7247_v16 = vpop.f32.mrf.mxu0  ;;  %2259 = vmatpush1.bf16.msra.mxu1 %v6246_v50  ;;  %v6260_v50 = vld [vmem:[%s9363_s4 + $0x34c] ss:$16 sps:$4 sm:$0xff]  }
 0x114   :  { %v7256_v53 = vadd.f32 %v476_v42, %v7096_v28  ;;  %2264 = vmatprep.subr.bf16.mxu1 %v6254_v17 }
 0x115   :  { %v478_v54 = vpop.f32.mrf.mxu1  ;;  %v7258_v1 = vpop.f32.mrf.mxu0  ;;  %2212 = vmatpush2.bf16.msra.mxu0 %v6249_v20 }
 0x116   :  { %9394 = vst [vmem:[#allocation15_spill] sm:$0xff] %v7256_v53  ;;  %v7261_v14 = vadd.f32 %v478_v54, %v7100_v15  ;;  %v6252_v15 = vld [vmem:[%s9363_s4 + $0x368] ss:$16 sps:$4 sm:$0xff]   ;;  %2213 = vmatprep.subr.bf16.mxu0 %v6257_v23  ;;  %v6261_v23 = vld [vmem:[%s9363_s4 + $0x320] ss:$16 sps:$4 sm:$0xff]  }
 0x117   :  { %v480_v28 = vpop.f32.mrf.mxu1  ;;  %v7269_v3 = vpop.f32.mrf.mxu0  ;;  %2265 = vmatpush2.bf16.msra.mxu1 %v6252_v15  ;;  %v1261_v15 = vlaneseq }
 0x118   :  { %9395 = vst [vmem:[#allocation16_spill] sm:$0xff] %v7261_v14  ;;  %v7278_v39 = vadd.f32 %v480_v28, %v7116_v35  ;;  %v6255_v35 = vld [vmem:[%s9363_s4 + $0x340] ss:$16 sps:$4 sm:$0xff]   ;;  %2266 = vmatprep.subr.bf16.mxu1 %v6260_v50  ;;  %v6264_v50 = vld [vmem:[%s9363_s4 + $0x328] ss:$16 sps:$4 sm:$0xff]  }
 0x119   :  { %v7280_v40 = vpop.f32.mrf.mxu1  ;;  %v7282_v42 = vpop.f32.mrf.mxu0  ;;  %2214 = vmatpush2.bf16.msra.mxu0 %v6255_v35 }
 0x11a   :  { %9396 = vst [vmem:[#allocation17_spill] sm:$0xff] %v7278_v39  ;;  %9397 = vst [vmem:[#allocation18_spill] sm:$0xff] %v7280_v40  ;;  %v6263_v39 = vld [vmem:[%s9363_s4 + $0x324] ss:$16 sps:$4 sm:$0xff]   ;;  %v7373_v40 = vld [vmem:[%s9361_s2] sm:$0xf] }
 0x11b   :  { %v486_v54 = vpop.f32.mrf.mxu1  ;;  %v7290_v14 = vpop.f32.mrf.mxu0  ;;  %2267 = vmatpush2.bf16.msra.mxu1 %v6258_v18  ;;  %2215 = vmatprep.subr.bf16.mxu0 %v6263_v39  ;;  %v6270_v39 = vld [vmem:[%s9363_s4 + $0x308] ss:$16 sps:$4 sm:$0xff]  }
 0x11c   :  { %v7299_v17 = vadd.f32 %v486_v54, %v7136_v44  ;;  %2268 = vmatprep.subr.bf16.mxu1 %v6266_v12  ;;  %v6267_v12 = vld [vmem:[%s9363_s4 + $0x300] ss:$16 sps:$4 sm:$0xff]  }
 0x11d   :  { %v7301_v28 = vpop.f32.mrf.mxu1  ;;  %v7303_v20 = vpop.f32.mrf.mxu0  ;;  %2216 = vmatpush2.bf16.msra.mxu0 %v6261_v23  ;;  %v6275_v23 = vld [vmem:[%s9363_s4 + $0x2e4] ss:$16 sps:$4 sm:$0xff]  }
 0x11e   :  { %9398 = vst [vmem:[#allocation19_spill] sm:$0xff] %v7299_v17  ;;  %9399 = vst [vmem:[#allocation20_spill] sm:$0xff] %v7301_v28  ;;  %v7326_v17 = vshrl.u32 %v1261_v15, 7  ;;  %v6269_v28 = vld [vmem:[%s9363_s4 + $0x304] ss:$16 sps:$4 sm:$0xff]  }
 0x11f   :  { %v490_v61 = vpop.f32.mrf.mxu1  ;;  %v7311_v44 = vpop.f32.mrf.mxu0  ;;  %2269 = vmatpush2.bf16.msra.mxu1 %v6264_v50  ;;  %2217 = vmatprep.subr.bf16.mxu0 %v6269_v28  ;;  %v6278_v50 = vld [vmem:[%s9363_s4 + $0x2ec] ss:$16 sps:$4 sm:$0xff]  }
 0x120   :  { %v7320_v54 = vadd.f32 %v490_v61, %v7156_v58  ;;  %2270 = vmatprep.subr.bf16.mxu1 %v6272_v30  ;;  %v6276_v30 = vld [vmem:[%s9363_s4 + $0x2e8] ss:$16 sps:$4 sm:$0xff]   ;;  %v7362_v28 = vsub.s32 0, %v7326_v17 }
 0x121   :  { %v7322_v35 = vpop.f32.mrf.mxu1  ;;  %v7324_v18 = vpop.f32.mrf.mxu0  ;;  %2218 = vmatpush2.bf16.msra.mxu0 %v6267_v12  ;;  %v6284_v12 = vld [vmem:[%s9363_s4 + $0x2cc] ss:$16 sps:$4 sm:$0xff]  }
 0x122   :  { %9400 = vst [vmem:[#allocation21_spill] sm:$0xff] %v7320_v54  ;;  %9401 = vst [vmem:[#allocation22_spill] sm:$0xff] %v7322_v35  ;;  %2219 = vmatprep.subr.bf16.mxu0 %v6275_v23  ;;  %v7380_v23 = vld [vmem:[%s9362_s3] sm:$0xf]  ;;  %v7396_v33 = vrot.slane %v7373_v40, %v7362_v28 }
 0x123   :  { %v496_v58 = vpop.f32.mrf.mxu1  ;;  %v7334_v61 = vpop.f32.mrf.mxu0  ;;  %2271 = vmatpush2.bf16.msra.mxu1 %v6270_v39  ;;  %9403 = vst [vmem:[#allocation24_spill] sm:$0xff] %v7362_v28 }
 0x124   :  { %v7343_v15 = vadd.f32 %v496_v58, %v7176_v9  ;;  %v6273_v9 = vld [vmem:[%s9363_s4 + $0x2e0] ss:$16 sps:$4 sm:$0xff]   ;;  %2272 = vmatprep.subr.bf16.mxu1 %v6278_v50  ;;  %v6281_v58 = vld [vmem:[%s9363_s4 + $0x2c4] ss:$16 sps:$4 sm:$0xff]   ;;  %v7383_v50 = vsub.s32 1, %v7326_v17 }
 0x125   :  { %v7351_v54 = vpop.f32.mrf.mxu1  ;;  %v7353_v35 = vpop.f32.mrf.mxu0  ;;  %2220 = vmatpush2.bf16.msra.mxu0 %v6273_v9  ;;  %v7402_v9 = vrot.slane %v7380_v23, %v7362_v28 }
 0x126   :  { %9402 = vst [vmem:[#allocation23_spill] sm:$0xff] %v7351_v54  ;;  %9404 = vst [vmem:[#allocation25_spill] sm:$0xff] %v7383_v50  ;;  %2221 = vmatprep.subr.bf16.mxu0 %v6281_v58 }
 0x127   :  { %v500_v39 = vpop.f32.mrf.mxu1  ;;  %v911_v54 = vpop.f32.mrf.mxu0  ;;  %2273 = vmatpush2.bf16.msra.mxu1 %v6276_v30  ;;  %v734_v30 = vadd.f32 %v7090_v21, %v7050_v27  ;;  %v7419_v21 = vrot.slane %v7380_v23, %v7383_v50 }
 0x128   :  { %v6279_v54 = vld [vmem:[%s9363_s4 + $0x2c0] ss:$16 sps:$4 sm:$0xff]   ;;  %v985_v39 = vadd.f32 %v7202_v51, %v730_v37  ;;  %2274 = vmatprep.subr.bf16.mxu1 %v6284_v12  ;;  %v7409_v37 = vrot.slane %v7373_v40, %v7383_v50  ;;  %v402_v51 = vadd.f32 %v7054_v47, %v7052_v46  ;;  %v6294_v46 = vld [vmem:[%s9363_s4 + $0xec] ss:$16 sps:$4 sm:$0xff]  }
 0x129   :  { %v501_v53 = vpop.f32.mrf.mxu1  ;;  %v912_v32 = vpop.f32.mrf.mxu0  ;;  %2222 = vmatpush2.bf16.msra.mxu0 %v6279_v54  ;;  %v989_v28 = vadd.f32 %v7226_v29, %v734_v30 }
 0x12a   :  { %v735_v47 = vadd.f32 %v7094_v25, %v402_v51  ;;  %2595 = vmatprep.subr.bf16.mxu0 %v6291_v6 }
 0x12b   :  { %v7398_v32 = vpop.f32.mrf.mxu1  ;;  %v1123_v53 = vpop.f32.mrf.mxu0  ;;  %2275 = vmatpush2.bf16.msra.mxu1 %v6282_v41  ;;  %v738_v41 = vadd.f32 %v7098_v31, %v7056_v49  ;;  %v412_v49 = vadd.f32 %v7064_v57, %v7062_v56 }
 0x12c   :  { %v1231_v22 = vadd.f32 %v1123_v53, %v985_v39  ;;  %v990_v30 = vadd.f32 %v7239_v34, %v735_v47  ;;  %2648 = vmatprep.subr.bf16.mxu1 %v6294_v46 }
 0x12d   :  { %v7413_v58 = vpop.f32.mrf.mxu1  ;;  %v1125_v12 = vpop.f32.mrf.mxu0  ;;  %v993_v25 = vadd.f32 %v7247_v16, %v738_v41 }
 0x12e   :  { %v1281_v24 = vmul.f32 %v7396_v33, %v1231_v22  ;;  %v1232_v27 = vadd.f32 %v1125_v12, %v986_v43 }
 0x12f   :  { %v7428_v54 = vpop.f32.mrf.mxu1  ;;  %v1127_v29 = vpop.f32.mrf.mxu0 }
 0x130   :  { %v1331_v19 = vadd.f32 %v7402_v9, %v1281_v24  ;;  %v1282_v39 = vmul.f32 %v7409_v37, %v1232_v27  ;;  %v1235_v53 = vadd.f32 %v1127_v29, %v989_v28  ;;  %v739_v24 = vadd.f32 %v7102_v26, %v7058_v52 }
 0x131   :  { %v7435_v43 = vpop.f32.mrf.mxu1  ;;  %v1129_v22 = vpop.f32.mrf.mxu0  ;;  %v742_v27 = vadd.f32 %v7118_v36, %v7060_v55  ;;  %v743_v52 = vadd.f32 %v7122_v38, %v412_v49 }
 0x132   :  { %v1332_v51 = vadd.f32 %v7419_v21, %v1282_v39  ;;  %v1285_v12 = vmul.f32 %v7396_v33, %v1235_v53  ;;  %v1236_v31 = vadd.f32 %v1129_v22, %v990_v30  ;;  %v1359_v6 = vmax.f32 %v1331_v19, 0.0 }
 0x133   :  { %v7444_v28 = vpop.f32.mrf.mxu1  ;;  %v1133_v34 = vpop.f32.mrf.mxu0  ;;  %v994_v47 = vadd.f32 %v7258_v1, %v739_v24  ;;  %v997_v26 = vadd.f32 %v7269_v3, %v742_v27  ;;  %v746_v30 = vadd.f32 %v7138_v45, %v7066_v60  ;;  %v998_v22 = vadd.f32 %v7282_v42, %v743_v52 }
 0x134   :  { %v1360_v46 = vmax.f32 %v1332_v51, 0.0  ;;  %v1239_v16 = vadd.f32 %v1133_v34, %v993_v25  ;;  %v1335_v29 = vadd.f32 %v7402_v9, %v1285_v12  ;;  %v1286_v41 = vmul.f32 %v7409_v37, %v1236_v31 }
 0x135   :  { %v7451_v56 = vpop.f32.mrf.mxu1  ;;  %v1135_v57 = vpop.f32.mrf.mxu0  ;;  %v1001_v31 = vadd.f32 %v7290_v14, %v746_v30  ;;  %v747_v60 = vadd.f32 %v7142_v48, %v7068_v63 }
 0x136   :  { %v6110_v39 = vpack.c.bf16 %v1360_v46, %v1359_v6  ;;  %v1289_v53 = vmul.f32 %v7396_v33, %v1239_v16  ;;  %v1336_v55 = vadd.f32 %v7419_v21, %v1286_v41  ;;  %v1240_v36 = vadd.f32 %v1135_v57, %v994_v47 }
 0x137   :  { %v7457_v19 = vpop.f32.mrf.mxu1  ;;  %v1137_v1 = vpop.f32.mrf.mxu0  ;;  %v1363_v51 = vmax.f32 %v1335_v29, 0.0  ;;  %v422_v16 = vadd.f32 %v7074_v5, %v7072_v4  ;;  %v750_v41 = vadd.f32 %v7158_v59, %v7070_v2  ;;  %v1002_v57 = vadd.f32 %v7303_v20, %v747_v60 }
 0x138   :  { %1475 = vst [vmem:[#allocation2 + $0x30] sm:$0xff] %v6110_v39  ;;  %v1243_v25 = vadd.f32 %v1137_v1, %v997_v26  ;;  %v1364_v38 = vmax.f32 %v1336_v55, 0.0  ;;  %v1339_v3 = vadd.f32 %v7402_v9, %v1289_v53  ;;  %v1290_v12 = vmul.f32 %v7409_v37, %v1240_v36 }
 0x139   :  { %v7464_v49 = vpop.f32.mrf.mxu1  ;;  %v1139_v24 = vpop.f32.mrf.mxu0  ;;  %v751_v5 = vadd.f32 %v7162_v62, %v422_v16  ;;  %v1005_v53 = vadd.f32 %v7311_v44, %v750_v41  ;;  %v754_v59 = vadd.f32 %v7178_v10, %v7076_v8 }
 0x13a   :  { %v1293_v34 = vmul.f32 %v7396_v33, %v1243_v25  ;;  %v1244_v27 = vadd.f32 %v1139_v24, %v998_v22  ;;  %v6112_v45 = vpack.c.bf16 %v1364_v38, %v1363_v51  ;;  %v1340_v42 = vadd.f32 %v7419_v21, %v1290_v12 }
 0x13b   :  { %v7471_v6 = vpop.f32.mrf.mxu1  ;;  %v1143_v46 = vpop.f32.mrf.mxu0  ;;  %v1367_v63 = vmax.f32 %v1339_v3, 0.0  ;;  %v1006_v22 = vadd.f32 %v7324_v18, %v751_v5  ;;  %v755_v3 = vadd.f32 %v7182_v13, %v7078_v11  ;;  %v1009_v12 = vadd.f32 %v7334_v61, %v754_v59 }
 0x13c   :  { %v1343_v47 = vadd.f32 %v7402_v9, %v1293_v34  ;;  %v1294_v29 = vmul.f32 %v7409_v37, %v1244_v27  ;;  %v1247_v14 = vadd.f32 %v1143_v46, %v1001_v31  ;;  %1477 = vst [vmem:[#allocation2 + $0x58] sm:$0xff] %v6112_v45  ;;  %v1368_v48 = vmax.f32 %v1340_v42, 0.0 }
 0x13d   :  { %v7480_v52 = vpop.f32.mrf.mxu1  ;;  %v1145_v26 = vpop.f32.mrf.mxu0  ;;  %v1010_v27 = vadd.f32 %v7353_v35, %v755_v3 }
 0x13e   :  { %v1344_v39 = vadd.f32 %v7419_v21, %v1294_v29  ;;  %v1297_v4 = vmul.f32 %v7396_v33, %v1247_v14  ;;  %v6114_v55 = vpack.c.bf16 %v1368_v48, %v1367_v63  ;;  %v1248_v36 = vadd.f32 %v1145_v26, %v1002_v57 }
 0x13f   :  { %v7486_v1 = vpop.f32.mrf.mxu1  ;;  %v1147_v2 = vpop.f32.mrf.mxu0  ;;  %v1371_v20 = vmax.f32 %v1343_v47, 0.0 }
 0x140   :  { %v1372_v30 = vmax.f32 %v1344_v39, 0.0  ;;  %1479 = vst [vmem:[#allocation2 + $0x50] sm:$0xff] %v6114_v55  ;;  %v1347_v25 = vadd.f32 %v7402_v9, %v1297_v4  ;;  %v1298_v51 = vmul.f32 %v7409_v37, %v1248_v36  ;;  %v1251_v62 = vadd.f32 %v1147_v2, %v1005_v53 }
 0x141   :  { %v7493_v38 = vpop.f32.mrf.mxu1  ;;  %v1149_v44 = vpop.f32.mrf.mxu0 }
 0x142   :  { %v6116_v24 = vpack.c.bf16 %v1372_v30, %v1371_v20  ;;  %v1348_v8 = vadd.f32 %v7419_v21, %v1298_v51  ;;  %v1301_v10 = vmul.f32 %v7396_v33, %v1251_v62  ;;  %v1252_v18 = vadd.f32 %v1149_v44, %v1006_v22 }
 0x143   :  { %v723_v31 = vpop.f32.mrf.mxu1  ;;  %v1153_v34 = vpop.f32.mrf.mxu0  ;;  %v1375_v42 = vmax.f32 %v1347_v25, 0.0 }
 0x144   :  { %1481 = vst [vmem:[#allocation2 + $0x8] sm:$0xff] %v6116_v24  ;;  %v7502_v60 = vadd.f32 %v723_v31, %v7343_v15  ;;  %v1255_v45 = vadd.f32 %v1153_v34, %v1009_v12  ;;  %v1376_v46 = vmax.f32 %v1348_v8, 0.0  ;;  %v1351_v11 = vadd.f32 %v7402_v9, %v1301_v10 }
 0x145   :  { %v1302_v13 = vmul.f32 %v7409_v37, %v1252_v18  ;;  %v7506_v61 = vpop.f32.mrf.mxu1  ;;  %v1155_v16 = vpop.f32.mrf.mxu0  ;;  %v7528_v24 = vsub.s32 2, %v7326_v17  ;;  %v7531_v10 = vsub.s32 3, %v7326_v17  ;;  %v732_v18 = vadd.f32 %v7398_v32, %v7211_v0  ;;  %v9408_v0 = vld [vmem:[#allocation14_spill] sm:$0xff] }
 0x146   :  { %v1305_v47 = vmul.f32 %v7396_v33, %v1255_v45  ;;  %v1256_v29 = vadd.f32 %v1155_v16, %v1010_v27  ;;  %v6118_v14 = vpack.c.bf16 %v1376_v46, %v1375_v42  ;;  %v1379_v48 = vmax.f32 %v1351_v11, 0.0  ;;  %v9407_v11 = vld [vmem:[#allocation8_spill] sm:$0xff] }
 0x147   :  { %v1352_v35 = vadd.f32 %v7419_v21, %v1302_v13  ;;  %v727_v41 = vpop.f32.mrf.mxu1  ;;  %v1157_v57 = vpop.f32.mrf.mxu0  ;;  %9405 = vst [vmem:[#allocation26_spill] sm:$0xff] %v7528_v24  ;;  %9406 = vst [vmem:[#allocation27_spill] sm:$0xff] %v7531_v10  ;;  %v733_v34 = vadd.f32 %v7413_v58, %v7218_v7  ;;  %v7539_v45 = vrot.slane %v7373_v40, %v7528_v24  ;;  %v9409_v13 = vld [vmem:[#allocation13_spill] sm:$0xff] }
 0x148   :  { %v1355_v15 = vadd.f32 %v7402_v9, %v1305_v47  ;;  %v1306_v63 = vmul.f32 %v7409_v37, %v1256_v29  ;;  %1483 = vst [vmem:[#allocation2 + $0x40] sm:$0xff] %v6118_v14  ;;  %v7543_v46 = vrot.slane %v7380_v23, %v7528_v24  ;;  %v7547_v17 = vrot.slane %v7373_v40, %v7531_v10  ;;  %v9410_v57 = vld [vmem:[#allocation15_spill] sm:$0xff] }
 0x149   :  { %v1380_v26 = vmax.f32 %v1352_v35, 0.0  ;;  %v728_v39 = vpop.f32.mrf.mxu1  ;;  %v1158_v4 = vpop.f32.mrf.mxu0  ;;  %v473_v32 = vadd.f32 %v9408_v0, %v9407_v11  ;;  %v736_v7 = vadd.f32 %v7428_v54, %v9409_v13  ;;  %v7555_v29 = vrot.slane %v7380_v23, %v7531_v10  ;;  %v9420_v11 = vld [vmem:[#allocation17_spill] sm:$0xff] }
 0x14a   :  { %v1356_v5 = vadd.f32 %v7419_v21, %v1306_v63  ;;  %v1383_v33 = vmax.f32 %v1355_v15, 0.0  ;;  %v740_v15 = vadd.f32 %v7444_v28, %v9410_v57  ;;  %v9411_v4 = vld [vmem:[#allocation9_spill] sm:$0xff]  ;;  %v744_v0 = vadd.f32 %v7457_v19, %v9420_v11  ;;  %v1535_v19 = vld [vmem:[#allocation2 + $0x58] sm:$0x22] }
 0x14b   :  { %v6120_v53 = vpack.c.bf16 %v1380_v26, %v1379_v48  ;;  %v948_v55 = vpop.f32.mrf.mxu1  ;;  %v737_v14 = vadd.f32 %v7435_v43, %v473_v32 }
 0x14c   :  { %v1384_v36 = vmax.f32 %v1356_v5, 0.0  ;;  %v987_v27 = vadd.f32 %v948_v55, %v732_v18  ;;  %v9412_v5 = vld [vmem:[#allocation18_spill] sm:$0xff]  ;;  %v9414_v55 = vld [vmem:[#allocation20_spill] sm:$0xff] }
 0x14d   :  { %1485 = vst [vmem:[#allocation2 + $0x10] sm:$0xff] %v6120_v53  ;;  %v950_v2 = vpop.f32.mrf.mxu1  ;;  %v483_v23 = vadd.f32 %v9412_v5, %v9411_v4  ;;  %v9413_v53 = vld [vmem:[#allocation10_spill] sm:$0xff]  ;;  %v9417_v18 = vld [vmem:[#allocation12_spill] sm:$0xff] }
 0x14e   :  { %v6122_v59 = vpack.c.bf16 %v1384_v36, %v1383_v33  ;;  %v988_v58 = vadd.f32 %v950_v2, %v733_v34  ;;  %v489_v43 = vadd.f32 %v9414_v55, %v9413_v53  ;;  %v9415_v33 = vld [vmem:[#allocation11_spill] sm:$0xff]  ;;  %v9416_v36 = vld [vmem:[#allocation22_spill] sm:$0xff] }
 0x14f   :  { %v952_v20 = vpop.f32.mrf.mxu1  ;;  %v493_v2 = vadd.f32 %v9416_v36, %v9415_v33 }
 0x150   :  { %1487 = vst [vmem:[#allocation2 + $0x60] sm:$0xff] %v6122_v59  ;;  %v991_v35 = vadd.f32 %v952_v20, %v736_v7  ;;  %v1491_v7 = vld [vmem:[#allocation2 + $0x30] sm:$0x22] }
 0x151   :  { %v954_v30 = vpop.f32.mrf.mxu1  ;;  %v5357_v4 = vrot.slane %v1491_v7, 9  ;;  %v753_v11 = vadd.f32 %v7493_v38, %v493_v2  ;;  %v1552_v38 = vld [vmem:[#allocation2 + $0x58] sm:$0x44] }
 0x152   :  { %v992_v48 = vadd.f32 %v954_v30, %v737_v14 }
 0x153   :  { %v958_v9 = vpop.f32.mrf.mxu1 }
 0x154   :  { %v995_v20 = vadd.f32 %v958_v9, %v740_v15 }
 0x155   :  { %v960_v22 = vpop.f32.mrf.mxu1 }
 0x157   :  { %v962_v37 = vpop.f32.mrf.mxu1 }
 0x159   :  { %v7513_v25 = vpop.f32.mrf.mxu1 }
 0x15b   :  { %v7515_v51 = vpop.f32.mrf.mxu1 }
 0x15d   :  { %v7517_v62 = vpop.f32.mrf.mxu1 }
 0x15f   :  { %v7519_v21 = vpop.f32.mrf.mxu1 }
 0x161   :  { %v7521_v44 = vpop.f32.mrf.mxu1 }
 0x163   :  { %v7523_v3 = vpop.f32.mrf.mxu1 }
 0x165   :  { %v7525_v12 = vpop.f32.mrf.mxu1 }
 0x167   :  { %v982_v8 = vpop.f32.mrf.mxu1 }
 0x169   :  { %v983_v31 = vpop.f32.mrf.mxu1 }
 0x16a   :  { %v9418_v31 = vld [vmem:[#allocation23_spill] sm:$0xff] }
 0x16b   :  { %v1194_v42 = vpop.f32.mrf.mxu1  ;;  %v7573_v34 = vadd.f32 %v9418_v31, %v9417_v18 }
 0x16c   :  { %v1233_v16 = vadd.f32 %v1194_v42, %v987_v27  ;;  %v9419_v27 = vld [vmem:[#allocation16_spill] sm:$0xff] }
 0x16d   :  { %v1196_v47 = vpop.f32.mrf.mxu1  ;;  %v741_v42 = vadd.f32 %v7451_v56, %v9419_v27  ;;  %v749_v56 = vadd.f32 %v7480_v52, %v489_v43  ;;  %v5361_v43 = vrot.slane %v1535_v19, 9  ;;  %v757_v2 = vadd.f32 %v7506_v61, %v7573_v34 }
 0x16e   :  { %v1283_v41 = vmul.f32 %v7539_v45, %v1233_v16  ;;  %v1234_v40 = vadd.f32 %v1196_v47, %v988_v58  ;;  %v1513_v58 = vld [vmem:[#allocation2 + $0x30] sm:$0x88] }
 0x16f   :  { %v1198_v63 = vpop.f32.mrf.mxu1  ;;  %v996_v57 = vadd.f32 %v960_v22, %v741_v42  ;;  %v5359_v5 = vrot.slane %v1513_v58, 9 }
 0x170   :  { %v1333_v54 = vadd.f32 %v7543_v46, %v1283_v41  ;;  %v1284_v26 = vmul.f32 %v7547_v17, %v1234_v40  ;;  %v1237_v39 = vadd.f32 %v1198_v63, %v991_v35  ;;  %v745_v35 = vadd.f32 %v7464_v49, %v483_v23  ;;  %v9421_v41 = vld [vmem:[#allocation19_spill] sm:$0xff]  ;;  %v1554_v63 = vld [vmem:[#allocation2 + $0x58] sm:$0x88] }
 0x171   :  { %v1200_v59 = vpop.f32.mrf.mxu1  ;;  %v748_v40 = vadd.f32 %v7471_v6, %v9421_v41  ;;  %v5363_v33 = vrot.slane %v1554_v63, 9 }
 0x172   :  { %v1334_v28 = vadd.f32 %v7555_v29, %v1284_v26  ;;  %v1287_v30 = vmul.f32 %v7539_v45, %v1237_v39  ;;  %v1238_v8 = vadd.f32 %v1200_v59, %v992_v48  ;;  %v1361_v32 = vmax.f32 %v1333_v54, 0.0 }
 0x173   :  { %v1204_v13 = vpop.f32.mrf.mxu1  ;;  %v999_v48 = vadd.f32 %v962_v37, %v744_v0  ;;  %v1000_v53 = vadd.f32 %v7513_v25, %v745_v35  ;;  %v9422_v37 = vld [vmem:[#allocation21_spill] sm:$0xff]  ;;  %v1003_v25 = vadd.f32 %v7515_v51, %v748_v40  ;;  %v1004_v51 = vadd.f32 %v7517_v62, %v749_v56 }
 0x174   :  { %v1362_v9 = vmax.f32 %v1334_v28, 0.0  ;;  %v1337_v16 = vadd.f32 %v7543_v46, %v1287_v30  ;;  %v1288_v47 = vmul.f32 %v7547_v17, %v1238_v8  ;;  %v1241_v14 = vadd.f32 %v1204_v13, %v995_v20  ;;  %v1489_v28 = vld [vmem:[#allocation2 + $0x30] sm:$0x11]  ;;  %v1511_v30 = vld [vmem:[#allocation2 + $0x30] sm:$0x44] }
 0x175   :  { %v1206_v15 = vpop.f32.mrf.mxu1  ;;  %v752_v36 = vadd.f32 %v7486_v1, %v9422_v37  ;;  %v7594_v27 = vmax.bf16 %v5357_v4, %v1489_v28  ;;  %v7596_v42 = vmax.bf16 %v5359_v5, %v1511_v30  ;;  %v7600_v13 = vld [vmem:[#allocation2 + $0x50] sm:$0x22]  ;;  %v7609_v41 = vmax.bf16 %v5363_v33, %v1552_v38 }
 0x176   :  { %v6111_v54 = vpack.c.bf16 %v1362_v9, %v1361_v32  ;;  %v1338_v26 = vadd.f32 %v7555_v29, %v1288_v47  ;;  %v1291_v39 = vmul.f32 %v7539_v45, %v1241_v14  ;;  %v1242_v49 = vadd.f32 %v1206_v15, %v996_v57  ;;  %v1533_v32 = vld [vmem:[#allocation2 + $0x58] sm:$0x11] }
 0x177   :  { %v1208_v23 = vpop.f32.mrf.mxu1  ;;  %v1365_v6 = vmax.f32 %v1337_v16, 0.0  ;;  %v7605_v16 = vmax.bf16 %v5361_v43, %v1533_v32  ;;  %v5366_v57 = vrot.slane %v7600_v13, 9  ;;  %v1007_v15 = vadd.f32 %v7519_v21, %v752_v36 }
 0x178   :  { %1476 = vst [vmem:[#allocation2] sm:$0xff] %v6111_v54  ;;  %v1366_v55 = vmax.f32 %v1338_v26, 0.0  ;;  %v1341_v52 = vadd.f32 %v7543_v46, %v1291_v39  ;;  %v1245_v22 = vadd.f32 %v1208_v23, %v999_v48  ;;  %v1292_v59 = vmul.f32 %v7547_v17, %v1242_v49 }
 0x179   :  { %v1210_v20 = vpop.f32.mrf.mxu1  ;;  %v1008_v5 = vadd.f32 %v7521_v44, %v753_v11 }
 0x17a   :  { %v6113_v8 = vpack.c.bf16 %v1366_v55, %v1365_v6  ;;  %v1295_v18 = vmul.f32 %v7539_v45, %v1245_v22  ;;  %v1246_v31 = vadd.f32 %v1210_v20, %v1000_v53  ;;  %v1342_v1 = vadd.f32 %v7555_v29, %v1292_v59 }
 0x17b   :  { %v1214_v0 = vpop.f32.mrf.mxu1  ;;  %v1369_v47 = vmax.f32 %v1341_v52, 0.0  ;;  %v1011_v53 = vadd.f32 %v7523_v3, %v7502_v60  ;;  %v1012_v55 = vadd.f32 %v7525_v12, %v757_v2  ;;  %v1596_v60 = vld [vmem:[#allocation2 + $0x50] sm:$0x88] }
 0x17c   :  { %1478 = vst [vmem:[#allocation2 + $0x18] sm:$0xff] %v6113_v8  ;;  %v1345_v7 = vadd.f32 %v7543_v46, %v1295_v18  ;;  %v1296_v58 = vmul.f32 %v7547_v17, %v1246_v31  ;;  %v1249_v9 = vadd.f32 %v1214_v0, %v1003_v25  ;;  %v1370_v14 = vmax.f32 %v1342_v1, 0.0  ;;  %v1615_v18 = vld [vmem:[#allocation2 + $0x8] sm:$0x22] }
 0x17d   :  { %v1216_v35 = vpop.f32.mrf.mxu1 }
 0x17e   :  { %v1346_v62 = vadd.f32 %v7555_v29, %v1296_v58  ;;  %v1299_v40 = vmul.f32 %v7539_v45, %v1249_v9  ;;  %v1250_v56 = vadd.f32 %v1216_v35, %v1004_v51  ;;  %v6115_v63 = vpack.c.bf16 %v1370_v14, %v1369_v47  ;;  %v1575_v47 = vld [vmem:[#allocation2 + $0x50] sm:$0x11] }
 0x17f   :  { %v1492_v19 = vld [vmem:[#allocation2] sm:$0x22]  ;;  %v1373_v48 = vmax.f32 %v1345_v7, 0.0  ;;  %v1218_v54 = vpop.f32.mrf.mxu1  ;;  %v1514_v34 = vld [vmem:[#allocation2] sm:$0x88]  ;;  %v5368_v14 = vrot.slane %v1596_v60, 9 }
 0x180   :  { %v5358_v61 = vrot.slane %v1492_v19, 9  ;;  %v1374_v26 = vmax.f32 %v1346_v62, 0.0  ;;  %v1349_v39 = vadd.f32 %v7543_v46, %v1299_v40  ;;  %v1300_v4 = vmul.f32 %v7547_v17, %v1250_v56  ;;  %v1490_v49 = vld [vmem:[#allocation2] sm:$0x11]  ;;  %1480 = vst [vmem:[#allocation2 + $0x68] sm:$0xff] %v6115_v63 }
 0x181   :  { %v5360_v21 = vrot.slane %v1514_v34, 9  ;;  %v1253_v23 = vadd.f32 %v1218_v54, %v1007_v15  ;;  %v1220_v6 = vpop.f32.mrf.mxu1  ;;  %v1512_v22 = vld [vmem:[#allocation2] sm:$0x44]  ;;  %v5370_v19 = vrot.slane %v1615_v18, 9  ;;  %v1631_v63 = vld [vmem:[#allocation2 + $0x8] sm:$0x88] }
 0x182   :  { %v1502_v52 = vmax.bf16 %v5358_v61, %v1490_v49  ;;  %v6117_v43 = vpack.c.bf16 %v1374_v26, %v1373_v48  ;;  %v1350_v33 = vadd.f32 %v7555_v29, %v1300_v4  ;;  %v1377_v59 = vmax.f32 %v1349_v39, 0.0  ;;  %v1594_v34 = vld [vmem:[#allocation2 + $0x50] sm:$0x44] }
 0x183   :  { %v1524_v37 = vmax.bf16 %v5360_v21, %v1512_v22  ;;  %v1536_v36 = vld [vmem:[#allocation2 + $0x18] sm:$0x22]  ;;  %v1303_v44 = vmul.f32 %v7539_v45, %v1253_v23  ;;  %v1254_v20 = vadd.f32 %v1220_v6, %v1008_v5  ;;  %v1224_v28 = vpop.f32.mrf.mxu1  ;;  %v1555_v25 = vld [vmem:[#allocation2 + $0x18] sm:$0x88]  ;;  %v1534_v11 = vld [vmem:[#allocation2 + $0x18] sm:$0x11] }
 0x184   :  { %v1503_v3 = vmax.bf16 %v1502_v52, %v7594_v27  ;;  %v5362_v30 = vrot.slane %v1536_v36, 9  ;;  %1482 = vst [vmem:[#allocation2 + $0x48] sm:$0xff] %v6117_v43  ;;  %v1378_v8 = vmax.f32 %v1350_v33, 0.0  ;;  %v1257_v12 = vadd.f32 %v1224_v28, %v1011_v53  ;;  %v1553_v9 = vld [vmem:[#allocation2 + $0x18] sm:$0x44] }
 0x185   :  { %v1525_v31 = vmax.bf16 %v1524_v37, %v7596_v42  ;;  %v5364_v1 = vrot.slane %v1555_v25, 9  ;;  %v1353_v32 = vadd.f32 %v7543_v46, %v1303_v44  ;;  %v1304_v27 = vmul.f32 %v7547_v17, %v1254_v20  ;;  %v1226_v51 = vpop.f32.mrf.mxu1  ;;  %v1613_v21 = vld [vmem:[#allocation2 + $0x8] sm:$0x11]  ;;  %v1651_v23 = vld [vmem:[#allocation2 + $0x40] sm:$0x22] }
 0x186   :  { %v1505_v7 = vrot.slane %v1503_v3, 6  ;;  %v1546_v58 = vmax.bf16 %v5362_v30, %v1534_v11  ;;  %v6119_v38 = vpack.c.bf16 %v1378_v8, %v1377_v59  ;;  %v1307_v2 = vmul.f32 %v7539_v45, %v1257_v12  ;;  %v1670_v36 = vld [vmem:[#allocation2 + $0x40] sm:$0x88]  ;;  %v1629_v8 = vld [vmem:[#allocation2 + $0x8] sm:$0x44] }
 0x187   :  { %v1527_v35 = vrot.slane %v1525_v31, 7  ;;  %v1565_v62 = vmax.bf16 %v5364_v1, %v1553_v9  ;;  %v1354_v40 = vadd.f32 %v7555_v29, %v1304_v27  ;;  %v1228_v56 = vpop.f32.mrf.mxu1  ;;  %v1578_v54 = vld [vmem:[#allocation2 + $0x68] sm:$0x22]  ;;  %v1258_v61 = vadd.f32 %v1226_v51, %v1012_v55  ;;  %v1597_v4 = vld [vmem:[#allocation2 + $0x68] sm:$0x88] }
 0x188   :  { %v1547_v48 = vmax.bf16 %v1546_v58, %v7605_v16  ;;  %1510 = vst.msk [vmem:[#allocation3] sm:$0x44] %vm7627_vm15, %v1505_v7  ;;  %1484 = vst [vmem:[#allocation2 + $0x20] sm:$0xff] %v6119_v38  ;;  %v1357_v45 = vadd.f32 %v7543_v46, %v1307_v2  ;;  %v5367_v39 = vrot.slane %v1578_v54, 9  ;;  %v1381_v5 = vmax.f32 %v1353_v32, 0.0 }
 0x189   :  { %v1566_v26 = vmax.bf16 %v1565_v62, %v7609_v41  ;;  %1532 = vst.msk [vmem:[#allocation3] sm:$0x88] %vm7635_vm2, %v1527_v35  ;;  %v1382_v53 = vmax.f32 %v1354_v40, 0.0  ;;  %v1229_v49 = vpop.f32.mrf.mxu1  ;;  %v1587_v16 = vmax.bf16 %v5366_v57, %v1575_v47  ;;  %v1576_v6 = vld [vmem:[#allocation2 + $0x68] sm:$0x11]  ;;  %v5369_v52 = vrot.slane %v1597_v4, 9 }
 0x18a   :  { %v1308_v46 = vmul.f32 %v7547_v17, %v1258_v61  ;;  %1551 = vst.msk [vmem:[#allocation3 + $0x8] sm:$0x11] %vm7643_vm4, %v1547_v48  ;;  %v5372_v55 = vrot.slane %v1631_v63, 9  ;;  %v1588_v43 = vmax.bf16 %v5367_v39, %v1576_v6  ;;  %v1595_v13 = vld [vmem:[#allocation2 + $0x68] sm:$0x44]  ;;  %v1606_v37 = vmax.bf16 %v5368_v14, %v1594_v34 }
 0x18b   :  { %v5365_v22 = vrot.slane %v1566_v26, 9  ;;  %v1616_v57 = vld [vmem:[#allocation2 + $0x48] sm:$0x22]  ;;  %v6121_v33 = vpack.c.bf16 %v1382_v53, %v1381_v5  ;;  %v1607_v59 = vmax.bf16 %v5369_v52, %v1595_v13  ;;  %v1632_v17 = vld [vmem:[#allocation2 + $0x48] sm:$0x88]  ;;  %v1625_v28 = vmax.bf16 %v5370_v19, %v1613_v21 }
 0x18c   :  { %v5371_v44 = vrot.slane %v1616_v57, 9  ;;  %v1358_v20 = vadd.f32 %v7555_v29, %v1308_v46  ;;  %v5375_v60 = vrot.slane %v1651_v23, 9  ;;  %v1589_v3 = vmax.bf16 %v1588_v43, %v1587_v16  ;;  %v1614_v30 = vld [vmem:[#allocation2 + $0x48] sm:$0x11]  ;;  %v1630_v31 = vld [vmem:[#allocation2 + $0x48] sm:$0x44] }
 0x18d   :  { %v5373_v25 = vrot.slane %v1632_v17, 9  ;;  %1486 = vst [vmem:[#allocation2 + $0x38] sm:$0xff] %v6121_v33  ;;  %1574 = vst.msk [vmem:[#allocation3 + $0x8] sm:$0x22] %vm7661_vm5, %v5365_v22  ;;  %v1608_v12 = vmax.bf16 %v1607_v59, %v1606_v37  ;;  %v1385_v11 = vmax.f32 %v1357_v45, 0.0  ;;  %v1641_v32 = vmax.bf16 %v5372_v55, %v1629_v8 }
 0x18e   :  { %v1626_v18 = vmax.bf16 %v5371_v44, %v1614_v30  ;;  %v1386_v1 = vmax.f32 %v1358_v20, 0.0  ;;  %v1649_v27 = vld [vmem:[#allocation2 + $0x40] sm:$0x11]  ;;  %v5377_v51 = vrot.slane %v1670_v36, 9  ;;  %v1591_v7 = vrot.slane %v1589_v3, 6 }
 0x18f   :  { %v1642_v29 = vmax.bf16 %v5373_v25, %v1630_v31  ;;  %v1652_v58 = vld [vmem:[#allocation2 + $0x20] sm:$0x22]  ;;  %v1689_v9 = vld [vmem:[#allocation2 + $0x10] sm:$0x22]  ;;  %v1610_v38 = vrot.slane %v1608_v12, 7  ;;  %v1661_v63 = vmax.bf16 %v5375_v60, %v1649_v27 }
 0x190   :  { %v1627_v2 = vmax.bf16 %v1626_v18, %v1625_v28  ;;  %v5376_v47 = vrot.slane %v1652_v58, 9  ;;  %v1671_v14 = vld [vmem:[#allocation2 + $0x20] sm:$0x88]  ;;  %v6123_v35 = vpack.c.bf16 %v1386_v1, %v1385_v11  ;;  %v1705_v62 = vld [vmem:[#allocation2 + $0x10] sm:$0x88]  ;;  %v5379_v34 = vrot.slane %v1689_v9, 9 }
 0x191   :  { %1593 = vst.msk [vmem:[#allocation3 + $0x8] sm:$0x44] %vm7627_vm15, %v1591_v7  ;;  %v1643_v40 = vmax.bf16 %v1642_v29, %v1641_v32  ;;  %v1650_v56 = vld [vmem:[#allocation2 + $0x20] sm:$0x11]  ;;  %v5378_v19 = vrot.slane %v1671_v14, 9  ;;  %v5381_v5 = vrot.slane %v1705_v62, 9 }
 0x192   :  { %v1668_v48 = vld [vmem:[#allocation2 + $0x40] sm:$0x44]  ;;  %1612 = vst.msk [vmem:[#allocation3 + $0x8] sm:$0x88] %vm7635_vm2, %v1610_v38  ;;  %v1662_v54 = vmax.bf16 %v5376_v47, %v1650_v56  ;;  %1488 = vst [vmem:[#allocation2 + $0x28] sm:$0xff] %v6123_v35 }
 0x193   :  { %v1669_v45 = vld [vmem:[#allocation2 + $0x20] sm:$0x44]  ;;  %1628 = vst.msk [vmem:[#allocation3 + $0x10] sm:$0x11] %vm7643_vm4, %v1627_v2  ;;  %v1680_v61 = vmax.bf16 %v5377_v51, %v1668_v48  ;;  %v5374_v26 = vrot.slane %v1643_v40, 9 }
 0x194   :  { %v1681_v39 = vmax.bf16 %v5378_v19, %v1669_v45  ;;  %v1687_v4 = vld [vmem:[#allocation2 + $0x10] sm:$0x11]  ;;  %v1663_v53 = vmax.bf16 %v1662_v54, %v1661_v63  ;;  %v1690_v49 = vld [vmem:[#allocation2 + $0x38] sm:$0x22]  ;;  %v1725_v16 = vld [vmem:[#allocation2 + $0x60] sm:$0x22] }
 0x195   :  { %v5380_v23 = vrot.slane %v1690_v49, 9  ;;  %v1706_v6 = vld [vmem:[#allocation2 + $0x38] sm:$0x88]  ;;  %1648 = vst.msk [vmem:[#allocation3 + $0x10] sm:$0x22] %vm7661_vm5, %v5374_v26  ;;  %v1699_v43 = vmax.bf16 %v5379_v34, %v1687_v4  ;;  %v5384_v59 = vrot.slane %v1725_v16, 9 }
 0x196   :  { %v1682_v21 = vmax.bf16 %v1681_v39, %v1680_v61  ;;  %v1744_v52 = vld [vmem:[#allocation2 + $0x60] sm:$0x88]  ;;  %v1665_v46 = vrot.slane %v1663_v53, 6  ;;  %v1688_v55 = vld [vmem:[#allocation2 + $0x38] sm:$0x11]  ;;  %v5382_v22 = vrot.slane %v1706_v6, 9 }
 0x197   :  { %v1703_v13 = vld [vmem:[#allocation2 + $0x10] sm:$0x44]  ;;  %v1700_v33 = vmax.bf16 %v5380_v23, %v1688_v55  ;;  %v1704_v37 = vld [vmem:[#allocation2 + $0x38] sm:$0x44]  ;;  %v5386_v17 = vrot.slane %v1744_v52, 9 }
 0x198   :  { %v1684_v57 = vrot.slane %v1682_v21, 7  ;;  %v1715_v36 = vmax.bf16 %v5381_v5, %v1703_v13  ;;  %1667 = vst.msk [vmem:[#allocation3 + $0x10] sm:$0x44] %vm7627_vm15, %v1665_v46  ;;  %v1716_v44 = vmax.bf16 %v5382_v22, %v1704_v37  ;;  %v1723_v25 = vld [vmem:[#allocation2 + $0x60] sm:$0x11] }
 0x199   :  { %v1701_v20 = vmax.bf16 %v1700_v33, %v1699_v43  ;;  %v1726_v28 = vld [vmem:[#allocation2 + $0x28] sm:$0x22]  ;;  %v1745_v30 = vld [vmem:[#allocation2 + $0x28] sm:$0x88]  ;;  %v1724_v8 = vld [vmem:[#allocation2 + $0x28] sm:$0x11]  ;;  %v1735_v18 = vmax.bf16 %v5384_v59, %v1723_v25 }
 0x19a   :  { %1686 = vst.msk [vmem:[#allocation3 + $0x10] sm:$0x88] %vm7635_vm2, %v1684_v57  ;;  %v1717_v60 = vmax.bf16 %v1716_v44, %v1715_v36  ;;  %v5385_v3 = vrot.slane %v1726_v28, 9  ;;  %v5387_v12 = vrot.slane %v1745_v30, 9  ;;  %v1742_v31 = vld [vmem:[#allocation2 + $0x60] sm:$0x44] }
 0x19b   :  { %1702 = vst.msk [vmem:[#allocation3 + $0x18] sm:$0x11] %vm7643_vm4, %v1701_v20  ;;  %v1743_v32 = vld [vmem:[#allocation2 + $0x28] sm:$0x44]  ;;  %v1754_v27 = vmax.bf16 %v5386_v17, %v1742_v31  ;;  %v7684_v9 = vld [vmem:[#allocation3 + $0x8] sm:$0xff]  ;;  %v7776_v25 = vld [vmem:[#allocation3] sm:$0xff] }
 0x19c   :  { %v5383_v11 = vrot.slane %v1717_v60, 9  ;;  %v1736_v1 = vmax.bf16 %v5385_v3, %v1724_v8  ;;  %v1755_v51 = vmax.bf16 %v5387_v12, %v1743_v32  ;;  %v1821_v41 = vld [vmem:[#allocation3] sm:$0xee]  ;;  %v6292_v23 = vld [vmem:[%s9363_s4 + $0xe8] ss:$16 sps:$4 sm:$0xff]  }
 0x19d   :  { %v5445_v14 = vcombine.high %v1821_v41, %v7684_v9  ;;  %v2701_v35 = vld [vmem:[#allocation3] sm:$0xcc]  ;;  %v5444_v62 = vcombine.low %v1821_v41, %v7684_v9  ;;  %v6300_v33 = vld [vmem:[%s9363_s4 + $0xcc] ss:$16 sps:$4 sm:$0xff]   ;;  %v6298_v20 = vld [vmem:[%s9363_s4 + $0xc8] ss:$16 sps:$4 sm:$0xff]  }
 0x19e   :  { %v1737_v7 = vmax.bf16 %v1736_v1, %v1735_v18  ;;  %1722 = vst.msk [vmem:[#allocation3 + $0x18] sm:$0x22] %vm7661_vm5, %v5383_v11  ;;  %v1756_v29 = vmax.bf16 %v1755_v51, %v1754_v27  ;;  %v5628_v40 = vcombine.low %v2701_v35, %v7684_v9  ;;  %v3186_v56 = vld [vmem:[#allocation3] sm:$0x88]  ;;  %v5629_v19 = vcombine.high %v2701_v35, %v7684_v9  ;;  %v6306_v60 = vld [vmem:[%s9363_s4 + $0xac] ss:$16 sps:$4 sm:$0xff]  }
 0x19f   :  { %v5749_v63 = vcombine.high %v3186_v56, %v7684_v9  ;;  %v1899_v54 = vrot.slane %v5445_v14, 1  ;;  %v5748_v61 = vcombine.low %v3186_v56, %v7684_v9  ;;  %v1896_v34 = vrot.slane %v5444_v62, 1  ;;  %v6289_v53 = vld [vmem:[%s9363_s4 + $0xe0] ss:$16 sps:$4 sm:$0xff]   ;;  %v6297_v57 = vld [vmem:[%s9363_s4 + $0xc4] ss:$16 sps:$4 sm:$0xff]  }
 0x1a0   :  { %v1739_v58 = vrot.slane %v1737_v7, 6  ;;  %v1758_v2 = vrot.slane %v1756_v29, 7  ;;  %v2770_v4 = vrot.slane %v5628_v40, 2  ;;  %v2773_v16 = vrot.slane %v5629_v19, 2  ;;  %v6295_v17 = vld [vmem:[%s9363_s4 + $0xc0] ss:$16 sps:$4 sm:$0xff]  }
 0x1a1   :  { %v7686_v38 = vld [vmem:[#allocation3 + $0x10] sm:$0xff]  ;;  %v3272_v21 = vrot.slane %v5749_v63, 3  ;;  %v3269_v13 = vrot.slane %v5748_v61, 3  ;;  %v6304_v30 = vld [vmem:[%s9363_s4 + $0xa8] ss:$16 sps:$4 sm:$0xff]   ;;  %v5509_v18 = vcombine.high %v7776_v25, %v7684_v9 }
 0x1a2   :  { %v7690_v15 = vcombine.high %v7684_v9, %v7686_v38  ;;  %v7694_v47 = vcombine.low %v7684_v9, %v7686_v38  ;;  %1741 = vst.msk [vmem:[#allocation3 + $0x18] sm:$0x44] %vm7627_vm15, %v1739_v58  ;;  %v6303_v28 = vld [vmem:[%s9363_s4 + $0xa4] ss:$16 sps:$4 sm:$0xff]   ;;  %v6301_v3 = vld [vmem:[%s9363_s4 + $0xa0] ss:$16 sps:$4 sm:$0xff]  }
 0x1a3   :  { %1760 = vst.msk [vmem:[#allocation3 + $0x18] sm:$0x88] %vm7635_vm2, %v1758_v2  ;;  %v6309_v8 = vld [vmem:[%s9363_s4 + $0x84] ss:$16 sps:$4 sm:$0xff]   ;;  %v6312_v12 = vld [vmem:[%s9363_s4 + $0x8c] ss:$16 sps:$4 sm:$0xff]  }
 0x1a4   :  { %v6307_v31 = vld [vmem:[%s9363_s4 + $0x80] ss:$16 sps:$4 sm:$0xff]   ;;  %v6310_v11 = vld [vmem:[%s9363_s4 + $0x88] ss:$16 sps:$4 sm:$0xff]   ;;  %v6315_v1 = vld [vmem:[%s9363_s4 + $0x64] ss:$16 sps:$4 sm:$0xff]  }
 0x1a5   :  { %v6318_v32 = vld [vmem:[%s9363_s4 + $0x6c] ss:$16 sps:$4 sm:$0xff]   ;;  %v6313_v27 = vld [vmem:[%s9363_s4 + $0x60] ss:$16 sps:$4 sm:$0xff]   ;;  %v6316_v51 = vld [vmem:[%s9363_s4 + $0x68] ss:$16 sps:$4 sm:$0xff]  }
 0x1a6   :  { %v6321_v7 = vld [vmem:[%s9363_s4 + $0x44] ss:$16 sps:$4 sm:$0xff]   ;;  %v6324_v29 = vld [vmem:[%s9363_s4 + $0x4c] ss:$16 sps:$4 sm:$0xff]   ;;  %v6319_v58 = vld [vmem:[%s9363_s4 + $0x40] ss:$16 sps:$4 sm:$0xff]  }
 0x1a7   :  { %v6322_v2 = vld [vmem:[%s9363_s4 + $0x48] ss:$16 sps:$4 sm:$0xff]   ;;  %v6327_v41 = vld [vmem:[%s9363_s4 + $0x24] ss:$16 sps:$4 sm:$0xff]   ;;  %v6330_v14 = vld [vmem:[%s9363_s4 + $0x2c] ss:$16 sps:$4 sm:$0xff]  }
 0x1a8   :  { %v6325_v35 = vld [vmem:[%s9363_s4 + $0x20] ss:$16 sps:$4 sm:$0xff]   ;;  %v6328_v62 = vld [vmem:[%s9363_s4 + $0x28] ss:$16 sps:$4 sm:$0xff]   ;;  %v6333_v40 = vld [vmem:[%s9363_s4 + $0x4] ss:$16 sps:$4 sm:$0xff]  }
 0x1a9   :  { %v1822_v48 = vld [vmem:[#allocation3 + $0x18] sm:$0x77]  ;;  %v6331_v19 = vld [vmem:[%s9363_s4] ss:$16 sps:$4 sm:$0xff]  }
 0x1aa   :  { %v5446_v0 = vcombine.low %v7686_v38, %v1822_v48  ;;  %v5447_v42 = vcombine.high %v7686_v38, %v1822_v48  ;;  %v2702_v45 = vld [vmem:[#allocation3 + $0x18] sm:$0xff]  ;;  %v6339_v48 = vld [vmem:[%s9363_s4 + $0x1a4] ss:$16 sps:$4 sm:$0xff]  }
 0x1ab   :  { %v7709_v26 = vcombine.low %v7686_v38, %v2702_v45  ;;  %v7712_v39 = vcombine.high %v7686_v38, %v2702_v45  ;;  %v6336_v56 = vld [vmem:[%s9363_s4 + $0xc] ss:$16 sps:$4 sm:$0xff]   ;;  %v6334_v63 = vld [vmem:[%s9363_s4 + $0x8] ss:$16 sps:$4 sm:$0xff]   ;;  %v6345_v45 = vld [vmem:[%s9363_s4 + $0x184] ss:$16 sps:$4 sm:$0xff]  }
 0x1ac   :  { %v1900_v5 = vrot.slane %v5447_v42, 1  ;;  %v1897_v49 = vrot.slane %v5446_v0, 1  ;;  %v6342_v0 = vld [vmem:[%s9363_s4 + $0x1ac] ss:$16 sps:$4 sm:$0xff]   ;;  %v6337_v42 = vld [vmem:[%s9363_s4 + $0x1a0] ss:$16 sps:$4 sm:$0xff]  }
 0x1ad   :  { %v7721_v6 = vrot.slane %v7712_v39, 2  ;;  %v7724_v52 = vrot.slane %v7709_v26, 2  ;;  %v3273_v46 = vrot.slane %v7712_v39, 3  ;;  %v3270_v55 = vrot.slane %v7709_v26, 3  ;;  %v6348_v61 = vld [vmem:[%s9363_s4 + $0x18c] ss:$16 sps:$4 sm:$0xff]  }
 0x1ae   :  { %v1901_v22 = vsel %vm85_vm1, %v1899_v54, %v1900_v5  ;;  %v1898_v43 = vsel %vm85_vm1, %v1896_v34, %v1897_v49  ;;  %v6340_v54 = vld [vmem:[%s9363_s4 + $0x1a8] ss:$16 sps:$4 sm:$0xff]   ;;  %v6343_v34 = vld [vmem:[%s9363_s4 + $0x180] ss:$16 sps:$4 sm:$0xff]   ;;  %v6557_v39 = vld [vmem:[%s9363_s4 + $0x7a4] ss:$16 sps:$4 sm:$0xff]  }
 0x1af   :  { %5504 = vmatprep.mubr.msk.bf16.mxu0 %vm2184_vm6, %v1901_v22  ;;  %5506 = vmatprep.mubr.msk.bf16.mxu1 %vm2184_vm6, %v1901_v22  ;;  %v7740_v37 = vsel %vm142_vm0, %v2773_v16, %v7721_v6  ;;  %v7744_v36 = vsel %vm142_vm0, %v2770_v4, %v7724_v52  ;;  %v7749_v59 = vsel %vm775_vm3, %v3272_v21, %v3273_v46  ;;  %v6346_v4 = vld [vmem:[%s9363_s4 + $0x188] ss:$16 sps:$4 sm:$0xff]   ;;  %v6357_v21 = vld [vmem:[%s9363_s4 + $0x144] ss:$16 sps:$4 sm:$0xff]   ;;  %v6355_v22 = vld [vmem:[%s9363_s4 + $0x140] ss:$16 sps:$4 sm:$0xff]  }
 0x1b0   :  { %2224 = vmatmul.mubr.bf16.vlgmr.msra.gmra.mxu0 %v1898_v43  ;;  %2277 = vmatmul.mubr.bf16.vlgmr.msra.gmra.mxu1 %v1898_v43  ;;  %v7754_v44 = vsel %vm775_vm3, %v3269_v13, %v3270_v55  ;;  %v6352_v16 = vld [vmem:[%s9363_s4 + $0x168] ss:$16 sps:$4 sm:$0xff]   ;;  %v6363_v13 = vld [vmem:[%s9363_s4 + $0x124] ss:$16 sps:$4 sm:$0xff]   ;;  %v6561_v26 = vld [vmem:[%s9363_s4 + $0x780] ss:$16 sps:$4 sm:$0xff]  }
 0x1b1   :  { %2596 = vmatpush1.bf16.msra.mxu0 %v6289_v53  ;;  %2649 = vmatpush1.bf16.msra.mxu1 %v6292_v23  ;;  %v6354_v53 = vld [vmem:[%s9363_s4 + $0x16c] ss:$16 sps:$4 sm:$0xff]   ;;  %v6358_v43 = vld [vmem:[%s9363_s4 + $0x148] ss:$16 sps:$4 sm:$0xff]  }
 0x1b2   :  { %5505 = vmatprep.mubr.msk.bf16.mxu0 %vm2184_vm6, %v1900_v5  ;;  %5507 = vmatprep.mubr.msk.bf16.mxu1 %vm2184_vm6, %v1900_v5  ;;  %v6351_v5 = vld [vmem:[%s9363_s4 + $0x164] ss:$16 sps:$4 sm:$0xff]   ;;  %v6360_v23 = vld [vmem:[%s9363_s4 + $0x14c] ss:$16 sps:$4 sm:$0xff]  }
 0x1b3   :  { %2597 = vmatprep.subr.bf16.mxu0 %v6297_v57  ;;  %2650 = vmatprep.subr.bf16.mxu1 %v6300_v33  ;;  %v6366_v57 = vld [vmem:[%s9363_s4 + $0x12c] ss:$16 sps:$4 sm:$0xff]   ;;  %v6361_v33 = vld [vmem:[%s9363_s4 + $0x120] ss:$16 sps:$4 sm:$0xff]  }
 0x1b5   :  { %2598 = vmatpush1.bf16.msra.mxu0 %v6295_v17  ;;  %2651 = vmatpush1.bf16.msra.mxu1 %v6298_v20  ;;  %v6364_v17 = vld [vmem:[%s9363_s4 + $0x128] ss:$16 sps:$4 sm:$0xff]   ;;  %v6369_v20 = vld [vmem:[%s9363_s4 + $0x104] ss:$16 sps:$4 sm:$0xff]  }
 0x1b6   :  { %2599 = vmatprep.subr.bf16.mxu0 %v6303_v28  ;;  %2652 = vmatprep.subr.bf16.mxu1 %v6306_v60  ;;  %v6372_v28 = vld [vmem:[%s9363_s4 + $0x10c] ss:$16 sps:$4 sm:$0xff]   ;;  %v6367_v60 = vld [vmem:[%s9363_s4 + $0x100] ss:$16 sps:$4 sm:$0xff]  }
 0x1b8   :  { %2234 = vmatmul.mubr.bf16.gmra.mxu0 %v1897_v49  ;;  %2287 = vmatmul.mubr.bf16.gmra.mxu1 %v1897_v49  ;;  %v6349_v49 = vld [vmem:[%s9363_s4 + $0x160] ss:$16 sps:$4 sm:$0xff]  }
 0x1b9   :  { %2600 = vmatpush1.bf16.msra.mxu0 %v6301_v3  ;;  %2653 = vmatpush1.bf16.msra.mxu1 %v6304_v30  ;;  %v6370_v3 = vld [vmem:[%s9363_s4 + $0x108] ss:$16 sps:$4 sm:$0xff]   ;;  %v6375_v30 = vld [vmem:[%s9363_s4 + $0x464] ss:$16 sps:$4 sm:$0xff]  }
 0x1ba   :  { %5568 = vmatprep.mubr.msk.bf16.mxu0 %vm2184_vm6, %v5509_v18  ;;  %5570 = vmatprep.mubr.msk.bf16.mxu1 %vm2184_vm6, %v5509_v18  ;;  %v5508_v18 = vcombine.low %v7776_v25, %v7684_v9  ;;  %v6384_v9 = vld [vmem:[%s9363_s4 + $0x44c] ss:$16 sps:$4 sm:$0xff]   ;;  %v6379_v25 = vld [vmem:[%s9363_s4 + $0x440] ss:$16 sps:$4 sm:$0xff]  }
 0x1bb   :  { %2601 = vmatprep.subr.bf16.mxu0 %v6309_v8  ;;  %2654 = vmatprep.subr.bf16.mxu1 %v6312_v12  ;;  %v6378_v8 = vld [vmem:[%s9363_s4 + $0x46c] ss:$16 sps:$4 sm:$0xff]  }
 0x1bc   :  { %v1764_v12 = vld [vmem:[#allocation3 + $0x18] sm:$0x33] }
 0x1bd   :  { %2602 = vmatpush1.bf16.msra.mxu0 %v6307_v31  ;;  %2655 = vmatpush1.bf16.msra.mxu1 %v6310_v11  ;;  %v6373_v31 = vld [vmem:[%s9363_s4 + $0x460] ss:$16 sps:$4 sm:$0xff]   ;;  %v6376_v11 = vld [vmem:[%s9363_s4 + $0x468] ss:$16 sps:$4 sm:$0xff]  }
 0x1be   :  { %2603 = vmatprep.subr.bf16.mxu0 %v6315_v1  ;;  %2656 = vmatprep.subr.bf16.mxu1 %v6318_v32  ;;  %v5511_v1 = vcombine.high %v7686_v38, %v1764_v12  ;;  %v6381_v32 = vld [vmem:[%s9363_s4 + $0x444] ss:$16 sps:$4 sm:$0xff]  }
 0x1c1   :  { %2604 = vmatpush1.bf16.msra.mxu0 %v6313_v27  ;;  %2657 = vmatpush1.bf16.msra.mxu1 %v6316_v51  ;;  %v6382_v27 = vld [vmem:[%s9363_s4 + $0x448] ss:$16 sps:$4 sm:$0xff]   ;;  %v6387_v51 = vld [vmem:[%s9363_s4 + $0x424] ss:$16 sps:$4 sm:$0xff]  }
 0x1c2   :  { %2605 = vmatprep.subr.bf16.mxu0 %v6321_v7  ;;  %2658 = vmatprep.subr.bf16.mxu1 %v6324_v29  ;;  %v6390_v7 = vld [vmem:[%s9363_s4 + $0x42c] ss:$16 sps:$4 sm:$0xff]   ;;  %v5510_v29 = vcombine.low %v7686_v38, %v1764_v12  ;;  %v6391_v38 = vld [vmem:[%s9363_s4 + $0x400] ss:$16 sps:$4 sm:$0xff]   ;;  %v6447_v12 = vld [vmem:[%s9363_s4 + $0x4a4] ss:$16 sps:$4 sm:$0xff]  }
 0x1c5   :  { %2606 = vmatpush1.bf16.msra.mxu0 %v6319_v58  ;;  %2659 = vmatpush1.bf16.msra.mxu1 %v6322_v2  ;;  %v6385_v58 = vld [vmem:[%s9363_s4 + $0x420] ss:$16 sps:$4 sm:$0xff]   ;;  %v6388_v2 = vld [vmem:[%s9363_s4 + $0x428] ss:$16 sps:$4 sm:$0xff]  }
 0x1c6   :  { %2607 = vmatprep.subr.bf16.mxu0 %v6327_v41  ;;  %2660 = vmatprep.subr.bf16.mxu1 %v6330_v14  ;;  %v6393_v41 = vld [vmem:[%s9363_s4 + $0x404] ss:$16 sps:$4 sm:$0xff]   ;;  %v6396_v14 = vld [vmem:[%s9363_s4 + $0x40c] ss:$16 sps:$4 sm:$0xff]  }
 0x1c9   :  { %2608 = vmatpush1.bf16.msra.mxu0 %v6325_v35  ;;  %2661 = vmatpush1.bf16.msra.mxu1 %v6328_v62  ;;  %v6394_v35 = vld [vmem:[%s9363_s4 + $0x408] ss:$16 sps:$4 sm:$0xff]   ;;  %v6399_v62 = vld [vmem:[%s9363_s4 + $0x3e4] ss:$16 sps:$4 sm:$0xff]  }
 0x1ca   :  { %2609 = vmatprep.subr.bf16.mxu0 %v6333_v40  ;;  %2662 = vmatprep.subr.bf16.mxu1 %v6336_v56  ;;  %v6397_v40 = vld [vmem:[%s9363_s4 + $0x3e0] ss:$16 sps:$4 sm:$0xff]   ;;  %v6400_v56 = vld [vmem:[%s9363_s4 + $0x3e8] ss:$16 sps:$4 sm:$0xff]  }
 0x1cd   :  { %2610 = vmatpush1.bf16.msra.mxu0 %v6331_v19  ;;  %2663 = vmatpush1.bf16.msra.mxu1 %v6334_v63  ;;  %v6405_v19 = vld [vmem:[%s9363_s4 + $0x3c4] ss:$16 sps:$4 sm:$0xff]   ;;  %v6408_v63 = vld [vmem:[%s9363_s4 + $0x3cc] ss:$16 sps:$4 sm:$0xff]  }
 0x1ce   :  { %2615 = vmatprep.subr.bf16.mxu0 %v6339_v48  ;;  %2668 = vmatprep.subr.bf16.mxu1 %v6342_v0  ;;  %v6403_v48 = vld [vmem:[%s9363_s4 + $0x3c0] ss:$16 sps:$4 sm:$0xff]   ;;  %v6406_v0 = vld [vmem:[%s9363_s4 + $0x3c8] ss:$16 sps:$4 sm:$0xff]  }
 0x1d1   :  { %2616 = vmatpush2.bf16.msra.mxu0 %v6337_v42  ;;  %2669 = vmatpush2.bf16.msra.mxu1 %v6340_v54  ;;  %v6411_v42 = vld [vmem:[%s9363_s4 + $0x3a4] ss:$16 sps:$4 sm:$0xff]   ;;  %v6414_v54 = vld [vmem:[%s9363_s4 + $0x3ac] ss:$16 sps:$4 sm:$0xff]  }
 0x1d2   :  { %2617 = vmatprep.subr.bf16.mxu0 %v6345_v45  ;;  %2670 = vmatprep.subr.bf16.mxu1 %v6348_v61  ;;  %v6409_v45 = vld [vmem:[%s9363_s4 + $0x3a0] ss:$16 sps:$4 sm:$0xff]   ;;  %v6412_v61 = vld [vmem:[%s9363_s4 + $0x3a8] ss:$16 sps:$4 sm:$0xff]  }
 0x1d5   :  { %2618 = vmatpush2.bf16.msra.mxu0 %v6343_v34  ;;  %2671 = vmatpush2.bf16.msra.mxu1 %v6346_v4  ;;  %v6417_v34 = vld [vmem:[%s9363_s4 + $0x384] ss:$16 sps:$4 sm:$0xff]   ;;  %v6420_v4 = vld [vmem:[%s9363_s4 + $0x38c] ss:$16 sps:$4 sm:$0xff]  }
 0x1d6   :  { %2619 = vmatprep.subr.bf16.mxu0 %v6351_v5  ;;  %2672 = vmatprep.subr.bf16.mxu1 %v6354_v53  ;;  %v6415_v5 = vld [vmem:[%s9363_s4 + $0x380] ss:$16 sps:$4 sm:$0xff]   ;;  %v6418_v53 = vld [vmem:[%s9363_s4 + $0x388] ss:$16 sps:$4 sm:$0xff]  }
 0x1d9   :  { %2620 = vmatpush2.bf16.msra.mxu0 %v6349_v49  ;;  %2673 = vmatpush2.bf16.msra.mxu1 %v6352_v16  ;;  %v6423_v49 = vld [vmem:[%s9363_s4 + $0x524] ss:$16 sps:$4 sm:$0xff]   ;;  %v6426_v16 = vld [vmem:[%s9363_s4 + $0x52c] ss:$16 sps:$4 sm:$0xff]  }
 0x1da   :  { %2621 = vmatprep.subr.bf16.mxu0 %v6357_v21  ;;  %2674 = vmatprep.subr.bf16.mxu1 %v6360_v23  ;;  %v6421_v21 = vld [vmem:[%s9363_s4 + $0x520] ss:$16 sps:$4 sm:$0xff]   ;;  %v6424_v23 = vld [vmem:[%s9363_s4 + $0x528] ss:$16 sps:$4 sm:$0xff]  }
 0x1dd   :  { %2622 = vmatpush2.bf16.msra.mxu0 %v6355_v22  ;;  %2675 = vmatpush2.bf16.msra.mxu1 %v6358_v43  ;;  %v6429_v22 = vld [vmem:[%s9363_s4 + $0x504] ss:$16 sps:$4 sm:$0xff]   ;;  %v6432_v43 = vld [vmem:[%s9363_s4 + $0x50c] ss:$16 sps:$4 sm:$0xff]  }
 0x1de   :  { %2623 = vmatprep.subr.bf16.mxu0 %v6363_v13  ;;  %2676 = vmatprep.subr.bf16.mxu1 %v6366_v57  ;;  %v6427_v13 = vld [vmem:[%s9363_s4 + $0x500] ss:$16 sps:$4 sm:$0xff]   ;;  %v6430_v57 = vld [vmem:[%s9363_s4 + $0x508] ss:$16 sps:$4 sm:$0xff]  }
 0x1e1   :  { %2624 = vmatpush2.bf16.msra.mxu0 %v6361_v33  ;;  %2677 = vmatpush2.bf16.msra.mxu1 %v6364_v17  ;;  %v6435_v33 = vld [vmem:[%s9363_s4 + $0x4e4] ss:$16 sps:$4 sm:$0xff]   ;;  %v6438_v17 = vld [vmem:[%s9363_s4 + $0x4ec] ss:$16 sps:$4 sm:$0xff]  }
 0x1e2   :  { %2625 = vmatprep.subr.bf16.mxu0 %v6369_v20  ;;  %2678 = vmatprep.subr.bf16.mxu1 %v6372_v28  ;;  %v6433_v20 = vld [vmem:[%s9363_s4 + $0x4e0] ss:$16 sps:$4 sm:$0xff]   ;;  %v6436_v28 = vld [vmem:[%s9363_s4 + $0x4e8] ss:$16 sps:$4 sm:$0xff]  }
 0x1e5   :  { %2626 = vmatpush2.bf16.msra.mxu0 %v6367_v60  ;;  %2679 = vmatpush2.bf16.msra.mxu1 %v6370_v3  ;;  %v6441_v60 = vld [vmem:[%s9363_s4 + $0x4c4] ss:$16 sps:$4 sm:$0xff]   ;;  %v6444_v3 = vld [vmem:[%s9363_s4 + $0x4cc] ss:$16 sps:$4 sm:$0xff]  }
 0x1e6   :  { %3064 = vmatprep.subr.bf16.mxu0 %v6375_v30  ;;  %3117 = vmatprep.subr.bf16.mxu1 %v6378_v8  ;;  %v6439_v30 = vld [vmem:[%s9363_s4 + $0x4c0] ss:$16 sps:$4 sm:$0xff]   ;;  %v6442_v8 = vld [vmem:[%s9363_s4 + $0x4c8] ss:$16 sps:$4 sm:$0xff]  }
 0x1e8   :  { %2628 = vmatmul.mubr.bf16.vlgmr.msra.gmra.mxu0 %v5508_v18  ;;  %2681 = vmatmul.mubr.bf16.vlgmr.msra.gmra.mxu1 %v5508_v18  ;;  %v6450_v18 = vld [vmem:[%s9363_s4 + $0x4ac] ss:$16 sps:$4 sm:$0xff]  }
 0x1e9   :  { %5569 = vmatprep.mubr.msk.bf16.mxu0 %vm2184_vm6, %v5511_v1  ;;  %5571 = vmatprep.mubr.msk.bf16.mxu1 %vm2184_vm6, %v5511_v1  ;;  %v6453_v1 = vld [vmem:[%s9363_s4 + $0x484] ss:$16 sps:$4 sm:$0xff]  }
 0x1ea   :  { %3065 = vmatpush1.bf16.msra.mxu0 %v6373_v31  ;;  %3118 = vmatpush1.bf16.msra.mxu1 %v6376_v11  ;;  %v6445_v31 = vld [vmem:[%s9363_s4 + $0x4a0] ss:$16 sps:$4 sm:$0xff]   ;;  %v6448_v11 = vld [vmem:[%s9363_s4 + $0x4a8] ss:$16 sps:$4 sm:$0xff]  }
 0x1eb   :  { %3066 = vmatprep.subr.bf16.mxu0 %v6381_v32  ;;  %3119 = vmatprep.subr.bf16.mxu1 %v6384_v9  ;;  %v6456_v32 = vld [vmem:[%s9363_s4 + $0x48c] ss:$16 sps:$4 sm:$0xff]   ;;  %v6451_v9 = vld [vmem:[%s9363_s4 + $0x480] ss:$16 sps:$4 sm:$0xff]  }
 0x1ee   :  { %3067 = vmatpush1.bf16.msra.mxu0 %v6379_v25  ;;  %3120 = vmatpush1.bf16.msra.mxu1 %v6382_v27  ;;  %v6454_v25 = vld [vmem:[%s9363_s4 + $0x488] ss:$16 sps:$4 sm:$0xff]   ;;  %v6459_v27 = vld [vmem:[%s9363_s4 + $0x624] ss:$16 sps:$4 sm:$0xff]  }
 0x1ef   :  { %3068 = vmatprep.subr.bf16.mxu0 %v6387_v51  ;;  %3121 = vmatprep.subr.bf16.mxu1 %v6390_v7  ;;  %v6462_v51 = vld [vmem:[%s9363_s4 + $0x62c] ss:$16 sps:$4 sm:$0xff]   ;;  %v6457_v7 = vld [vmem:[%s9363_s4 + $0x620] ss:$16 sps:$4 sm:$0xff]  }
 0x1f0   :  { %2638 = vmatmul.mubr.bf16.gmra.mxu0 %v5510_v29  ;;  %2691 = vmatmul.mubr.bf16.gmra.mxu1 %v5510_v29  ;;  %v6460_v29 = vld [vmem:[%s9363_s4 + $0x628] ss:$16 sps:$4 sm:$0xff]  }
 0x1f1   :  { %5688 = vmatprep.mubr.msk.bf16.mxu0 %vm2184_vm6, %v7740_v37  ;;  %5690 = vmatprep.mubr.msk.bf16.mxu1 %vm2184_vm6, %v7740_v37  ;;  %v6402_v37 = vld [vmem:[%s9363_s4 + $0x3ec] ss:$16 sps:$4 sm:$0xff]  }
 0x1f2   :  { %3069 = vmatpush1.bf16.msra.mxu0 %v6385_v58  ;;  %3122 = vmatpush1.bf16.msra.mxu1 %v6388_v2  ;;  %v6465_v58 = vld [vmem:[%s9363_s4 + $0x604] ss:$16 sps:$4 sm:$0xff]   ;;  %v6468_v2 = vld [vmem:[%s9363_s4 + $0x60c] ss:$16 sps:$4 sm:$0xff]  }
 0x1f3   :  { %3070 = vmatprep.subr.bf16.mxu0 %v6393_v41  ;;  %3123 = vmatprep.subr.bf16.mxu1 %v6396_v14  ;;  %v6463_v41 = vld [vmem:[%s9363_s4 + $0x600] ss:$16 sps:$4 sm:$0xff]   ;;  %v6466_v14 = vld [vmem:[%s9363_s4 + $0x608] ss:$16 sps:$4 sm:$0xff]  }
 0x1f6   :  { %3071 = vmatpush1.bf16.msra.mxu0 %v6391_v38  ;;  %3124 = vmatpush1.bf16.msra.mxu1 %v6394_v35  ;;  %v6469_v38 = vld [vmem:[%s9363_s4 + $0x5e0] ss:$16 sps:$4 sm:$0xff]   ;;  %v6472_v35 = vld [vmem:[%s9363_s4 + $0x5e8] ss:$16 sps:$4 sm:$0xff]  }
 0x1f7   :  { %3072 = vmatprep.subr.bf16.mxu0 %v6399_v62  ;;  %3125 = vmatprep.subr.bf16.mxu1 %v6402_v37  ;;  %v6477_v62 = vld [vmem:[%s9363_s4 + $0x5c4] ss:$16 sps:$4 sm:$0xff]   ;;  %v6480_v37 = vld [vmem:[%s9363_s4 + $0x5cc] ss:$16 sps:$4 sm:$0xff]  }
 0x1fa   :  { %3073 = vmatpush1.bf16.msra.mxu0 %v6397_v40  ;;  %3126 = vmatpush1.bf16.msra.mxu1 %v6400_v56  ;;  %v6475_v40 = vld [vmem:[%s9363_s4 + $0x5c0] ss:$16 sps:$4 sm:$0xff]   ;;  %v6478_v56 = vld [vmem:[%s9363_s4 + $0x5c8] ss:$16 sps:$4 sm:$0xff]  }
 0x1fb   :  { %3074 = vmatprep.subr.bf16.mxu0 %v6405_v19  ;;  %3127 = vmatprep.subr.bf16.mxu1 %v6408_v63  ;;  %v6481_v19 = vld [vmem:[%s9363_s4 + $0x5a0] ss:$16 sps:$4 sm:$0xff]   ;;  %v6484_v63 = vld [vmem:[%s9363_s4 + $0x5a8] ss:$16 sps:$4 sm:$0xff]  }
 0x1fe   :  { %3075 = vmatpush1.bf16.msra.mxu0 %v6403_v48  ;;  %3128 = vmatpush1.bf16.msra.mxu1 %v6406_v0  ;;  %v6489_v48 = vld [vmem:[%s9363_s4 + $0x584] ss:$16 sps:$4 sm:$0xff]   ;;  %v6492_v0 = vld [vmem:[%s9363_s4 + $0x58c] ss:$16 sps:$4 sm:$0xff]  }
 0x1ff   :  { %3076 = vmatprep.subr.bf16.mxu0 %v6411_v42  ;;  %3129 = vmatprep.subr.bf16.mxu1 %v6414_v54  ;;  %v6487_v42 = vld [vmem:[%s9363_s4 + $0x580] ss:$16 sps:$4 sm:$0xff]   ;;  %v6490_v54 = vld [vmem:[%s9363_s4 + $0x588] ss:$16 sps:$4 sm:$0xff]  }
 0x202   :  { %3077 = vmatpush1.bf16.msra.mxu0 %v6409_v45  ;;  %3130 = vmatpush1.bf16.msra.mxu1 %v6412_v61  ;;  %v6495_v45 = vld [vmem:[%s9363_s4 + $0x564] ss:$16 sps:$4 sm:$0xff]   ;;  %v6498_v61 = vld [vmem:[%s9363_s4 + $0x56c] ss:$16 sps:$4 sm:$0xff]  }
 0x203   :  { %3078 = vmatprep.subr.bf16.mxu0 %v6417_v34  ;;  %3131 = vmatprep.subr.bf16.mxu1 %v6420_v4  ;;  %v6493_v34 = vld [vmem:[%s9363_s4 + $0x560] ss:$16 sps:$4 sm:$0xff]   ;;  %v6496_v4 = vld [vmem:[%s9363_s4 + $0x568] ss:$16 sps:$4 sm:$0xff]  }
 0x206   :  { %3079 = vmatpush1.bf16.msra.mxu0 %v6415_v5  ;;  %3132 = vmatpush1.bf16.msra.mxu1 %v6418_v53  ;;  %v6501_v5 = vld [vmem:[%s9363_s4 + $0x544] ss:$16 sps:$4 sm:$0xff]   ;;  %v6504_v53 = vld [vmem:[%s9363_s4 + $0x54c] ss:$16 sps:$4 sm:$0xff]  }
 0x207   :  { %3084 = vmatprep.subr.bf16.mxu0 %v6423_v49  ;;  %3137 = vmatprep.subr.bf16.mxu1 %v6426_v16  ;;  %v6499_v49 = vld [vmem:[%s9363_s4 + $0x540] ss:$16 sps:$4 sm:$0xff]   ;;  %v6502_v16 = vld [vmem:[%s9363_s4 + $0x548] ss:$16 sps:$4 sm:$0xff]  }
 0x20a   :  { %3085 = vmatpush2.bf16.msra.mxu0 %v6421_v21  ;;  %3138 = vmatpush2.bf16.msra.mxu1 %v6424_v23  ;;  %v6507_v21 = vld [vmem:[%s9363_s4 + $0x6e4] ss:$16 sps:$4 sm:$0xff]   ;;  %v6510_v23 = vld [vmem:[%s9363_s4 + $0x6ec] ss:$16 sps:$4 sm:$0xff]  }
 0x20b   :  { %3086 = vmatprep.subr.bf16.mxu0 %v6429_v22  ;;  %3139 = vmatprep.subr.bf16.mxu1 %v6432_v43  ;;  %v6505_v22 = vld [vmem:[%s9363_s4 + $0x6e0] ss:$16 sps:$4 sm:$0xff]   ;;  %v6508_v43 = vld [vmem:[%s9363_s4 + $0x6e8] ss:$16 sps:$4 sm:$0xff]  }
 0x20e   :  { %3087 = vmatpush2.bf16.msra.mxu0 %v6427_v13  ;;  %3140 = vmatpush2.bf16.msra.mxu1 %v6430_v57  ;;  %v6513_v13 = vld [vmem:[%s9363_s4 + $0x6c4] ss:$16 sps:$4 sm:$0xff]   ;;  %v6516_v57 = vld [vmem:[%s9363_s4 + $0x6cc] ss:$16 sps:$4 sm:$0xff]  }
 0x20f   :  { %3088 = vmatprep.subr.bf16.mxu0 %v6435_v33  ;;  %3141 = vmatprep.subr.bf16.mxu1 %v6438_v17  ;;  %v6511_v33 = vld [vmem:[%s9363_s4 + $0x6c0] ss:$16 sps:$4 sm:$0xff]   ;;  %v6514_v17 = vld [vmem:[%s9363_s4 + $0x6c8] ss:$16 sps:$4 sm:$0xff]  }
 0x212   :  { %3089 = vmatpush2.bf16.msra.mxu0 %v6433_v20  ;;  %3142 = vmatpush2.bf16.msra.mxu1 %v6436_v28  ;;  %v6519_v20 = vld [vmem:[%s9363_s4 + $0x6a4] ss:$16 sps:$4 sm:$0xff]   ;;  %v6522_v28 = vld [vmem:[%s9363_s4 + $0x6ac] ss:$16 sps:$4 sm:$0xff]  }
 0x213   :  { %3090 = vmatprep.subr.bf16.mxu0 %v6441_v60  ;;  %3143 = vmatprep.subr.bf16.mxu1 %v6444_v3  ;;  %v6517_v60 = vld [vmem:[%s9363_s4 + $0x6a0] ss:$16 sps:$4 sm:$0xff]   ;;  %v6520_v3 = vld [vmem:[%s9363_s4 + $0x6a8] ss:$16 sps:$4 sm:$0xff]  }
 0x216   :  { %3091 = vmatpush2.bf16.msra.mxu0 %v6439_v30  ;;  %3144 = vmatpush2.bf16.msra.mxu1 %v6442_v8  ;;  %v6525_v30 = vld [vmem:[%s9363_s4 + $0x684] ss:$16 sps:$4 sm:$0xff]   ;;  %v6528_v8 = vld [vmem:[%s9363_s4 + $0x68c] ss:$16 sps:$4 sm:$0xff]  }
 0x217   :  { %3092 = vmatprep.subr.bf16.mxu0 %v6447_v12  ;;  %3145 = vmatprep.subr.bf16.mxu1 %v6450_v18  ;;  %v6523_v12 = vld [vmem:[%s9363_s4 + $0x680] ss:$16 sps:$4 sm:$0xff]   ;;  %v6526_v18 = vld [vmem:[%s9363_s4 + $0x688] ss:$16 sps:$4 sm:$0xff]  }
 0x21a   :  { %3093 = vmatpush2.bf16.msra.mxu0 %v6445_v31  ;;  %3146 = vmatpush2.bf16.msra.mxu1 %v6448_v11  ;;  %v6531_v31 = vld [vmem:[%s9363_s4 + $0x664] ss:$16 sps:$4 sm:$0xff]   ;;  %v6534_v11 = vld [vmem:[%s9363_s4 + $0x66c] ss:$16 sps:$4 sm:$0xff]  }
 0x21b   :  { %3094 = vmatprep.subr.bf16.mxu0 %v6453_v1  ;;  %3147 = vmatprep.subr.bf16.mxu1 %v6456_v32  ;;  %v6529_v1 = vld [vmem:[%s9363_s4 + $0x660] ss:$16 sps:$4 sm:$0xff]   ;;  %v6532_v32 = vld [vmem:[%s9363_s4 + $0x668] ss:$16 sps:$4 sm:$0xff]  }
 0x21e   :  { %3095 = vmatpush2.bf16.msra.mxu0 %v6451_v9  ;;  %3148 = vmatpush2.bf16.msra.mxu1 %v6454_v25  ;;  %v3190_v9 = vld [vmem:[#allocation3 + $0x20] sm:$0x11] }
 0x21f   :  { %3567 = vmatprep.subr.bf16.mxu0 %v6459_v27  ;;  %3620 = vmatprep.subr.bf16.mxu1 %v6462_v51  ;;  %v6537_v25 = vld [vmem:[%s9363_s4 + $0x644] ss:$16 sps:$4 sm:$0xff]   ;;  %v6540_v27 = vld [vmem:[%s9363_s4 + $0x64c] ss:$16 sps:$4 sm:$0xff]   ;;  %v5753_v51 = vcombine.high %v3190_v9, %v3190_v9 }
 0x221   :  { %3097 = vmatmul.mubr.bf16.vlgmr.msra.gmra.mxu0 %v7744_v36  ;;  %3150 = vmatmul.mubr.bf16.vlgmr.msra.gmra.mxu1 %v7744_v36  ;;  %v6471_v36 = vld [vmem:[%s9363_s4 + $0x5e4] ss:$16 sps:$4 sm:$0xff]  }
 0x222   :  { %5689 = vmatprep.mubr.msk.bf16.mxu0 %vm2184_vm6, %v7721_v6  ;;  %5691 = vmatprep.mubr.msk.bf16.mxu1 %vm2184_vm6, %v7721_v6  ;;  %v6474_v6 = vld [vmem:[%s9363_s4 + $0x5ec] ss:$16 sps:$4 sm:$0xff]  }
 0x223   :  { %3568 = vmatpush1.bf16.msra.mxu0 %v6457_v7  ;;  %3621 = vmatpush1.bf16.msra.mxu1 %v6460_v29  ;;  %v6535_v7 = vld [vmem:[%s9363_s4 + $0x640] ss:$16 sps:$4 sm:$0xff]   ;;  %v6538_v29 = vld [vmem:[%s9363_s4 + $0x648] ss:$16 sps:$4 sm:$0xff]  }
 0x224   :  { %3569 = vmatprep.subr.bf16.mxu0 %v6465_v58  ;;  %3622 = vmatprep.subr.bf16.mxu1 %v6468_v2  ;;  %v6543_v58 = vld [vmem:[%s9363_s4 + $0x7e4] ss:$16 sps:$4 sm:$0xff]   ;;  %v6546_v2 = vld [vmem:[%s9363_s4 + $0x7ec] ss:$16 sps:$4 sm:$0xff]  }
 0x227   :  { %3570 = vmatpush1.bf16.msra.mxu0 %v6463_v41  ;;  %3623 = vmatpush1.bf16.msra.mxu1 %v6466_v14  ;;  %v3277_v41 = vrot.slane %v5753_v51, 3  ;;  %v6541_v14 = vld [vmem:[%s9363_s4 + $0x7e0] ss:$16 sps:$4 sm:$0xff]   ;;  %v6623_v51 = vld [vmem:[%s9363_s4 + $0x804] ss:$16 sps:$4 sm:$0xff]  }
 0x228   :  { %3571 = vmatprep.subr.bf16.mxu0 %v6471_v36  ;;  %3624 = vmatprep.subr.bf16.mxu1 %v6474_v6  ;;  %v6544_v36 = vld [vmem:[%s9363_s4 + $0x7e8] ss:$16 sps:$4 sm:$0xff]   ;;  %v6550_v6 = vld [vmem:[%s9363_s4 + $0x7c4] ss:$16 sps:$4 sm:$0xff]  }
 0x229   :  { %3107 = vmatmul.mubr.bf16.gmra.mxu0 %v7724_v52  ;;  %3160 = vmatmul.mubr.bf16.gmra.mxu1 %v7724_v52  ;;  %v6483_v52 = vld [vmem:[%s9363_s4 + $0x5a4] ss:$16 sps:$4 sm:$0xff]  }
 0x22a   :  { %5810 = vmatprep.mubr.msk.bf16.mxu0 %vm2184_vm6, %v7749_v59  ;;  %5812 = vmatprep.mubr.msk.bf16.mxu1 %vm2184_vm6, %v7749_v59  ;;  %v6486_v59 = vld [vmem:[%s9363_s4 + $0x5ac] ss:$16 sps:$4 sm:$0xff]  }
 0x22b   :  { %3572 = vmatpush1.bf16.msra.mxu0 %v6469_v38  ;;  %3625 = vmatpush1.bf16.msra.mxu1 %v6472_v35  ;;  %v6553_v38 = vld [vmem:[%s9363_s4 + $0x7cc] ss:$16 sps:$4 sm:$0xff]   ;;  %v5752_v35 = vcombine.low %v3190_v9, %v3190_v9 }
 0x22c   :  { %3573 = vmatprep.subr.bf16.mxu0 %v6477_v62  ;;  %3626 = vmatprep.subr.bf16.mxu1 %v6480_v37  ;;  %v3278_v62 = vsel %vm775_vm3, %v3273_v46, %v3277_v41  ;;  %v6548_v37 = vld [vmem:[%s9363_s4 + $0x7c0] ss:$16 sps:$4 sm:$0xff]   ;;  %v6560_v46 = vld [vmem:[%s9363_s4 + $0x7ac] ss:$16 sps:$4 sm:$0xff]  }
 0x22d   :  { %v6620_v9 = vld [vmem:[%s9363_s4 + $0x82c] ss:$16 sps:$4 sm:$0xff]  }
 0x22e   :  { %v6629_v41 = vld [vmem:[#allocation3 + $0x18] sm:$0xff] }
 0x22f   :  { %3574 = vmatpush1.bf16.msra.mxu0 %v6475_v40  ;;  %3627 = vmatpush1.bf16.msra.mxu1 %v6478_v56  ;;  %v6551_v40 = vld [vmem:[%s9363_s4 + $0x7c8] ss:$16 sps:$4 sm:$0xff]   ;;  %v6555_v56 = vld [vmem:[%s9363_s4 + $0x7a0] ss:$16 sps:$4 sm:$0xff]  }
 0x230   :  { %3575 = vmatprep.subr.bf16.mxu0 %v6483_v52  ;;  %3628 = vmatprep.subr.bf16.mxu1 %v6486_v59  ;;  %v6558_v52 = vld [vmem:[%s9363_s4 + $0x7a8] ss:$16 sps:$4 sm:$0xff]  }
 0x233   :  { %3576 = vmatpush1.bf16.msra.mxu0 %v6481_v19  ;;  %3629 = vmatpush1.bf16.msra.mxu1 %v6484_v63  ;;  %v6563_v19 = vld [vmem:[%s9363_s4 + $0x784] ss:$16 sps:$4 sm:$0xff]   ;;  %v6566_v63 = vld [vmem:[%s9363_s4 + $0x78c] ss:$16 sps:$4 sm:$0xff]  }
 0x234   :  { %3577 = vmatprep.subr.bf16.mxu0 %v6489_v48  ;;  %3630 = vmatprep.subr.bf16.mxu1 %v6492_v0  ;;  %v6569_v48 = vld [vmem:[%s9363_s4 + $0x764] ss:$16 sps:$4 sm:$0xff]   ;;  %v6567_v0 = vld [vmem:[%s9363_s4 + $0x760] ss:$16 sps:$4 sm:$0xff]  }
 0x237   :  { %3578 = vmatpush1.bf16.msra.mxu0 %v6487_v42  ;;  %3631 = vmatpush1.bf16.msra.mxu1 %v6490_v54  ;;  %v6570_v42 = vld [vmem:[%s9363_s4 + $0x768] ss:$16 sps:$4 sm:$0xff]   ;;  %v6575_v54 = vld [vmem:[%s9363_s4 + $0x744] ss:$16 sps:$4 sm:$0xff]  }
 0x238   :  { %3579 = vmatprep.subr.bf16.mxu0 %v6495_v45  ;;  %3632 = vmatprep.subr.bf16.mxu1 %v6498_v61  ;;  %v6578_v45 = vld [vmem:[%s9363_s4 + $0x74c] ss:$16 sps:$4 sm:$0xff]   ;;  %v6573_v61 = vld [vmem:[%s9363_s4 + $0x740] ss:$16 sps:$4 sm:$0xff]  }
 0x23b   :  { %3580 = vmatpush1.bf16.msra.mxu0 %v6493_v34  ;;  %3633 = vmatpush1.bf16.msra.mxu1 %v6496_v4  ;;  %v6576_v34 = vld [vmem:[%s9363_s4 + $0x748] ss:$16 sps:$4 sm:$0xff]   ;;  %v6581_v4 = vld [vmem:[%s9363_s4 + $0x724] ss:$16 sps:$4 sm:$0xff]  }
 0x23c   :  { %3581 = vmatprep.subr.bf16.mxu0 %v6501_v5  ;;  %3634 = vmatprep.subr.bf16.mxu1 %v6504_v53  ;;  %v6584_v5 = vld [vmem:[%s9363_s4 + $0x72c] ss:$16 sps:$4 sm:$0xff]   ;;  %v6579_v53 = vld [vmem:[%s9363_s4 + $0x720] ss:$16 sps:$4 sm:$0xff]  }
 0x23f   :  { %3582 = vmatpush1.bf16.msra.mxu0 %v6499_v49  ;;  %3635 = vmatpush1.bf16.msra.mxu1 %v6502_v16  ;;  %v6582_v49 = vld [vmem:[%s9363_s4 + $0x728] ss:$16 sps:$4 sm:$0xff]   ;;  %v6587_v16 = vld [vmem:[%s9363_s4 + $0x704] ss:$16 sps:$4 sm:$0xff]  }
 0x240   :  { %3587 = vmatprep.subr.bf16.mxu0 %v6507_v21  ;;  %3640 = vmatprep.subr.bf16.mxu1 %v6510_v23  ;;  %v6590_v21 = vld [vmem:[%s9363_s4 + $0x70c] ss:$16 sps:$4 sm:$0xff]   ;;  %v6585_v23 = vld [vmem:[%s9363_s4 + $0x700] ss:$16 sps:$4 sm:$0xff]  }
 0x243   :  { %3588 = vmatpush2.bf16.msra.mxu0 %v6505_v22  ;;  %3641 = vmatpush2.bf16.msra.mxu1 %v6508_v43  ;;  %v6588_v22 = vld [vmem:[%s9363_s4 + $0x708] ss:$16 sps:$4 sm:$0xff]   ;;  %v6593_v43 = vld [vmem:[%s9363_s4 + $0x8a4] ss:$16 sps:$4 sm:$0xff]  }
 0x244   :  { %3589 = vmatprep.subr.bf16.mxu0 %v6513_v13  ;;  %3642 = vmatprep.subr.bf16.mxu1 %v6516_v57  ;;  %v6596_v13 = vld [vmem:[%s9363_s4 + $0x8ac] ss:$16 sps:$4 sm:$0xff]   ;;  %v6591_v57 = vld [vmem:[%s9363_s4 + $0x8a0] ss:$16 sps:$4 sm:$0xff]  }
 0x247   :  { %3590 = vmatpush2.bf16.msra.mxu0 %v6511_v33  ;;  %3643 = vmatpush2.bf16.msra.mxu1 %v6514_v17  ;;  %v6594_v33 = vld [vmem:[%s9363_s4 + $0x8a8] ss:$16 sps:$4 sm:$0xff]   ;;  %v6599_v17 = vld [vmem:[%s9363_s4 + $0x884] ss:$16 sps:$4 sm:$0xff]  }
 0x248   :  { %3591 = vmatprep.subr.bf16.mxu0 %v6519_v20  ;;  %3644 = vmatprep.subr.bf16.mxu1 %v6522_v28  ;;  %v6602_v20 = vld [vmem:[%s9363_s4 + $0x88c] ss:$16 sps:$4 sm:$0xff]   ;;  %v6597_v28 = vld [vmem:[%s9363_s4 + $0x880] ss:$16 sps:$4 sm:$0xff]  }
 0x24b   :  { %3592 = vmatpush2.bf16.msra.mxu0 %v6517_v60  ;;  %3645 = vmatpush2.bf16.msra.mxu1 %v6520_v3  ;;  %v6600_v60 = vld [vmem:[%s9363_s4 + $0x888] ss:$16 sps:$4 sm:$0xff]   ;;  %v6605_v3 = vld [vmem:[%s9363_s4 + $0x864] ss:$16 sps:$4 sm:$0xff]  }
 0x24c   :  { %3593 = vmatprep.subr.bf16.mxu0 %v6525_v30  ;;  %3646 = vmatprep.subr.bf16.mxu1 %v6528_v8  ;;  %v6608_v30 = vld [vmem:[%s9363_s4 + $0x86c] ss:$16 sps:$4 sm:$0xff]   ;;  %v6603_v8 = vld [vmem:[%s9363_s4 + $0x860] ss:$16 sps:$4 sm:$0xff]  }
 0x24f   :  { %3594 = vmatpush2.bf16.msra.mxu0 %v6523_v12  ;;  %3647 = vmatpush2.bf16.msra.mxu1 %v6526_v18  ;;  %v6606_v12 = vld [vmem:[%s9363_s4 + $0x868] ss:$16 sps:$4 sm:$0xff]   ;;  %v6611_v18 = vld [vmem:[%s9363_s4 + $0x844] ss:$16 sps:$4 sm:$0xff]  }
 0x250   :  { %3595 = vmatprep.subr.bf16.mxu0 %v6531_v31  ;;  %3648 = vmatprep.subr.bf16.mxu1 %v6534_v11  ;;  %v6614_v31 = vld [vmem:[%s9363_s4 + $0x84c] ss:$16 sps:$4 sm:$0xff]   ;;  %v6609_v11 = vld [vmem:[%s9363_s4 + $0x840] ss:$16 sps:$4 sm:$0xff]  }
 0x253   :  { %3596 = vmatpush2.bf16.msra.mxu0 %v6529_v1  ;;  %3649 = vmatpush2.bf16.msra.mxu1 %v6532_v32  ;;  %v6612_v1 = vld [vmem:[%s9363_s4 + $0x848] ss:$16 sps:$4 sm:$0xff]   ;;  %v6617_v32 = vld [vmem:[%s9363_s4 + $0x824] ss:$16 sps:$4 sm:$0xff]  }
 0x254   :  { %3597 = vmatprep.subr.bf16.mxu0 %v6537_v25  ;;  %3650 = vmatprep.subr.bf16.mxu1 %v6540_v27  ;;  %v6615_v25 = vld [vmem:[%s9363_s4 + $0x820] ss:$16 sps:$4 sm:$0xff]   ;;  %v6618_v27 = vld [vmem:[%s9363_s4 + $0x828] ss:$16 sps:$4 sm:$0xff]  }
 0x257   :  { %3598 = vmatpush2.bf16.msra.mxu0 %v6535_v7  ;;  %3651 = vmatpush2.bf16.msra.mxu1 %v6538_v29  ;;  %v6626_v7 = vld [vmem:[%s9363_s4 + $0x80c] ss:$16 sps:$4 sm:$0xff]   ;;  %v6621_v29 = vld [vmem:[%s9363_s4 + $0x800] ss:$16 sps:$4 sm:$0xff]  }
 0x258   :  { %4042 = vmatprep.subr.bf16.mxu0 %v6543_v58  ;;  %4095 = vmatprep.subr.bf16.mxu1 %v6546_v2  ;;  %v6624_v58 = vld [vmem:[%s9363_s4 + $0x808] ss:$16 sps:$4 sm:$0xff]   ;;  %v3689_v2 = vld [vmem:[#allocation3 + $0x20] sm:$0x33] }
 0x25a   :  { %3600 = vmatmul.mubr.bf16.vlgmr.msra.gmra.mxu0 %v7754_v44  ;;  %3653 = vmatmul.mubr.bf16.vlgmr.msra.gmra.mxu1 %v7754_v44  ;;  %v3275_v44 = vrot.slane %v5752_v35, 3  ;;  %v9371_v35 = vmov 0.0  }
 0x25b   :  { %5811 = vmatprep.mubr.msk.bf16.mxu0 %vm2184_vm6, %v3278_v62  ;;  %5813 = vmatprep.mubr.msk.bf16.mxu1 %vm2184_vm6, %v3278_v62  ;;  %v5948_v62 = vld [vmem:[%s9366_s7 + $0x150] sm:$0xff] }
 0x25c   :  { %4043 = vmatpush1.bf16.msra.mxu0 %v6541_v14  ;;  %4096 = vmatpush1.bf16.msra.mxu1 %v6544_v36  ;;  %v3276_v59 = vsel %vm775_vm3, %v3270_v55, %v3275_v44  ;;  %v6564_v55 = vld [vmem:[%s9363_s4 + $0x788] ss:$16 sps:$4 sm:$0xff]   ;;  %v5873_v14 = vcombine.high %v6629_v41, %v3689_v2  ;;  %v5872_v36 = vcombine.low %v6629_v41, %v3689_v2  ;;  %v4310_v44 = vld [vmem:[%s9366_s7 + $0x60] sm:$0xff] }
 0x25d   :  { %4044 = vmatprep.subr.bf16.mxu0 %v6550_v6  ;;  %4097 = vmatprep.subr.bf16.mxu1 %v6553_v38  ;;  %v4313_v6 = vld [vmem:[%s9366_s7 + $0x78] sm:$0xff] }
 0x25e   :  { %v5949_v38 = vld [vmem:[%s9366_s7 + $0x158] sm:$0xff] }
 0x25f   :  { %v4317_v2 = vld [vmem:[%s9366_s7 + $0x98] sm:$0xff] }
 0x260   :  { %4045 = vmatpush1.bf16.msra.mxu0 %v6548_v37  ;;  %4098 = vmatpush1.bf16.msra.mxu1 %v6551_v40  ;;  %v4311_v37 = vld [vmem:[%s9366_s7 + $0x68] sm:$0xff]  ;;  %v5953_v41 = vld [vmem:[%s9366_s7 + $0x178] sm:$0xff] }
 0x261   :  { %4046 = vmatprep.subr.bf16.mxu0 %v6557_v39  ;;  %4099 = vmatprep.subr.bf16.mxu1 %v6560_v46  ;;  %v5947_v40 = vld [vmem:[%s9366_s7 + $0x148] sm:$0xff]  ;;  %v5946_v39 = vld [vmem:[%s9366_s7 + $0x140] sm:$0xff]  ;;  %v4309_v46 = vld [vmem:[%s9366_s7 + $0x58] sm:$0xff] }
 0x262   :  { %3610 = vmatmul.mubr.bf16.gmra.mxu0 %v3276_v59  ;;  %3663 = vmatmul.mubr.bf16.gmra.mxu1 %v3276_v59  ;;  %v5944_v59 = vld [vmem:[%s9366_s7 + $0x130] sm:$0xff] }
 0x263   :  { %5930 = vmatprep.mubr.msk.bf16.mxu0 %vm2184_vm6, %v7690_v15  ;;  %5932 = vmatprep.mubr.msk.bf16.mxu1 %vm2184_vm6, %v7690_v15  ;;  %v6572_v15 = vld [vmem:[%s9363_s4 + $0x76c] ss:$16 sps:$4 sm:$0xff]  }
 0x264   :  { %4047 = vmatpush1.bf16.msra.mxu0 %v6555_v56  ;;  %4100 = vmatpush1.bf16.msra.mxu1 %v6558_v52  ;;  %v5945_v56 = vld [vmem:[%s9366_s7 + $0x138] sm:$0xff]  ;;  %v4308_v52 = vld [vmem:[%s9366_s7 + $0x50] sm:$0xff] }
 0x265   :  { %4048 = vmatprep.subr.bf16.mxu0 %v6563_v19  ;;  %4101 = vmatprep.subr.bf16.mxu1 %v6566_v63  ;;  %v4307_v19 = vld [vmem:[%s9366_s7 + $0x48] sm:$0xff] }
 0x266   :  { %v5943_v63 = vld [vmem:[%s9366_s7 + $0x128] sm:$0xff] }
 0x268   :  { %4049 = vmatpush1.bf16.msra.mxu0 %v6561_v26  ;;  %4102 = vmatpush1.bf16.msra.mxu1 %v6564_v55  ;;  %v4306_v26 = vld [vmem:[%s9366_s7 + $0x40] sm:$0xff] }
 0x269   :  { %4050 = vmatprep.subr.bf16.mxu0 %v6569_v48  ;;  %4103 = vmatprep.subr.bf16.mxu1 %v6572_v15  ;;  %v5942_v55 = vld [vmem:[%s9366_s7 + $0x120] sm:$0xff]  ;;  %v4305_v48 = vld [vmem:[%s9366_s7 + $0x38] sm:$0xff] }
 0x26a   :  { %v5941_v15 = vld [vmem:[%s9366_s7 + $0x118] sm:$0xff] }
 0x26c   :  { %4051 = vmatpush1.bf16.msra.mxu0 %v6567_v0  ;;  %4104 = vmatpush1.bf16.msra.mxu1 %v6570_v42  ;;  %v4304_v0 = vld [vmem:[%s9366_s7 + $0x30] sm:$0xff] }
 0x26d   :  { %4052 = vmatprep.subr.bf16.mxu0 %v6575_v54  ;;  %4105 = vmatprep.subr.bf16.mxu1 %v6578_v45  ;;  %v5940_v42 = vld [vmem:[%s9366_s7 + $0x110] sm:$0xff]  ;;  %v4303_v54 = vld [vmem:[%s9366_s7 + $0x28] sm:$0xff] }
 0x26e   :  { %v5939_v45 = vld [vmem:[%s9366_s7 + $0x108] sm:$0xff] }
 0x270   :  { %4053 = vmatpush1.bf16.msra.mxu0 %v6573_v61  ;;  %4106 = vmatpush1.bf16.msra.mxu1 %v6576_v34  ;;  %v4302_v61 = vld [vmem:[%s9366_s7 + $0x20] sm:$0xff] }
 0x271   :  { %4054 = vmatprep.subr.bf16.mxu0 %v6581_v4  ;;  %4107 = vmatprep.subr.bf16.mxu1 %v6584_v5  ;;  %v5938_v34 = vld [vmem:[%s9366_s7 + $0x100] sm:$0xff]  ;;  %v4301_v4 = vld [vmem:[%s9366_s7 + $0x18] sm:$0xff] }
 0x272   :  { %v5937_v5 = vld [vmem:[%s9366_s7 + $0xf8] sm:$0xff] }
 0x274   :  { %4055 = vmatpush1.bf16.msra.mxu0 %v6579_v53  ;;  %4108 = vmatpush1.bf16.msra.mxu1 %v6582_v49  ;;  %v4300_v53 = vld [vmem:[%s9366_s7 + $0x10] sm:$0xff] }
 0x275   :  { %4056 = vmatprep.subr.bf16.mxu0 %v6587_v16  ;;  %4109 = vmatprep.subr.bf16.mxu1 %v6590_v21  ;;  %v5936_v49 = vld [vmem:[%s9366_s7 + $0xf0] sm:$0xff]  ;;  %v4299_v16 = vld [vmem:[%s9366_s7 + $0x8] sm:$0xff] }
 0x276   :  { %v5935_v21 = vld [vmem:[%s9366_s7 + $0xe8] sm:$0xff] }
 0x278   :  { %4057 = vmatpush1.bf16.msra.mxu0 %v6585_v23  ;;  %4110 = vmatpush1.bf16.msra.mxu1 %v6588_v22  ;;  %v4298_v23 = vld [vmem:[%s9366_s7] sm:$0xff] }
 0x279   :  { %4062 = vmatprep.subr.bf16.mxu0 %v6593_v43  ;;  %4115 = vmatprep.subr.bf16.mxu1 %v6596_v13  ;;  %v5934_v22 = vld [vmem:[%s9366_s7 + $0xe0] sm:$0xff]  ;;  %v4325_v43 = vld [vmem:[%s9366_s7 + $0xd8] sm:$0xff] }
 0x27a   :  { %v5961_v13 = vld [vmem:[%s9366_s7 + $0x1b8] sm:$0xff] }
 0x27c   :  { %4063 = vmatpush2.bf16.msra.mxu0 %v6591_v57  ;;  %4116 = vmatpush2.bf16.msra.mxu1 %v6594_v33  ;;  %v4324_v57 = vld [vmem:[%s9366_s7 + $0xd0] sm:$0xff]  ;;  %v8598_v33 = vpop.f32.mrf.mxu0 }
 0x27d   :  { %4064 = vmatprep.subr.bf16.mxu0 %v6599_v17  ;;  %4117 = vmatprep.subr.bf16.mxu1 %v6602_v20  ;;  %v8600_v17 = vpop.f32.mrf.mxu1  ;;  %v5960_v20 = vld [vmem:[%s9366_s7 + $0x1b0] sm:$0xff] }
 0x280   :  { %4065 = vmatpush2.bf16.msra.mxu0 %v6597_v28  ;;  %4118 = vmatpush2.bf16.msra.mxu1 %v6600_v60  ;;  %v4323_v28 = vld [vmem:[%s9366_s7 + $0xc8] sm:$0xff] }
 0x281   :  { %4066 = vmatprep.subr.bf16.mxu0 %v6605_v3  ;;  %4119 = vmatprep.subr.bf16.mxu1 %v6608_v30  ;;  %v5959_v60 = vld [vmem:[%s9366_s7 + $0x1a8] sm:$0xff]  ;;  %v4322_v3 = vld [vmem:[%s9366_s7 + $0xc0] sm:$0xff]  ;;  %v8618_v30 = vpop.f32.mrf.mxu0 }
 0x284   :  { %4067 = vmatpush2.bf16.msra.mxu0 %v6603_v8  ;;  %4120 = vmatpush2.bf16.msra.mxu1 %v6606_v12  ;;  %v8620_v8 = vpop.f32.mrf.mxu1  ;;  %v5958_v12 = vld [vmem:[%s9366_s7 + $0x1a0] sm:$0xff] }
 0x285   :  { %4068 = vmatprep.subr.bf16.mxu0 %v6611_v18  ;;  %4121 = vmatprep.subr.bf16.mxu1 %v6614_v31  ;;  %v4321_v18 = vld [vmem:[%s9366_s7 + $0xb8] sm:$0xff] }
 0x286   :  { %v5957_v31 = vld [vmem:[%s9366_s7 + $0x198] sm:$0xff] }
 0x288   :  { %4069 = vmatpush2.bf16.msra.mxu0 %v6609_v11  ;;  %4122 = vmatpush2.bf16.msra.mxu1 %v6612_v1  ;;  %v4320_v11 = vld [vmem:[%s9366_s7 + $0xb0] sm:$0xff]  ;;  %v8638_v1 = vpop.f32.mrf.mxu0 }
 0x289   :  { %4070 = vmatprep.subr.bf16.mxu0 %v6617_v32  ;;  %4123 = vmatprep.subr.bf16.mxu1 %v6620_v9  ;;  %v8640_v32 = vpop.f32.mrf.mxu1  ;;  %v5956_v9 = vld [vmem:[%s9366_s7 + $0x190] sm:$0xff] }
 0x28c   :  { %4071 = vmatpush2.bf16.msra.mxu0 %v6615_v25  ;;  %4124 = vmatpush2.bf16.msra.mxu1 %v6618_v27  ;;  %v4319_v25 = vld [vmem:[%s9366_s7 + $0xa8] sm:$0xff] }
 0x28d   :  { %4072 = vmatprep.subr.bf16.mxu0 %v6623_v51  ;;  %4125 = vmatprep.subr.bf16.mxu1 %v6626_v7  ;;  %v5955_v27 = vld [vmem:[%s9366_s7 + $0x188] sm:$0xff]  ;;  %v4318_v51 = vld [vmem:[%s9366_s7 + $0xa0] sm:$0xff]  ;;  %v8658_v7 = vpop.f32.mrf.mxu0 }
 0x290   :  { %4073 = vmatpush2.bf16.msra.mxu0 %v6621_v29  ;;  %4126 = vmatpush2.bf16.msra.mxu1 %v6624_v58  ;;  %v8660_v29 = vpop.f32.mrf.mxu1  ;;  %v5954_v58 = vld [vmem:[%s9366_s7 + $0x180] sm:$0xff] }
 0x291   :  { %4461 = vmatprep.subr.mxu1 %v9371_v35  ;;  %4388 = vmatprep.subr.mxu0 %v9371_v35 }
 0x293   :  { %4075 = vmatmul.mubr.bf16.vlgmr.msra.gmra.mxu0 %v7694_v47  ;;  %4128 = vmatmul.mubr.bf16.vlgmr.msra.gmra.mxu1 %v7694_v47  ;;  %v4312_v47 = vld [vmem:[%s9366_s7 + $0x70] sm:$0xff] }
 0x294   :  { %5931 = vmatprep.mubr.msk.bf16.mxu0 %vm2184_vm6, %v5873_v14  ;;  %5933 = vmatprep.mubr.msk.bf16.mxu1 %vm2184_vm6, %v5873_v14  ;;  %v4316_v14 = vld [vmem:[%s9366_s7 + $0x90] sm:$0xff] }
 0x295   :  { %4462 = vmatpush1.msra.mxu1 %v4313_v6  ;;  %4389 = vmatpush1.msra.mxu0 %v5949_v38  ;;  %v8680_v6 = vpop.f32.mrf.mxu1  ;;  %v5952_v38 = vld [vmem:[%s9366_s7 + $0x170] sm:$0xff] }
 0x296   :  { %4463 = vmatprep.subr.mxu1 %v9371_v35  ;;  %4390 = vmatprep.subr.mxu0 %v9371_v35  ;;  %9432 = vst [vmem:[#allocation14_spill] sm:$0xff] %v8680_v6 }
 0x297   :  { %4464 = vmatpush1.msra.mxu1 %v4312_v47  ;;  %4391 = vmatpush1.msra.mxu0 %v5948_v62  ;;  %v4315_v47 = vld [vmem:[%s9366_s7 + $0x88] sm:$0xff] }
 0x298   :  { %4465 = vmatprep.subr.mxu1 %v9371_v35  ;;  %4392 = vmatprep.subr.mxu0 %v9371_v35  ;;  %v5951_v62 = vld [vmem:[%s9366_s7 + $0x168] sm:$0xff] }
 0x299   :  { %4466 = vmatpush1.msra.mxu1 %v4311_v37  ;;  %4393 = vmatpush1.msra.mxu0 %v5947_v40  ;;  %v4314_v37 = vld [vmem:[%s9366_s7 + $0x80] sm:$0xff] }
 0x29a   :  { %4467 = vmatprep.subr.mxu1 %v9371_v35  ;;  %4394 = vmatprep.subr.mxu0 %v9371_v35  ;;  %v5950_v40 = vld [vmem:[%s9366_s7 + $0x160] sm:$0xff] }
 0x29b   :  { %4085 = vmatmul.mubr.bf16.gmra.mxu0 %v5872_v36  ;;  %4138 = vmatmul.mubr.bf16.gmra.mxu1 %v5872_v36  ;;  %v8678_v36 = vpop.f32.mrf.mxu0 }
 0x29c   :  { %4468 = vmatpush1.msra.mxu1 %v4310_v44  ;;  %4395 = vmatpush1.msra.mxu0 %v5946_v39  ;;  %9431 = vst [vmem:[#allocation8_spill] sm:$0xff] %v8678_v36  ;;  %v8703_v39 = vpop.f32.mrf.mxu1 }
 0x29d   :  { %4469 = vmatprep.subr.mxu1 %v9371_v35  ;;  %4396 = vmatprep.subr.mxu0 %v9371_v35  ;;  %v8701_v44 = vpop.f32.mrf.mxu0  ;;  %9434 = vst [vmem:[#allocation15_spill] sm:$0xff] %v8703_v39 }
 0x29e   :  { %4470 = vmatpush1.msra.mxu1 %v4309_v46  ;;  %4397 = vmatpush1.msra.mxu0 %v5945_v56  ;;  %9433 = vst [vmem:[#allocation13_spill] sm:$0xff] %v8701_v44  ;;  %v2292_v56 = vpop.f32.mrf.mxu1 }
 0x29f   :  { %4471 = vmatprep.subr.mxu1 %v9371_v35  ;;  %4398 = vmatprep.subr.mxu0 %v9371_v35  ;;  %v2239_v46 = vpop.f32.mrf.mxu0 }
 0x2a0   :  { %4472 = vmatpush1.msra.mxu1 %v4308_v52  ;;  %4399 = vmatpush1.msra.mxu0 %v5944_v59  ;;  %v2294_v59 = vpop.f32.mrf.mxu1 }
 0x2a1   :  { %4473 = vmatprep.subr.mxu1 %v9371_v35  ;;  %4400 = vmatprep.subr.mxu0 %v9371_v35  ;;  %v2241_v52 = vpop.f32.mrf.mxu0 }
 0x2a2   :  { %4474 = vmatpush1.msra.mxu1 %v4307_v19  ;;  %4401 = vmatpush1.msra.mxu0 %v5943_v63 }
 0x2a3   :  { %4475 = vmatprep.subr.mxu1 %v9371_v35  ;;  %4402 = vmatprep.subr.mxu0 %v9371_v35 }
 0x2a4   :  { %4476 = vmatpush1.msra.mxu1 %v4306_v26  ;;  %4403 = vmatpush1.msra.mxu0 %v5942_v55 }
 0x2a5   :  { %4477 = vmatprep.subr.mxu1 %v9371_v35  ;;  %4404 = vmatprep.subr.mxu0 %v9371_v35 }
 0x2a6   :  { %4478 = vmatpush1.msra.mxu1 %v4305_v48  ;;  %4405 = vmatpush1.msra.mxu0 %v5941_v15 }
 0x2a7   :  { %4479 = vmatprep.subr.mxu1 %v9371_v35  ;;  %4406 = vmatprep.subr.mxu0 %v9371_v35 }
 0x2a8   :  { %4480 = vmatpush1.msra.mxu1 %v4304_v0  ;;  %4407 = vmatpush1.msra.mxu0 %v5940_v42  ;;  %v2629_v19 = vpop.f32.mrf.mxu0  ;;  %v2682_v63 = vpop.f32.mrf.mxu1 }
 0x2a9   :  { %4481 = vmatprep.subr.mxu1 %v9371_v35  ;;  %4408 = vmatprep.subr.mxu0 %v9371_v35 }
 0x2aa   :  { %4482 = vmatpush1.msra.mxu1 %v4303_v54  ;;  %4409 = vmatpush1.msra.mxu0 %v5939_v45  ;;  %v2631_v26 = vpop.f32.mrf.mxu0  ;;  %v2684_v55 = vpop.f32.mrf.mxu1 }
 0x2ab   :  { %4483 = vmatprep.subr.mxu1 %v9371_v35  ;;  %4410 = vmatprep.subr.mxu0 %v9371_v35  ;;  %v2685_v10 = vadd.f32 %v2684_v55, %v8620_v8  ;;  %v9440_v55 = vld [vmem:[#allocation15_spill] sm:$0xff] }
 0x2ac   :  { %4484 = vmatpush1.msra.mxu1 %v4302_v61  ;;  %4411 = vmatpush1.msra.mxu0 %v5938_v34  ;;  %v2633_v48 = vpop.f32.mrf.mxu0  ;;  %v2686_v15 = vpop.f32.mrf.mxu1 }
 0x2ad   :  { %4485 = vmatprep.subr.mxu1 %v9371_v35  ;;  %4412 = vmatprep.subr.mxu0 %v9371_v35  ;;  %v2634_v39 = vadd.f32 %v2633_v48, %v8638_v1  ;;  %v2687_v44 = vadd.f32 %v2686_v15, %v8640_v32 }
 0x2ae   :  { %4486 = vmatpush1.msra.mxu1 %v4301_v4  ;;  %4413 = vmatpush1.msra.mxu0 %v5937_v5  ;;  %v2635_v0 = vpop.f32.mrf.mxu0  ;;  %v2688_v42 = vpop.f32.mrf.mxu1 }
 0x2af   :  { %4487 = vmatprep.subr.mxu1 %v9371_v35  ;;  %4414 = vmatprep.subr.mxu0 %v9371_v35  ;;  %v2636_v6 = vadd.f32 %v2635_v0, %v8658_v7  ;;  %v2689_v36 = vadd.f32 %v2688_v42, %v8660_v29 }
 0x2b0   :  { %4488 = vmatpush1.msra.mxu1 %v4300_v53  ;;  %4415 = vmatpush1.msra.mxu0 %v5936_v49  ;;  %v2639_v54 = vpop.f32.mrf.mxu0  ;;  %v2692_v45 = vpop.f32.mrf.mxu1 }
 0x2b1   :  { %4489 = vmatprep.subr.mxu1 %v9371_v35  ;;  %4416 = vmatprep.subr.mxu0 %v9371_v35 }
 0x2b2   :  { %4490 = vmatpush1.msra.mxu1 %v4299_v16  ;;  %4417 = vmatpush1.msra.mxu0 %v5935_v21  ;;  %v2641_v61 = vpop.f32.mrf.mxu0  ;;  %v2694_v34 = vpop.f32.mrf.mxu1 }
 0x2b3   :  { %4491 = vmatprep.subr.mxu1 %v9371_v35  ;;  %4418 = vmatprep.subr.mxu0 %v9371_v35  ;;  %v2695_v32 = vadd.f32 %v2694_v34, %v9440_v55 }
 0x2b4   :  { %4492 = vmatpush1.msra.mxu1 %v4298_v23  ;;  %4419 = vmatpush1.msra.mxu0 %v5934_v22  ;;  %v2643_v4 = vpop.f32.mrf.mxu0  ;;  %v2696_v5 = vpop.f32.mrf.mxu1 }
 0x2b5   :  { %4501 = vmatprep.subr.mxu1 %v9371_v35  ;;  %4428 = vmatprep.subr.mxu0 %v9371_v35  ;;  %v2644_v48 = vadd.f32 %v2643_v4, %v2239_v46  ;;  %v2697_v7 = vadd.f32 %v2696_v5, %v2292_v56  ;;  %v9450_v56 = vld [vmem:[#allocation27_spill] sm:$0xff] }
 0x2b6   :  { %4502 = vmatpush2.msra.mxu1 %v4325_v43  ;;  %4429 = vmatpush2.msra.mxu0 %v5961_v13  ;;  %v2645_v53 = vpop.f32.mrf.mxu0  ;;  %v2698_v49 = vpop.f32.mrf.mxu1 }
 0x2b7   :  { %4503 = vmatprep.subr.mxu1 %v9371_v35  ;;  %4430 = vmatprep.subr.mxu0 %v9371_v35  ;;  %v2646_v15 = vadd.f32 %v2645_v53, %v2241_v52  ;;  %v2699_v29 = vadd.f32 %v2698_v49, %v2294_v59 }
 0x2b8   :  { %4504 = vmatpush2.msra.mxu1 %v4324_v57  ;;  %4431 = vmatpush2.msra.mxu0 %v5960_v20 }
 0x2b9   :  { %4505 = vmatprep.subr.mxu1 %v9371_v35  ;;  %4432 = vmatprep.subr.mxu0 %v9371_v35 }
 0x2ba   :  { %4506 = vmatpush2.msra.mxu1 %v4323_v28  ;;  %4433 = vmatpush2.msra.mxu0 %v5959_v60 }
 0x2bb   :  { %4507 = vmatprep.subr.mxu1 %v9371_v35  ;;  %4434 = vmatprep.subr.mxu0 %v9371_v35 }
 0x2bc   :  { %4508 = vmatpush2.msra.mxu1 %v4322_v3  ;;  %4435 = vmatpush2.msra.mxu0 %v5958_v12 }
 0x2bd   :  { %4509 = vmatprep.subr.mxu1 %v9371_v35  ;;  %4436 = vmatprep.subr.mxu0 %v9371_v35 }
 0x2be   :  { %4510 = vmatpush2.msra.mxu1 %v4321_v18  ;;  %4437 = vmatpush2.msra.mxu0 %v5957_v31 }
 0x2bf   :  { %4511 = vmatprep.subr.mxu1 %v9371_v35  ;;  %4438 = vmatprep.subr.mxu0 %v9371_v35 }
 0x2c0   :  { %4512 = vmatpush2.msra.mxu1 %v4320_v11  ;;  %4439 = vmatpush2.msra.mxu0 %v5956_v9 }
 0x2c1   :  { %4513 = vmatprep.subr.mxu1 %v9371_v35  ;;  %4440 = vmatprep.subr.mxu0 %v9371_v35 }
 0x2c2   :  { %4514 = vmatpush2.msra.mxu1 %v4319_v25  ;;  %4441 = vmatpush2.msra.mxu0 %v5955_v27 }
 0x2c3   :  { %4515 = vmatprep.subr.mxu1 %v9371_v35  ;;  %4442 = vmatprep.subr.mxu0 %v9371_v35 }
 0x2c4   :  { %4516 = vmatpush2.msra.mxu1 %v4318_v51  ;;  %4443 = vmatpush2.msra.mxu0 %v5954_v58 }
 0x2c5   :  { %4517 = vmatprep.subr.mxu1 %v9371_v35  ;;  %4444 = vmatprep.subr.mxu0 %v9371_v35 }
 0x2c6   :  { %4518 = vmatpush2.msra.mxu1 %v4317_v2  ;;  %4445 = vmatpush2.msra.mxu0 %v5953_v41 }
 0x2c7   :  { %4519 = vmatprep.subr.mxu1 %v9371_v35  ;;  %4446 = vmatprep.subr.mxu0 %v9371_v35 }
 0x2c8   :  { %4520 = vmatpush2.msra.mxu1 %v4316_v14  ;;  %4447 = vmatpush2.msra.mxu0 %v5952_v38 }
 0x2c9   :  { %4521 = vmatprep.subr.mxu1 %v9371_v35  ;;  %4448 = vmatprep.subr.mxu0 %v9371_v35 }
 0x2ca   :  { %4522 = vmatpush2.msra.mxu1 %v4315_v47  ;;  %4449 = vmatpush2.msra.mxu0 %v5951_v62 }
 0x2cb   :  { %4523 = vmatprep.subr.mxu1 %v9371_v35  ;;  %4450 = vmatprep.subr.mxu0 %v9371_v35 }
 0x2cc   :  { %4524 = vmatpush2.msra.mxu1 %v4314_v37  ;;  %4451 = vmatpush2.msra.mxu0 %v5950_v40  ;;  %v2630_v37 = vadd.f32 %v2629_v19, %v8598_v33  ;;  %v2683_v40 = vadd.f32 %v2682_v63, %v8600_v17  ;;  %v4164_v33 = vld [vmem:[%s9364_s5] sm:$0xf]  ;;  %v9438_v19 = vld [vmem:[#allocation14_spill] sm:$0xff] }
 0x2cd   :  { %4722 = vmatprep.subr.mxu1 %v9371_v35  ;;  %4589 = vmatprep.subr.mxu0 %v9371_v35  ;;  %v2632_v35 = vadd.f32 %v2631_v26, %v8618_v30  ;;  %v4202_v17 = vld [vmem:[%s9365_s6] sm:$0xf]  ;;  %v2693_v63 = vadd.f32 %v2692_v45, %v9438_v19  ;;  %v8749_v52 = vrot.slane %v4164_v33, %v9450_v56  ;;  %s6654_s6 = smov [#allocation5]  }
 0x2ce   :  { %v9437_v30 = vld [vmem:[#allocation8_spill] sm:$0xff]  ;;  %v9439_v26 = vld [vmem:[#allocation13_spill] sm:$0xff]  ;;  %v8752_v59 = vrot.slane %v4202_v17, %v9450_v56  ;;  %s5199_s18 = sshll.u32 %s6654_s6, 4  ;;  %s5200_s18 = int_to_ptr.vmem [resolvable:$true] %s5199_s18 }
 0x2cf   :  { %v2640_v8 = vadd.f32 %v2639_v54, %v9437_v30  ;;  %v2642_v1 = vadd.f32 %v2641_v61, %v9439_v26  ;;  %v9444_v54 = vld [vmem:[#allocation26_spill] sm:$0xff]  ;;  %v9447_v61 = vld [vmem:[#allocation25_spill] sm:$0xff]  ;;  %9451 = vst [vmem:[#allocation16_spill] sm:$0xff] %v8749_v52  ;;  %s6630_s19 = scalar_lea.vmem %s5200_s18, 32  ;;  %p6635_p1 = scmp.lt.s32.totalorder %s5200_s18, %s5200_s18 }
 0x2d0   :  { %v8737_v19 = vrot.slane %v4164_v33, %v9444_v54  ;;  %v8740_v45 = vrot.slane %v4202_v17, %v9444_v54  ;;  %v8743_v34 = vrot.slane %v4164_v33, %v9447_v61  ;;  %v8746_v46 = vrot.slane %v4202_v17, %v9447_v61  ;;  %9452 = vst [vmem:[#allocation17_spill] sm:$0xff] %v8752_v59  ;;  %p6631_p0 = scmp.ne.s32.totalorder %s5200_s18, %s6630_s19  ;;  %p6636_p2 = scmp.lt.s32.totalorder %s6630_s19, %s6630_s19 }
 0x2d2   :  { %9445 = vst [vmem:[#allocation11_spill] sm:$0xff] %v8737_v19  ;;  %9446 = vst [vmem:[#allocation22_spill] sm:$0xff] %v8740_v45  ;;  %p6637_p3 = por %p6636_p2, %p6635_p1 }
 0x2d3   :  { %9448 = vst [vmem:[#allocation12_spill] sm:$0xff] %v8743_v34  ;;  %9449 = vst [vmem:[#allocation23_spill] sm:$0xff] %v8746_v46 }
 0x2d4   :  { %p6638_p4 = pnand %p6637_p3, %p6631_p0 }
 0x2e1   :  { %v3098_v16 = vpop.f32.mrf.mxu0  ;;  %v3151_v21 = vpop.f32.mrf.mxu1 }
 0x2e2   :  { %v3172_v4 = vadd.f32 %v3151_v21, %v2683_v40 }
 0x2e3   :  { %v3100_v23 = vpop.f32.mrf.mxu0  ;;  %v3153_v22 = vpop.f32.mrf.mxu1 }
 0x2e4   :  { %v3171_v5 = vadd.f32 %v3100_v23, %v2632_v35  ;;  %v3173_v53 = vadd.f32 %v3153_v22, %v2685_v10 }
 0x2e5   :  { %v3102_v43 = vpop.f32.mrf.mxu0  ;;  %v3155_v13 = vpop.f32.mrf.mxu1 }
 0x2e6   :  { %v3174_v49 = vadd.f32 %v3102_v43, %v2634_v39  ;;  %v3176_v26 = vadd.f32 %v3155_v13, %v2687_v44 }
 0x2e7   :  { %v3104_v57 = vpop.f32.mrf.mxu0  ;;  %v3157_v20 = vpop.f32.mrf.mxu1 }
 0x2e8   :  { %v3175_v55 = vadd.f32 %v3104_v57, %v2636_v6  ;;  %v3177_v54 = vadd.f32 %v3157_v20, %v2689_v36 }
 0x2e9   :  { %v3108_v28 = vpop.f32.mrf.mxu0  ;;  %v3161_v60 = vpop.f32.mrf.mxu1 }
 0x2ea   :  { %v3178_v45 = vadd.f32 %v3108_v28, %v2640_v8  ;;  %v9460_v8 = vld [vmem:[#allocation16_spill] sm:$0xff] }
 0x2eb   :  { %v3110_v3 = vpop.f32.mrf.mxu0  ;;  %v3163_v12 = vpop.f32.mrf.mxu1 }
 0x2ec   :  { %v3179_v34 = vadd.f32 %v3110_v3, %v2642_v1  ;;  %v3181_v19 = vadd.f32 %v3163_v12, %v2695_v32  ;;  %v9454_v3 = vld [vmem:[#allocation11_spill] sm:$0xff] }
 0x2ed   :  { %v3112_v18 = vpop.f32.mrf.mxu0  ;;  %v3165_v31 = vpop.f32.mrf.mxu1 }
 0x2ef   :  { %v3114_v11 = vpop.f32.mrf.mxu0  ;;  %v3167_v9 = vpop.f32.mrf.mxu1 }
 0x2f0   :  { %v3183_v56 = vadd.f32 %v3114_v11, %v2646_v15  ;;  %v3185_v59 = vadd.f32 %v3167_v9, %v2699_v29 }
 0x31a   :  { %v3601_v25 = vpop.f32.mrf.mxu0  ;;  %v3654_v27 = vpop.f32.mrf.mxu1 }
 0x31c   :  { %v3603_v51 = vpop.f32.mrf.mxu0  ;;  %v3656_v58 = vpop.f32.mrf.mxu1 }
 0x31d   :  { %v3676_v21 = vadd.f32 %v3656_v58, %v3173_v53 }
 0x31e   :  { %v3605_v2 = vpop.f32.mrf.mxu0  ;;  %v3658_v41 = vpop.f32.mrf.mxu1 }
 0x31f   :  { %v3677_v39 = vadd.f32 %v3605_v2, %v3174_v49  ;;  %v3679_v44 = vadd.f32 %v3658_v41, %v3176_v26 }
 0x320   :  { %v3607_v14 = vpop.f32.mrf.mxu0  ;;  %v3660_v38 = vpop.f32.mrf.mxu1 }
 0x321   :  { %v3678_v23 = vadd.f32 %v3607_v14, %v3175_v55  ;;  %v3680_v22 = vadd.f32 %v3660_v38, %v3177_v54 }
 0x322   :  { %v3611_v47 = vpop.f32.mrf.mxu0  ;;  %v3664_v62 = vpop.f32.mrf.mxu1 }
 0x323   :  { %v3681_v43 = vadd.f32 %v3611_v47, %v3178_v45  ;;  %v9458_v47 = vld [vmem:[#allocation22_spill] sm:$0xff] }
 0x324   :  { %v8712_v50 = vpop.f32.mrf.mxu0  ;;  %v8714_v24 = vpop.f32.mrf.mxu1 }
 0x325   :  { %9435 = vst [vmem:[#allocation9_spill] sm:$0xff] %v8712_v50  ;;  %9436 = vst [vmem:[#allocation18_spill] sm:$0xff] %v8714_v24  ;;  %v9441_v24 = vld [vmem:[#allocation24_spill] sm:$0xff] }
 0x326   :  { %v3615_v0 = vpop.f32.mrf.mxu0  ;;  %v3668_v42 = vpop.f32.mrf.mxu1  ;;  %v8731_v50 = vrot.slane %v4164_v33, %v9441_v24  ;;  %v8734_v30 = vrot.slane %v4202_v17, %v9441_v24  ;;  %v3170_v24 = vadd.f32 %v3098_v16, %v2630_v37  ;;  %v3184_v33 = vadd.f32 %v3165_v31, %v2697_v7  ;;  %v9459_v37 = vld [vmem:[#allocation12_spill] sm:$0xff] }
 0x327   :  { %v3675_v17 = vadd.f32 %v3654_v27, %v3172_v4  ;;  %v3674_v16 = vadd.f32 %v3603_v51, %v3171_v5 }
 0x328   :  { %9442 = vst [vmem:[#allocation10_spill] sm:$0xff] %v8731_v50  ;;  %9443 = vst [vmem:[#allocation20_spill] sm:$0xff] %v8734_v30  ;;  %v3180_v30 = vadd.f32 %v3161_v60, %v2693_v63  ;;  %v3617_v61 = vpop.f32.mrf.mxu0  ;;  %v3670_v46 = vpop.f32.mrf.mxu1  ;;  %v3182_v50 = vadd.f32 %v3112_v18, %v2644_v48  ;;  %v3673_v52 = vadd.f32 %v3601_v25, %v3170_v24 }
 0x329   :  { %v3687_v58 = vadd.f32 %v3668_v42, %v3184_v33  ;;  %v3686_v1 = vadd.f32 %v3617_v61, %v3183_v56  ;;  %v3688_v32 = vadd.f32 %v3670_v46, %v3185_v59  ;;  %v9462_v42 = vld [vmem:[#allocation17_spill] sm:$0xff] }
 0x32a   :  { %v3683_v13 = vadd.f32 %v3664_v62, %v3180_v30  ;;  %v3685_v51 = vadd.f32 %v3615_v0, %v3182_v50  ;;  %v9461_v50 = vld [vmem:[#allocation23_spill] sm:$0xff] }
 0x32c   :  { %v9455_v11 = vld [vmem:[#allocation9_spill] sm:$0xff]  ;;  %v9456_v25 = vld [vmem:[#allocation18_spill] sm:$0xff] }
 0x32d   :  { %v3682_v9 = vadd.f32 %v9455_v11, %v3179_v34  ;;  %v3684_v27 = vadd.f32 %v9456_v25, %v3181_v19 }
 0x32f   :  { %v9453_v28 = vld [vmem:[#allocation10_spill] sm:$0xff]  ;;  %v9457_v14 = vld [vmem:[#allocation20_spill] sm:$0xff] }
 0x353   :  { %v4076_v35 = vpop.f32.mrf.mxu0  ;;  %v4129_v10 = vpop.f32.mrf.mxu1 }
 0x354   :  { %v4148_v6 = vadd.f32 %v4076_v35, %v3673_v52  ;;  %v4150_v36 = vadd.f32 %v4129_v10, %v3675_v17 }
 0x355   :  { %v4078_v57 = vpop.f32.mrf.mxu0  ;;  %v4131_v20 = vpop.f32.mrf.mxu1 }
 0x356   :  { %v4186_v60 = vmul.f32 %v9453_v28, %v4148_v6  ;;  %v4188_v12 = vmul.f32 %v9454_v3, %v4150_v36  ;;  %v4149_v18 = vadd.f32 %v4078_v57, %v3674_v16  ;;  %v4151_v31 = vadd.f32 %v4131_v20, %v3676_v21 }
 0x357   :  { %v4080_v2 = vpop.f32.mrf.mxu0  ;;  %v4133_v41 = vpop.f32.mrf.mxu1 }
 0x358   :  { %v4224_v38 = vadd.f32 %v9457_v14, %v4186_v60  ;;  %v4226_v62 = vadd.f32 %v9458_v47, %v4188_v12  ;;  %v4187_v40 = vmul.f32 %v9459_v37, %v4149_v18  ;;  %v4189_v63 = vmul.f32 %v9460_v8, %v4151_v31 }
 0x359   :  { %v4152_v48 = vadd.f32 %v4080_v2, %v3677_v39  ;;  %v4154_v7 = vadd.f32 %v4133_v41, %v3679_v44  ;;  %v4082_v15 = vpop.f32.mrf.mxu0  ;;  %v4135_v29 = vpop.f32.mrf.mxu1 }
 0x35a   :  { %v4240_v30 = vmax.f32 %v4224_v38, 0.0  ;;  %v4242_v19 = vmax.f32 %v4226_v62, 0.0  ;;  %v4225_v0 = vadd.f32 %v9461_v50, %v4187_v40  ;;  %v4227_v45 = vadd.f32 %v9462_v42, %v4189_v63 }
 0x35b   :  { %v4190_v34 = vmul.f32 %v9453_v28, %v4152_v48  ;;  %v4192_v52 = vmul.f32 %v9454_v3, %v4154_v7  ;;  %v4153_v24 = vadd.f32 %v4082_v15, %v3678_v23  ;;  %v4155_v4 = vadd.f32 %v4135_v29, %v3680_v22  ;;  %v4086_v5 = vpop.f32.mrf.mxu0  ;;  %v4139_v53 = vpop.f32.mrf.mxu1 }
 0x35c   :  { %4256 = vst [vmem:[#allocation4 + $0x68] sm:$0xff] %v4240_v30  ;;  %4258 = vst [vmem:[#allocation4 + $0x38] sm:$0xff] %v4242_v19  ;;  %v4241_v46 = vmax.f32 %v4225_v0, 0.0  ;;  %v4243_v59 = vmax.f32 %v4227_v45, 0.0  ;;  %v4156_v49 = vadd.f32 %v4086_v5, %v3681_v43  ;;  %v4158_v26 = vadd.f32 %v4139_v53, %v3683_v13 }
 0x35d   :  { %v4228_v55 = vadd.f32 %v9457_v14, %v4190_v34  ;;  %v4230_v54 = vadd.f32 %v9458_v47, %v4192_v52  ;;  %v4191_v61 = vmul.f32 %v9459_v37, %v4153_v24  ;;  %v4193_v33 = vmul.f32 %v9460_v8, %v4155_v4  ;;  %v4088_v17 = vpop.f32.mrf.mxu0  ;;  %v4141_v56 = vpop.f32.mrf.mxu1 }
 0x35e   :  { %4257 = vst [vmem:[#allocation4 + $0x20] sm:$0xff] %v4241_v46  ;;  %4259 = vst [vmem:[#allocation4 + $0x78] sm:$0xff] %v4243_v59  ;;  %v4194_v16 = vmul.f32 %v9453_v28, %v4156_v49  ;;  %v4196_v21 = vmul.f32 %v9454_v3, %v4158_v26  ;;  %v4157_v35 = vadd.f32 %v4088_v17, %v3682_v9 }
 0x35f   :  { %v4159_v10 = vadd.f32 %v4141_v56, %v3684_v27  ;;  %v4244_v39 = vmax.f32 %v4228_v55, 0.0  ;;  %v4246_v44 = vmax.f32 %v4230_v54, 0.0  ;;  %v4229_v6 = vadd.f32 %v9461_v50, %v4191_v61  ;;  %v4090_v23 = vpop.f32.mrf.mxu0  ;;  %v4143_v22 = vpop.f32.mrf.mxu1 }
 0x360   :  { %v4231_v36 = vadd.f32 %v9462_v42, %v4193_v33  ;;  %v4232_v43 = vadd.f32 %v9457_v14, %v4194_v16  ;;  %v4234_v13 = vadd.f32 %v9458_v47, %v4196_v21  ;;  %v4195_v57 = vmul.f32 %v9459_v37, %v4157_v35 }
 0x361   :  { %v4197_v20 = vmul.f32 %v9460_v8, %v4159_v10  ;;  %4260 = vst [vmem:[#allocation4 + $0x8] sm:$0xff] %v4244_v39  ;;  %4262 = vst [vmem:[#allocation4 + $0x58] sm:$0xff] %v4246_v44  ;;  %v4245_v60 = vmax.f32 %v4229_v6, 0.0  ;;  %v4160_v18 = vadd.f32 %v4090_v23, %v3685_v51  ;;  %v4162_v31 = vadd.f32 %v4143_v22, %v3687_v58  ;;  %v4092_v11 = vpop.f32.mrf.mxu0  ;;  %v4145_v9 = vpop.f32.mrf.mxu1 }
 0x362   :  { %v4247_v12 = vmax.f32 %v4231_v36, 0.0  ;;  %v4248_v25 = vmax.f32 %v4232_v43, 0.0  ;;  %v4250_v27 = vmax.f32 %v4234_v13, 0.0  ;;  %v4233_v2 = vadd.f32 %v9461_v50, %v4195_v57  ;;  %v6008_v13 = vld [vmem:[%s9366_s7 + $0x318] sm:$0xff] }
 0x363   :  { %v4235_v41 = vadd.f32 %v9462_v42, %v4197_v20  ;;  %4261 = vst [vmem:[#allocation4 + $0x50] sm:$0xff] %v4245_v60  ;;  %v4198_v38 = vmul.f32 %v9453_v28, %v4160_v18  ;;  %v4200_v62 = vmul.f32 %v9454_v3, %v4162_v31  ;;  %v4161_v40 = vadd.f32 %v4092_v11, %v3686_v1  ;;  %v4276_v48 = vld [vmem:[#allocation4 + $0x68] sm:$0xc]  ;;  %v4278_v7 = vld [vmem:[#allocation4 + $0x38] sm:$0xc] }
 0x364   :  { %4263 = vst [vmem:[#allocation4 + $0x40] sm:$0xff] %v4247_v12  ;;  %v4163_v63 = vadd.f32 %v4145_v9, %v3688_v32  ;;  %4264 = vst [vmem:[#allocation4 + $0x10] sm:$0xff] %v4248_v25  ;;  %v4249_v51 = vmax.f32 %v4233_v2, 0.0  ;;  %v4284_v15 = vrot.slane %v4276_v48, 2  ;;  %v4272_v45 = vld [vmem:[#allocation4 + $0x68] sm:$0x3] }
 0x365   :  { %4266 = vst [vmem:[#allocation4 + $0x30] sm:$0xff] %v4250_v27  ;;  %v4251_v58 = vmax.f32 %v4235_v41, 0.0  ;;  %v4236_v29 = vadd.f32 %v9457_v14, %v4198_v38  ;;  %v4238_v30 = vadd.f32 %v9458_v47, %v4200_v62  ;;  %v4199_v19 = vmul.f32 %v9459_v37, %v4161_v40  ;;  %v4277_v28 = vld [vmem:[#allocation4 + $0x20] sm:$0xc]  ;;  %v4279_v3 = vld [vmem:[#allocation4 + $0x78] sm:$0xc] }
 0x366   :  { %v4201_v0 = vmul.f32 %v9460_v8, %v4163_v63  ;;  %4265 = vst [vmem:[#allocation4 + $0x48] sm:$0xff] %v4249_v51  ;;  %v4285_v1 = vrot.slane %v4277_v28, 2  ;;  %v4274_v32 = vld [vmem:[#allocation4 + $0x38] sm:$0x3]  ;;  %v4286_v34 = vrot.slane %v4278_v7, 2  ;;  %v4292_v52 = vmax.f32 %v4272_v45, %v4284_v15  ;;  %v5979_v15 = vld [vmem:[%s9366_s7 + $0x238] sm:$0xff] }
 0x367   :  { %4267 = vst [vmem:[#allocation4 + $0x28] sm:$0xff] %v4251_v58  ;;  %v4252_v24 = vmax.f32 %v4236_v29, 0.0  ;;  %v4254_v4 = vmax.f32 %v4238_v30, 0.0  ;;  %v4237_v5 = vadd.f32 %v9461_v50, %v4199_v19  ;;  %v4273_v47 = vld [vmem:[#allocation4 + $0x20] sm:$0x3]  ;;  %v4287_v46 = vrot.slane %v4279_v3, 2 }
 0x368   :  { %v4239_v14 = vadd.f32 %v9462_v42, %v4201_v0  ;;  %v4331_v53 = vld [vmem:[#allocation4 + $0x20] sm:$0xc0]  ;;  %v4275_v37 = vld [vmem:[#allocation4 + $0x78] sm:$0x3]  ;;  %v4293_v8 = vmax.f32 %v4273_v47, %v4285_v1  ;;  %v4294_v59 = vmax.f32 %v4274_v32, %v4286_v34  ;;  %v4333_v49 = vld [vmem:[#allocation4 + $0x78] sm:$0xc0] }
 0x369   :  { %v4339_v26 = vrot.slane %v4331_v53, 2  ;;  %4268 = vst [vmem:[#allocation4 + $0x70] sm:$0xf] %v4252_v24  ;;  %4270 = vst [vmem:[#allocation4 + $0x60] sm:$0xf] %v4254_v4  ;;  %v4253_v55 = vmax.f32 %v4237_v5, 0.0  ;;  %v4295_v17 = vmax.f32 %v4275_v37, %v4287_v46 }
 0x36a   :  { %v4255_v54 = vmax.f32 %v4239_v14, 0.0  ;;  %v4327_v61 = vld [vmem:[#allocation4 + $0x20] sm:$0x30]  ;;  %v4341_v33 = vrot.slane %v4333_v49, 2  ;;  %v4329_v56 = vld [vmem:[#allocation4 + $0x78] sm:$0x30]  ;;  %v4296_v36 = vmax.f32 %v4292_v52, %v4294_v59 }
 0x36b   :  { %v4347_v16 = vmax.f32 %v4327_v61, %v4339_v26  ;;  %v4330_v50 = vld [vmem:[#allocation4 + $0x68] sm:$0xc0]  ;;  %v4332_v21 = vld [vmem:[#allocation4 + $0x38] sm:$0xc0]  ;;  %4269 = vst [vmem:[#allocation4] sm:$0xf] %v4253_v55  ;;  %v4297_v6 = vmax.f32 %v4293_v8, %v4295_v17 }
 0x36c   :  { %4271 = vst [vmem:[#allocation4 + $0x18] sm:$0xf] %v4255_v54  ;;  %v4349_v42 = vmax.f32 %v4329_v56, %v4341_v33  ;;  %v4326_v35 = vld [vmem:[#allocation4 + $0x68] sm:$0x30]  ;;  %v4338_v10 = vrot.slane %v4330_v50, 2  ;;  %v4340_v39 = vrot.slane %v4332_v21, 2 }
 0x36d   :  { %v4536_v44 = vld [vmem:[#allocation4 + $0x50] sm:$0xc]  ;;  %v4328_v23 = vld [vmem:[#allocation4 + $0x38] sm:$0x30]  ;;  %v4538_v22 = vld [vmem:[#allocation4 + $0x40] sm:$0xc]  ;;  %5963 = vmatprep.mubr.msk.f32.mxu1 %vm2184_vm6, %v4297_v6 }
 0x36e   :  { %v4544_v43 = vrot.slane %v4536_v44, 2  ;;  %v4351_v57 = vmax.f32 %v4347_v16, %v4349_v42  ;;  %v4346_v20 = vmax.f32 %v4326_v35, %v4338_v10  ;;  %v4348_v60 = vmax.f32 %v4328_v23, %v4340_v39  ;;  %v4532_v12 = vld [vmem:[#allocation4 + $0x50] sm:$0x3]  ;;  %v4665_v31 = vld [vmem:[#allocation4 + $0x50] sm:$0xc0]  ;;  %4526 = vmatmul.mubr.f32.vlgmr.msra.gmra.mxu1 %v4296_v36  ;;  %v6007_v38 = vld [vmem:[%s9366_s7 + $0x310] sm:$0xff] }
 0x36f   :  { %v4546_v18 = vrot.slane %v4538_v22, 2  ;;  %v4534_v11 = vld [vmem:[#allocation4 + $0x40] sm:$0x3]  ;;  %v4667_v25 = vld [vmem:[#allocation4 + $0x40] sm:$0xc0]  ;;  %v4673_v27 = vrot.slane %v4665_v31, 2  ;;  %4723 = vmatpush1.msra.mxu1 %v6008_v13 }
 0x370   :  { %v4552_v9 = vmax.f32 %v4532_v12, %v4544_v43  ;;  %v4384_v2 = vrot.slane %v4351_v57, 4  ;;  %v4350_v41 = vmax.f32 %v4346_v20, %v4348_v60  ;;  %v4661_v40 = vld [vmem:[#allocation4 + $0x50] sm:$0x30]  ;;  %v4675_v63 = vrot.slane %v4667_v25, 2  ;;  %v4663_v48 = vld [vmem:[#allocation4 + $0x40] sm:$0x30] }
 0x371   :  { %v4554_v62 = vmax.f32 %v4534_v11, %v4546_v18  ;;  %v4681_v51 = vmax.f32 %v4661_v40, %v4673_v27  ;;  %v9463_v58 = vmov 0.0   ;;  %v6006_v19 = vld [vmem:[%s9366_s7 + $0x308] sm:$0xff]  ;;  %v5978_v0 = vld [vmem:[%s9366_s7 + $0x230] sm:$0xff]  ;;  %v6005_v1 = vld [vmem:[%s9366_s7 + $0x300] sm:$0xff] }
 0x372   :  { %5962 = vmatprep.mubr.msk.f32.mxu0 %vm2184_vm6, %v4384_v2  ;;  %4724 = vmatprep.subr.mxu1 %v9463_v58  ;;  %v4383_v7 = vrot.slane %v4350_v41, 4  ;;  %v4683_v30 = vmax.f32 %v4663_v48, %v4675_v63  ;;  %v5977_v3 = vld [vmem:[%s9366_s7 + $0x228] sm:$0xff]  ;;  %v5976_v32 = vld [vmem:[%s9366_s7 + $0x220] sm:$0xff]  ;;  %v6004_v34 = vld [vmem:[%s9366_s7 + $0x2f8] sm:$0xff] }
 0x373   :  { %v4556_v29 = vmax.f32 %v4552_v9, %v4554_v62  ;;  %4725 = vmatpush1.msra.mxu1 %v6007_v38  ;;  %v5975_v52 = vld [vmem:[%s9366_s7 + $0x218] sm:$0xff]  ;;  %v6003_v24 = vld [vmem:[%s9366_s7 + $0x2f0] sm:$0xff]  ;;  %v6002_v5 = vld [vmem:[%s9366_s7 + $0x2e8] sm:$0xff] }
 0x374   :  { %4453 = vmatmul.mubr.f32.vlgmr.msra.gmra.mxu0 %v4383_v7  ;;  %4726 = vmatprep.subr.mxu1 %v9463_v58  ;;  %v4685_v28 = vmax.f32 %v4681_v51, %v4683_v30  ;;  %v5974_v4 = vld [vmem:[%s9366_s7 + $0x210] sm:$0xff]  ;;  %v5973_v14 = vld [vmem:[%s9366_s7 + $0x208] sm:$0xff]  ;;  %v6001_v47 = vld [vmem:[%s9366_s7 + $0x2e0] sm:$0xff] }
 0x375   :  { %4590 = vmatpush1.msra.mxu0 %v5979_v15  ;;  %5992 = vmatprep.mubr.msk.f32.mxu0 %vm2184_vm6, %v4556_v29  ;;  %v5972_v53 = vld [vmem:[%s9366_s7 + $0x200] sm:$0xff]  ;;  %v6000_v37 = vld [vmem:[%s9366_s7 + $0x2d8] sm:$0xff]  ;;  %v5999_v8 = vld [vmem:[%s9366_s7 + $0x2d0] sm:$0xff] }
 0x376   :  { %4591 = vmatprep.subr.mxu0 %v9463_v58  ;;  %4727 = vmatpush1.msra.mxu1 %v6006_v19  ;;  %v4718_v45 = vrot.slane %v4685_v28, 4  ;;  %v5971_v46 = vld [vmem:[%s9366_s7 + $0x1f8] sm:$0xff]  ;;  %v5970_v59 = vld [vmem:[%s9366_s7 + $0x1f0] sm:$0xff]  ;;  %v5998_v49 = vld [vmem:[%s9366_s7 + $0x2c8] sm:$0xff] }
 0x377   :  { %4592 = vmatpush1.msra.mxu0 %v5978_v0  ;;  %4728 = vmatprep.subr.mxu1 %v9463_v58  ;;  %v5969_v26 = vld [vmem:[%s9366_s7 + $0x1e8] sm:$0xff]  ;;  %v5997_v55 = vld [vmem:[%s9366_s7 + $0x2c0] sm:$0xff]  ;;  %v5996_v61 = vld [vmem:[%s9366_s7 + $0x2b8] sm:$0xff] }
 0x378   :  { %4593 = vmatprep.subr.mxu0 %v9463_v58  ;;  %6021 = vmatprep.mubr.msk.f32.mxu1 %vm2184_vm6, %v4718_v45  ;;  %v5968_v54 = vld [vmem:[%s9366_s7 + $0x1e0] sm:$0xff]  ;;  %v5967_v33 = vld [vmem:[%s9366_s7 + $0x1d8] sm:$0xff]  ;;  %v5995_v17 = vld [vmem:[%s9366_s7 + $0x2b0] sm:$0xff] }
 0x379   :  { %4594 = vmatpush1.msra.mxu0 %v5977_v3  ;;  %4729 = vmatpush1.msra.mxu1 %v6005_v1  ;;  %v5966_v56 = vld [vmem:[%s9366_s7 + $0x1d0] sm:$0xff]  ;;  %v5994_v16 = vld [vmem:[%s9366_s7 + $0x2a8] sm:$0xff]  ;;  %v5993_v21 = vld [vmem:[%s9366_s7 + $0x2a0] sm:$0xff] }
 0x37a   :  { %4595 = vmatprep.subr.mxu0 %v9463_v58  ;;  %4730 = vmatprep.subr.mxu1 %v9463_v58  ;;  %v5965_v50 = vld [vmem:[%s9366_s7 + $0x1c8] sm:$0xff]  ;;  %v5964_v42 = vld [vmem:[%s9366_s7 + $0x1c0] sm:$0xff]  ;;  %v6020_v35 = vld [vmem:[%s9366_s7 + $0x378] sm:$0xff] }
 0x37b   :  { %4596 = vmatpush1.msra.mxu0 %v5976_v32  ;;  %4731 = vmatpush1.msra.mxu1 %v6004_v34  ;;  %v5991_v10 = vld [vmem:[%s9366_s7 + $0x298] sm:$0xff]  ;;  %v6019_v39 = vld [vmem:[%s9366_s7 + $0x370] sm:$0xff]  ;;  %v6018_v6 = vld [vmem:[%s9366_s7 + $0x368] sm:$0xff] }
 0x37c   :  { %4597 = vmatprep.subr.mxu0 %v9463_v58  ;;  %4732 = vmatprep.subr.mxu1 %v9463_v58  ;;  %v5990_v44 = vld [vmem:[%s9366_s7 + $0x290] sm:$0xff]  ;;  %v5989_v36 = vld [vmem:[%s9366_s7 + $0x288] sm:$0xff]  ;;  %v6017_v23 = vld [vmem:[%s9366_s7 + $0x360] sm:$0xff] }
 0x37d   :  { %4598 = vmatpush1.msra.mxu0 %v5975_v52  ;;  %4733 = vmatpush1.msra.mxu1 %v6003_v24  ;;  %v5988_v22 = vld [vmem:[%s9366_s7 + $0x280] sm:$0xff]  ;;  %v6016_v43 = vld [vmem:[%s9366_s7 + $0x358] sm:$0xff]  ;;  %v4666_v57 = vld [vmem:[#allocation4 + $0x58] sm:$0xc0] }
 0x37e   :  { %4599 = vmatprep.subr.mxu0 %v9463_v58  ;;  %4734 = vmatprep.subr.mxu1 %v9463_v58  ;;  %v4664_v13 = vld [vmem:[#allocation4 + $0x8] sm:$0xc0]  ;;  %v5987_v20 = vld [vmem:[%s9366_s7 + $0x278] sm:$0xff]  ;;  %v6015_v60 = vld [vmem:[%s9366_s7 + $0x350] sm:$0xff]  ;;  %v4674_v25 = vrot.slane %v4666_v57, 2 }
 0x37f   :  { %4600 = vmatpush1.msra.mxu0 %v5974_v4  ;;  %4735 = vmatpush1.msra.mxu1 %v6002_v5  ;;  %v4927_v12 = vld [vmem:[#allocation4 + $0x48] sm:$0xc0]  ;;  %v5986_v31 = vld [vmem:[%s9366_s7 + $0x270] sm:$0xff]  ;;  %v6014_v11 = vld [vmem:[%s9366_s7 + $0x348] sm:$0xff]  ;;  %v4672_v9 = vrot.slane %v4664_v13, 2 }
 0x380   :  { %4601 = vmatprep.subr.mxu0 %v9463_v58  ;;  %4736 = vmatprep.subr.mxu1 %v9463_v58  ;;  %v4929_v18 = vld [vmem:[#allocation4 + $0x28] sm:$0xc0]  ;;  %v5985_v27 = vld [vmem:[%s9366_s7 + $0x268] sm:$0xff]  ;;  %v4935_v41 = vrot.slane %v4927_v12, 2  ;;  %v4660_v40 = vld [vmem:[#allocation4 + $0x8] sm:$0x30] }
 0x381   :  { %4602 = vmatpush1.msra.mxu0 %v5973_v14  ;;  %4737 = vmatpush1.msra.mxu1 %v6001_v47  ;;  %v6013_v2 = vld [vmem:[%s9366_s7 + $0x340] sm:$0xff]  ;;  %v4937_v38 = vrot.slane %v4929_v18, 2  ;;  %v4662_v63 = vld [vmem:[#allocation4 + $0x58] sm:$0x30]  ;;  %v6012_v48 = vld [vmem:[%s9366_s7 + $0x338] sm:$0xff]  ;;  %v4680_v51 = vmax.f32 %v4660_v40, %v4672_v9 }
 0x382   :  { %4603 = vmatprep.subr.mxu0 %v9463_v58  ;;  %4738 = vmatprep.subr.mxu1 %v9463_v58  ;;  %v5984_v62 = vld [vmem:[%s9366_s7 + $0x260] sm:$0xff]  ;;  %v4682_v7 = vmax.f32 %v4662_v63, %v4674_v25  ;;  %v4537_v29 = vld [vmem:[#allocation4 + $0x58] sm:$0xc]  ;;  %v5983_v30 = vld [vmem:[%s9366_s7 + $0x258] sm:$0xff] }
 0x383   :  { %4604 = vmatpush1.msra.mxu0 %v5972_v53  ;;  %4739 = vmatpush1.msra.mxu1 %v6000_v37  ;;  %v4535_v15 = vld [vmem:[#allocation4 + $0x8] sm:$0xc]  ;;  %v4923_v19 = vld [vmem:[#allocation4 + $0x48] sm:$0x30]  ;;  %v6011_v28 = vld [vmem:[%s9366_s7 + $0x330] sm:$0xff]  ;;  %v4545_v52 = vrot.slane %v4537_v29, 2 }
 0x384   :  { %4605 = vmatprep.subr.mxu0 %v9463_v58  ;;  %4740 = vmatprep.subr.mxu1 %v9463_v58  ;;  %v4925_v0 = vld [vmem:[#allocation4 + $0x28] sm:$0x30]  ;;  %v4943_v45 = vmax.f32 %v4923_v19, %v4935_v41  ;;  %v4798_v1 = vld [vmem:[#allocation4 + $0x48] sm:$0xc]  ;;  %v4543_v34 = vrot.slane %v4535_v15, 2  ;;  %v5982_v24 = vld [vmem:[%s9366_s7 + $0x250] sm:$0xff]  ;;  %v4684_v5 = vmax.f32 %v4680_v51, %v4682_v7 }
 0x385   :  { %4606 = vmatpush1.msra.mxu0 %v5971_v46  ;;  %4741 = vmatpush1.msra.mxu1 %v5999_v8  ;;  %v4945_v3 = vmax.f32 %v4925_v0, %v4937_v38  ;;  %v4800_v32 = vld [vmem:[#allocation4 + $0x28] sm:$0xc]  ;;  %v6010_v4 = vld [vmem:[%s9366_s7 + $0x328] sm:$0xff]  ;;  %v4806_v47 = vrot.slane %v4798_v1, 2  ;;  %v4531_v8 = vld [vmem:[#allocation4 + $0x8] sm:$0x3] }
 0x386   :  { %4607 = vmatprep.subr.mxu0 %v9463_v58  ;;  %4742 = vmatprep.subr.mxu1 %v9463_v58  ;;  %v5981_v14 = vld [vmem:[%s9366_s7 + $0x248] sm:$0xff]  ;;  %v4808_v53 = vrot.slane %v4800_v32, 2  ;;  %v6009_v37 = vld [vmem:[%s9366_s7 + $0x320] sm:$0xff]  ;;  %v6061_v13 = vld [vmem:[%s9366_s7 + $0x4b0] sm:$0xff] }
 0x387   :  { %4608 = vmatpush1.msra.mxu0 %v5970_v59  ;;  %4743 = vmatpush1.msra.mxu1 %v5998_v49  ;;  %v4947_v46 = vmax.f32 %v4943_v45, %v4945_v3  ;;  %v4533_v59 = vld [vmem:[#allocation4 + $0x58] sm:$0x3]  ;;  %v4551_v49 = vmax.f32 %v4531_v8, %v4543_v34  ;;  %v6059_v12 = vld [vmem:[%s9366_s7 + $0x4a0] sm:$0xff]  ;;  %v6025_v40 = vld [vmem:[%s9366_s7 + $0x398] sm:$0xff] }
 0x388   :  { %4609 = vmatprep.subr.mxu0 %v9463_v58  ;;  %4744 = vmatprep.subr.mxu1 %v9463_v58  ;;  %v6032_v57 = vld [vmem:[%s9366_s7 + $0x3d0] sm:$0xff]  ;;  %v6030_v18 = vld [vmem:[%s9366_s7 + $0x3c0] sm:$0xff]  ;;  %v6052_v51 = vld [vmem:[%s9366_s7 + $0x468] sm:$0xff] }
 0x389   :  { %4610 = vmatpush1.msra.mxu0 %v5969_v26  ;;  %4745 = vmatpush1.msra.mxu1 %v5997_v55  ;;  %v4553_v26 = vmax.f32 %v4533_v59, %v4545_v52  ;;  %v4717_v55 = vrot.slane %v4684_v5, 4  ;;  %v6057_v9 = vld [vmem:[%s9366_s7 + $0x490] sm:$0xff]  ;;  %v6055_v41 = vld [vmem:[%s9366_s7 + $0x480] sm:$0xff]  ;;  %v6023_v7 = vld [vmem:[%s9366_s7 + $0x388] sm:$0xff] }
 0x38a   :  { %4611 = vmatprep.subr.mxu0 %v9463_v58  ;;  %4746 = vmatprep.subr.mxu1 %v9463_v58  ;;  %v6028_v25 = vld [vmem:[%s9366_s7 + $0x3b0] sm:$0xff]  ;;  %v6026_v38 = vld [vmem:[%s9366_s7 + $0x3a0] sm:$0xff]  ;;  %v6049_v19 = vld [vmem:[%s9366_s7 + $0x458] sm:$0xff] }
 0x38b   :  { %4612 = vmatpush1.msra.mxu0 %v5968_v54  ;;  %4747 = vmatpush1.msra.mxu1 %v5996_v61  ;;  %v5980_v54 = vld [vmem:[%s9366_s7 + $0x240] sm:$0xff]  ;;  %v6053_v63 = vld [vmem:[%s9366_s7 + $0x470] sm:$0xff]  ;;  %v6076_v45 = vld [vmem:[%s9366_s7 + $0x528] sm:$0xff] }
 0x38c   :  { %4613 = vmatprep.subr.mxu0 %v9463_v58  ;;  %4748 = vmatprep.subr.mxu1 %v9463_v58  ;;  %v4794_v61 = vld [vmem:[#allocation4 + $0x48] sm:$0x3]  ;;  %v6077_v0 = vld [vmem:[%s9366_s7 + $0x530] sm:$0xff]  ;;  %v6047_v3 = vld [vmem:[%s9366_s7 + $0x448] sm:$0xff] }
 0x38d   :  { %4614 = vmatpush1.msra.mxu0 %v5967_v33  ;;  %4749 = vmatpush1.msra.mxu1 %v5995_v17  ;;  %v4796_v33 = vld [vmem:[#allocation4 + $0x28] sm:$0x3]  ;;  %v6066_v17 = vld [vmem:[%s9366_s7 + $0x4d8] sm:$0xff]  ;;  %v4926_v52 = vld [vmem:[#allocation4 + $0x10] sm:$0xc0] }
 0x38e   :  { %4615 = vmatprep.subr.mxu0 %v9463_v58  ;;  %4750 = vmatprep.subr.mxu1 %v9463_v58  ;;  %v6051_v15 = vld [vmem:[%s9366_s7 + $0x460] sm:$0xff]  ;;  %v6074_v34 = vld [vmem:[%s9366_s7 + $0x518] sm:$0xff]  ;;  %v6073_v5 = vld [vmem:[%s9366_s7 + $0x510] sm:$0xff] }
 0x38f   :  { %4616 = vmatpush1.msra.mxu0 %v5966_v56  ;;  %4751 = vmatpush1.msra.mxu1 %v5994_v16  ;;  %v4814_v56 = vmax.f32 %v4794_v61, %v4806_v47  ;;  %v4816_v16 = vmax.f32 %v4796_v33, %v4808_v53  ;;  %v6022_v29 = vld [vmem:[%s9366_s7 + $0x380] sm:$0xff]  ;;  %v6072_v47 = vld [vmem:[%s9366_s7 + $0x508] sm:$0xff]  ;;  %v4934_v53 = vrot.slane %v4926_v52, 2  ;;  %v6070_v61 = vld [vmem:[%s9366_s7 + $0x4f8] sm:$0xff] }
 0x390   :  { %4617 = vmatprep.subr.mxu0 %v9463_v58  ;;  %4752 = vmatprep.subr.mxu1 %v9463_v58  ;;  %v6075_v1 = vld [vmem:[%s9366_s7 + $0x520] sm:$0xff]  ;;  %v6103_v52 = vld [vmem:[%s9366_s7 + $0x5f8] sm:$0xff] }
 0x391   :  { %4618 = vmatpush1.msra.mxu0 %v5965_v50  ;;  %4753 = vmatpush1.msra.mxu1 %v5993_v21  ;;  %v4980_v50 = vrot.slane %v4947_v46, 4  ;;  %v4555_v21 = vmax.f32 %v4551_v49, %v4553_v26  ;;  %v6046_v32 = vld [vmem:[%s9366_s7 + $0x440] sm:$0xff]  ;;  %v6043_v46 = vld [vmem:[%s9366_s7 + $0x428] sm:$0xff] }
 0x392   :  { %4619 = vmatprep.subr.mxu0 %v9463_v58  ;;  %4762 = vmatprep.subr.mxu1 %v9463_v58  ;;  %v6071_v8 = vld [vmem:[%s9366_s7 + $0x500] sm:$0xff]  ;;  %v4922_v49 = vld [vmem:[#allocation4 + $0x10] sm:$0x30] }
 0x393   :  { %4620 = vmatpush1.msra.mxu0 %v5964_v42  ;;  %4763 = vmatpush2.msra.mxu1 %v6020_v35  ;;  %v6037_v42 = vld [vmem:[%s9366_s7 + $0x3f8] sm:$0xff]  ;;  %v6065_v35 = vld [vmem:[%s9366_s7 + $0x4d0] sm:$0xff]  ;;  %v6042_v59 = vld [vmem:[%s9366_s7 + $0x420] sm:$0xff]  ;;  %v4942_v33 = vmax.f32 %v4922_v49, %v4934_v53 }
 0x394   :  { %4629 = vmatprep.subr.mxu0 %v9463_v58  ;;  %4764 = vmatprep.subr.mxu1 %v9463_v58  ;;  %v4924_v26 = vld [vmem:[#allocation4 + $0x30] sm:$0x30]  ;;  %v6099_v53 = vld [vmem:[%s9366_s7 + $0x5d8] sm:$0xff] }
 0x395   :  { %4630 = vmatpush2.msra.mxu0 %v5991_v10  ;;  %4765 = vmatpush2.msra.mxu1 %v6019_v39  ;;  %v4818_v10 = vmax.f32 %v4814_v56, %v4816_v16  ;;  %v6036_v39 = vld [vmem:[%s9366_s7 + $0x3f0] sm:$0xff]  ;;  %v5060_v56 = vld [vmem:[#allocation4] sm:$0xc]  ;;  %v5057_v49 = vld [vmem:[#allocation4 + $0x60] sm:$0x3] }
 0x396   :  { %4631 = vmatprep.subr.mxu0 %v9463_v58  ;;  %4766 = vmatprep.subr.mxu1 %v9463_v58  ;;  %v5062_v16 = vld [vmem:[#allocation4 + $0x18] sm:$0xc] }
 0x397   :  { %4632 = vmatpush2.msra.mxu0 %v5990_v44  ;;  %4767 = vmatpush2.msra.mxu1 %v6018_v6  ;;  %v6064_v44 = vld [vmem:[%s9366_s7 + $0x4c8] sm:$0xff] }
 0x398   :  { %4633 = vmatprep.subr.mxu0 %v9463_v58  ;;  %4768 = vmatprep.subr.mxu1 %v9463_v58  ;;  %v6035_v6 = vld [vmem:[%s9366_s7 + $0x3e8] sm:$0xff] }
 0x399   :  { %4634 = vmatpush2.msra.mxu0 %v5989_v36  ;;  %4769 = vmatpush2.msra.mxu1 %v6017_v23  ;;  %v6063_v36 = vld [vmem:[%s9366_s7 + $0x4c0] sm:$0xff] }
 0x39a   :  { %4635 = vmatprep.subr.mxu0 %v9463_v58  ;;  %4770 = vmatprep.subr.mxu1 %v9463_v58  ;;  %v6034_v23 = vld [vmem:[%s9366_s7 + $0x3e0] sm:$0xff] }
 0x39b   :  { %4636 = vmatpush2.msra.mxu0 %v5988_v22  ;;  %4771 = vmatpush2.msra.mxu1 %v6016_v43  ;;  %v6062_v22 = vld [vmem:[%s9366_s7 + $0x4b8] sm:$0xff] }
 0x39c   :  { %4637 = vmatprep.subr.mxu0 %v9463_v58  ;;  %4772 = vmatprep.subr.mxu1 %v9463_v58  ;;  %v6033_v43 = vld [vmem:[%s9366_s7 + $0x3d8] sm:$0xff] }
 0x39d   :  { %4638 = vmatpush2.msra.mxu0 %v5987_v20  ;;  %4773 = vmatpush2.msra.mxu1 %v6015_v60  ;;  %v6060_v20 = vld [vmem:[%s9366_s7 + $0x4a8] sm:$0xff] }
 0x39e   :  { %4639 = vmatprep.subr.mxu0 %v9463_v58  ;;  %4774 = vmatprep.subr.mxu1 %v9463_v58  ;;  %v6031_v60 = vld [vmem:[%s9366_s7 + $0x3c8] sm:$0xff] }
 0x39f   :  { %4640 = vmatpush2.msra.mxu0 %v5986_v31  ;;  %4775 = vmatpush2.msra.mxu1 %v6014_v11  ;;  %v6058_v31 = vld [vmem:[%s9366_s7 + $0x498] sm:$0xff] }
 0x3a0   :  { %4641 = vmatprep.subr.mxu0 %v9463_v58  ;;  %4776 = vmatprep.subr.mxu1 %v9463_v58  ;;  %v6029_v11 = vld [vmem:[%s9366_s7 + $0x3b8] sm:$0xff] }
 0x3a1   :  { %4642 = vmatpush2.msra.mxu0 %v5985_v27  ;;  %4777 = vmatpush2.msra.mxu1 %v6013_v2  ;;  %v6056_v27 = vld [vmem:[%s9366_s7 + $0x488] sm:$0xff] }
 0x3a2   :  { %4643 = vmatprep.subr.mxu0 %v9463_v58  ;;  %4778 = vmatprep.subr.mxu1 %v9463_v58  ;;  %v6027_v2 = vld [vmem:[%s9366_s7 + $0x3a8] sm:$0xff] }
 0x3a3   :  { %4644 = vmatpush2.msra.mxu0 %v5984_v62  ;;  %4779 = vmatpush2.msra.mxu1 %v6012_v48  ;;  %v6054_v62 = vld [vmem:[%s9366_s7 + $0x478] sm:$0xff]  ;;  %v6024_v48 = vld [vmem:[%s9366_s7 + $0x390] sm:$0xff] }
 0x3a4   :  { %4645 = vmatprep.subr.mxu0 %v9463_v58  ;;  %4780 = vmatprep.subr.mxu1 %v9463_v58 }
 0x3a5   :  { %4646 = vmatpush2.msra.mxu0 %v5983_v30  ;;  %4781 = vmatpush2.msra.mxu1 %v6011_v28  ;;  %v6078_v30 = vld [vmem:[%s9366_s7 + $0x538] sm:$0xff]  ;;  %v6048_v28 = vld [vmem:[%s9366_s7 + $0x450] sm:$0xff] }
 0x3a6   :  { %4647 = vmatprep.subr.mxu0 %v9463_v58  ;;  %4782 = vmatprep.subr.mxu1 %v9463_v58 }
 0x3a7   :  { %4648 = vmatpush2.msra.mxu0 %v5982_v24  ;;  %4783 = vmatpush2.msra.mxu1 %v6010_v4  ;;  %v4928_v24 = vld [vmem:[#allocation4 + $0x30] sm:$0xc0]  ;;  %v6045_v4 = vld [vmem:[%s9366_s7 + $0x438] sm:$0xff] }
 0x3a8   :  { %4649 = vmatprep.subr.mxu0 %v9463_v58  ;;  %4784 = vmatprep.subr.mxu1 %v9463_v58 }
 0x3a9   :  { %4650 = vmatpush2.msra.mxu0 %v5981_v14  ;;  %4785 = vmatpush2.msra.mxu1 %v6009_v37  ;;  %v6044_v14 = vld [vmem:[%s9366_s7 + $0x430] sm:$0xff]  ;;  %v4936_v37 = vrot.slane %v4928_v24, 2 }
 0x3aa   :  { %4651 = vmatprep.subr.mxu0 %v9463_v58  ;;  %4787 = vmatmul.mubr.f32.vlgmr.msra.gmra.mxu1 %v4717_v55  ;;  %v4797_v55 = vld [vmem:[#allocation4 + $0x10] sm:$0xc]  ;;  %v6102_v24 = vld [vmem:[%s9366_s7 + $0x5f0] sm:$0xff] }
 0x3ab   :  { %4984 = vmatprep.subr.mxu1 %v9463_v58  ;;  %4652 = vmatpush2.msra.mxu0 %v5980_v54  ;;  %v4799_v54 = vld [vmem:[#allocation4 + $0x30] sm:$0xc] }
 0x3ac   :  { %4985 = vmatpush1.msra.mxu1 %v6066_v17  ;;  %6079 = vmatprep.mubr.msk.f32.mxu1 %vm2184_vm6, %v4980_v50  ;;  %v4944_v17 = vmax.f32 %v4924_v26, %v4936_v37  ;;  %v6041_v50 = vld [vmem:[%s9366_s7 + $0x418] sm:$0xff]  ;;  %v6097_v26 = vld [vmem:[%s9366_s7 + $0x5c8] sm:$0xff] }
 0x3ad   :  { %4654 = vmatmul.mubr.f32.vlgmr.msra.gmra.mxu0 %v4555_v21  ;;  %4851 = vmatprep.subr.mxu0 %v9463_v58  ;;  %v6069_v21 = vld [vmem:[%s9366_s7 + $0x4f0] sm:$0xff] }
 0x3ae   :  { %4986 = vmatprep.subr.mxu1 %v9463_v58  ;;  %4852 = vmatpush1.msra.mxu0 %v6037_v42  ;;  %v4805_v42 = vrot.slane %v4797_v55, 2 }
 0x3af   :  { %6050 = vmatprep.mubr.msk.f32.mxu0 %vm2184_vm6, %v4818_v10  ;;  %4987 = vmatpush1.msra.mxu1 %v6065_v35  ;;  %v4807_v35 = vrot.slane %v4799_v54, 2  ;;  %v5068_v10 = vrot.slane %v5060_v56, 2 }
 0x3b0   :  { %4853 = vmatprep.subr.mxu0 %v9463_v58  ;;  %4988 = vmatprep.subr.mxu1 %v9463_v58 }
 0x3b1   :  { %4854 = vmatpush1.msra.mxu0 %v6036_v39  ;;  %4989 = vmatpush1.msra.mxu1 %v6064_v44  ;;  %v5070_v39 = vrot.slane %v5062_v16, 2  ;;  %v6040_v44 = vld [vmem:[%s9366_s7 + $0x410] sm:$0xff] }
 0x3b2   :  { %4855 = vmatprep.subr.mxu0 %v9463_v58  ;;  %4990 = vmatprep.subr.mxu1 %v9463_v58 }
 0x3b3   :  { %4856 = vmatpush1.msra.mxu0 %v6035_v6  ;;  %4991 = vmatpush1.msra.mxu1 %v6063_v36  ;;  %v6068_v6 = vld [vmem:[%s9366_s7 + $0x4e8] sm:$0xff]  ;;  %v4946_v36 = vmax.f32 %v4942_v33, %v4944_v17 }
 0x3b4   :  { %4857 = vmatprep.subr.mxu0 %v9463_v58  ;;  %4992 = vmatprep.subr.mxu1 %v9463_v58 }
 0x3b5   :  { %4858 = vmatpush1.msra.mxu0 %v6034_v23  ;;  %4993 = vmatpush1.msra.mxu1 %v6062_v22  ;;  %v6039_v23 = vld [vmem:[%s9366_s7 + $0x408] sm:$0xff] }
 0x3b6   :  { %4859 = vmatprep.subr.mxu0 %v9463_v58  ;;  %4994 = vmatprep.subr.mxu1 %v9463_v58  ;;  %v4793_v22 = vld [vmem:[#allocation4 + $0x10] sm:$0x3] }
 0x3b7   :  { %4860 = vmatpush1.msra.mxu0 %v6033_v43  ;;  %4995 = vmatpush1.msra.mxu1 %v6061_v13  ;;  %v4795_v43 = vld [vmem:[#allocation4 + $0x30] sm:$0x3]  ;;  %v6067_v13 = vld [vmem:[%s9366_s7 + $0x4e0] sm:$0xff] }
 0x3b8   :  { %4861 = vmatprep.subr.mxu0 %v9463_v58  ;;  %4996 = vmatprep.subr.mxu1 %v9463_v58 }
 0x3b9   :  { %4862 = vmatpush1.msra.mxu0 %v6032_v57  ;;  %4997 = vmatpush1.msra.mxu1 %v6060_v20  ;;  %v4813_v57 = vmax.f32 %v4793_v22, %v4805_v42  ;;  %v4815_v20 = vmax.f32 %v4795_v43, %v4807_v35 }
 0x3ba   :  { %4863 = vmatprep.subr.mxu0 %v9463_v58  ;;  %4998 = vmatprep.subr.mxu1 %v9463_v58 }
 0x3bb   :  { %4864 = vmatpush1.msra.mxu0 %v6031_v60  ;;  %4999 = vmatpush1.msra.mxu1 %v6059_v12  ;;  %v5056_v60 = vld [vmem:[#allocation4] sm:$0x3]  ;;  %v5058_v12 = vld [vmem:[#allocation4 + $0x18] sm:$0x3] }
 0x3bc   :  { %4865 = vmatprep.subr.mxu0 %v9463_v58  ;;  %5000 = vmatprep.subr.mxu1 %v9463_v58 }
 0x3bd   :  { %4866 = vmatpush1.msra.mxu0 %v6030_v18  ;;  %5001 = vmatpush1.msra.mxu1 %v6058_v31  ;;  %v5076_v18 = vmax.f32 %v5056_v60, %v5068_v10  ;;  %v5078_v31 = vmax.f32 %v5058_v12, %v5070_v39 }
 0x3be   :  { %4867 = vmatprep.subr.mxu0 %v9463_v58  ;;  %5002 = vmatprep.subr.mxu1 %v9463_v58 }
 0x3bf   :  { %4868 = vmatpush1.msra.mxu0 %v6029_v11  ;;  %5003 = vmatpush1.msra.mxu1 %v6057_v9  ;;  %v4979_v11 = vrot.slane %v4946_v36, 4  ;;  %v6038_v9 = vld [vmem:[%s9366_s7 + $0x400] sm:$0xff] }
 0x3c0   :  { %4869 = vmatprep.subr.mxu0 %v9463_v58  ;;  %5004 = vmatprep.subr.mxu1 %v9463_v58 }
 0x3c1   :  { %4870 = vmatpush1.msra.mxu0 %v6028_v25  ;;  %5005 = vmatpush1.msra.mxu1 %v6056_v27  ;;  %v4817_v25 = vmax.f32 %v4813_v57, %v4815_v20  ;;  %v6095_v27 = vld [vmem:[%s9366_s7 + $0x5b8] sm:$0xff]  ;;  %v6109_v20 = vld [vmem:[%s9367_s8] ss:$0 sm:$0xff] }
 0x3c2   :  { %4871 = vmatprep.subr.mxu0 %v9463_v58  ;;  %5006 = vmatprep.subr.mxu1 %v9463_v58 }
 0x3c3   :  { %4872 = vmatpush1.msra.mxu0 %v6027_v2  ;;  %5007 = vmatpush1.msra.mxu1 %v6055_v41  ;;  %v5080_v2 = vmax.f32 %v5076_v18, %v5078_v31  ;;  %v6094_v41 = vld [vmem:[%s9366_s7 + $0x5b0] sm:$0xff] }
 0x3c4   :  { %4873 = vmatprep.subr.mxu0 %v9463_v58  ;;  %5008 = vmatprep.subr.mxu1 %v9463_v58 }
 0x3c5   :  { %4874 = vmatpush1.msra.mxu0 %v6026_v38  ;;  %5009 = vmatpush1.msra.mxu1 %v6054_v62  ;;  %v6093_v38 = vld [vmem:[%s9366_s7 + $0x5a8] sm:$0xff]  ;;  %v6092_v62 = vld [vmem:[%s9366_s7 + $0x5a0] sm:$0xff] }
 0x3c6   :  { %4875 = vmatprep.subr.mxu0 %v9463_v58  ;;  %5010 = vmatprep.subr.mxu1 %v9463_v58 }
 0x3c7   :  { %4876 = vmatpush1.msra.mxu0 %v6025_v40  ;;  %5011 = vmatpush1.msra.mxu1 %v6053_v63  ;;  %v6091_v40 = vld [vmem:[%s9366_s7 + $0x598] sm:$0xff]  ;;  %v6090_v63 = vld [vmem:[%s9366_s7 + $0x590] sm:$0xff] }
 0x3c8   :  { %4877 = vmatprep.subr.mxu0 %v9463_v58  ;;  %5012 = vmatprep.subr.mxu1 %v9463_v58 }
 0x3c9   :  { %4878 = vmatpush1.msra.mxu0 %v6024_v48  ;;  %5013 = vmatpush1.msra.mxu1 %v6052_v51  ;;  %v6089_v48 = vld [vmem:[%s9366_s7 + $0x588] sm:$0xff]  ;;  %v6088_v51 = vld [vmem:[%s9366_s7 + $0x580] sm:$0xff] }
 0x3ca   :  { %4879 = vmatprep.subr.mxu0 %v9463_v58  ;;  %5014 = vmatprep.subr.mxu1 %v9463_v58 }
 0x3cb   :  { %4880 = vmatpush1.msra.mxu0 %v6023_v7  ;;  %5015 = vmatpush1.msra.mxu1 %v6051_v15  ;;  %v6087_v7 = vld [vmem:[%s9366_s7 + $0x578] sm:$0xff]  ;;  %v6086_v15 = vld [vmem:[%s9366_s7 + $0x570] sm:$0xff] }
 0x3cc   :  { %4881 = vmatprep.subr.mxu0 %v9463_v58  ;;  %5024 = vmatprep.subr.mxu1 %v9463_v58 }
 0x3cd   :  { %4882 = vmatpush1.msra.mxu0 %v6022_v29  ;;  %5025 = vmatpush2.msra.mxu1 %v6078_v30  ;;  %v6085_v29 = vld [vmem:[%s9366_s7 + $0x568] sm:$0xff]  ;;  %v6084_v30 = vld [vmem:[%s9366_s7 + $0x560] sm:$0xff] }
 0x3ce   :  { %4891 = vmatprep.subr.mxu0 %v9463_v58  ;;  %5026 = vmatprep.subr.mxu1 %v9463_v58 }
 0x3cf   :  { %4892 = vmatpush2.msra.mxu0 %v6049_v19  ;;  %5027 = vmatpush2.msra.mxu1 %v6077_v0  ;;  %v6083_v19 = vld [vmem:[%s9366_s7 + $0x558] sm:$0xff]  ;;  %v6082_v0 = vld [vmem:[%s9366_s7 + $0x550] sm:$0xff] }
 0x3d0   :  { %4893 = vmatprep.subr.mxu0 %v9463_v58  ;;  %5028 = vmatprep.subr.mxu1 %v9463_v58 }
 0x3d1   :  { %4894 = vmatpush2.msra.mxu0 %v6048_v28  ;;  %5029 = vmatpush2.msra.mxu1 %v6076_v45  ;;  %v6081_v28 = vld [vmem:[%s9366_s7 + $0x548] sm:$0xff]  ;;  %v6080_v45 = vld [vmem:[%s9366_s7 + $0x540] sm:$0xff] }
 0x3d2   :  { %4895 = vmatprep.subr.mxu0 %v9463_v58  ;;  %5030 = vmatprep.subr.mxu1 %v9463_v58 }
 0x3d3   :  { %4896 = vmatpush2.msra.mxu0 %v6047_v3  ;;  %5031 = vmatpush2.msra.mxu1 %v6075_v1  ;;  %v6107_v3 = vld [vmem:[%s9366_s7 + $0x618] sm:$0xff]  ;;  %v6106_v1 = vld [vmem:[%s9366_s7 + $0x610] sm:$0xff] }
 0x3d4   :  { %4897 = vmatprep.subr.mxu0 %v9463_v58  ;;  %5032 = vmatprep.subr.mxu1 %v9463_v58 }
 0x3d5   :  { %4898 = vmatpush2.msra.mxu0 %v6046_v32  ;;  %5033 = vmatpush2.msra.mxu1 %v6074_v34  ;;  %v6105_v32 = vld [vmem:[%s9366_s7 + $0x608] sm:$0xff]  ;;  %v6104_v34 = vld [vmem:[%s9366_s7 + $0x600] sm:$0xff] }
 0x3d6   :  { %4899 = vmatprep.subr.mxu0 %v9463_v58  ;;  %5034 = vmatprep.subr.mxu1 %v9463_v58 }
 0x3d7   :  { %4900 = vmatpush2.msra.mxu0 %v6045_v4  ;;  %5035 = vmatpush2.msra.mxu1 %v6073_v5  ;;  %v6101_v4 = vld [vmem:[%s9366_s7 + $0x5e8] sm:$0xff] }
 0x3d8   :  { %4901 = vmatprep.subr.mxu0 %v9463_v58  ;;  %5036 = vmatprep.subr.mxu1 %v9463_v58  ;;  %v5059_v5 = vld [vmem:[#allocation4 + $0x70] sm:$0xc] }
 0x3d9   :  { %4902 = vmatpush2.msra.mxu0 %v6044_v14  ;;  %5037 = vmatpush2.msra.mxu1 %v6072_v47  ;;  %v5061_v14 = vld [vmem:[#allocation4 + $0x60] sm:$0xc]  ;;  %v6100_v47 = vld [vmem:[%s9366_s7 + $0x5e0] sm:$0xff]  ;;  %v5067_v37 = vrot.slane %v5059_v5, 2 }
 0x3da   :  { %4903 = vmatprep.subr.mxu0 %v9463_v58  ;;  %5038 = vmatprep.subr.mxu1 %v9463_v58 }
 0x3db   :  { %4904 = vmatpush2.msra.mxu0 %v6043_v46  ;;  %5039 = vmatpush2.msra.mxu1 %v6071_v8  ;;  %v5069_v46 = vrot.slane %v5061_v14, 2  ;;  %v6098_v8 = vld [vmem:[%s9366_s7 + $0x5d0] sm:$0xff] }
 0x3dc   :  { %4905 = vmatprep.subr.mxu0 %v9463_v58  ;;  %5040 = vmatprep.subr.mxu1 %v9463_v58 }
 0x3dd   :  { %4906 = vmatpush2.msra.mxu0 %v6042_v59  ;;  %5041 = vmatpush2.msra.mxu1 %v6070_v61  ;;  %v5055_v59 = vld [vmem:[#allocation4 + $0x70] sm:$0x3]  ;;  %v5077_v54 = vmax.f32 %v5057_v49, %v5069_v46  ;;  %v6096_v61 = vld [vmem:[%s9366_s7 + $0x5c0] sm:$0xff] }
 0x3de   :  { %4907 = vmatprep.subr.mxu0 %v9463_v58  ;;  %5042 = vmatprep.subr.mxu1 %v9463_v58  ;;  %v5075_v55 = vmax.f32 %v5055_v59, %v5067_v37 }
 0x3df   :  { %4908 = vmatpush2.msra.mxu0 %v6041_v50  ;;  %5043 = vmatpush2.msra.mxu1 %v6069_v21 }
 0x3e0   :  { %4909 = vmatprep.subr.mxu0 %v9463_v58  ;;  %5044 = vmatprep.subr.mxu1 %v9463_v58  ;;  %v5079_v33 = vmax.f32 %v5075_v55, %v5077_v54 }
 0x3e1   :  { %4910 = vmatpush2.msra.mxu0 %v6040_v44  ;;  %5045 = vmatpush2.msra.mxu1 %v6068_v6 }
 0x3e2   :  { %4911 = vmatprep.subr.mxu0 %v9463_v58  ;;  %5046 = vmatprep.subr.mxu1 %v9463_v58 }
 0x3e3   :  { %4912 = vmatpush2.msra.mxu0 %v6039_v23  ;;  %5047 = vmatpush2.msra.mxu1 %v6067_v13 }
 0x3e4   :  { %4913 = vmatprep.subr.mxu0 %v9463_v58  ;;  %5049 = vmatmul.mubr.f32.vlgmr.msra.gmra.mxu1 %v4979_v11 }
 0x3e5   :  { %4914 = vmatpush2.msra.mxu0 %v6038_v9 }
 0x3e6   :  { %4916 = vmatmul.mubr.f32.vlgmr.msra.gmra.mxu0 %v4817_v25  ;;  %5113 = vmatprep.subr.mxu0 %v9463_v58 }
 0x3e7   :  { %5114 = vmatpush1.msra.mxu0 %v6095_v27  ;;  %6108 = vmatprep.mubr.msk.f32.mxu0 %vm2184_vm6, %v5080_v2 }
 0x3e8   :  { %5115 = vmatprep.subr.mxu0 %v9463_v58 }
 0x3e9   :  { %5116 = vmatpush1.msra.mxu0 %v6094_v41 }
 0x3ea   :  { %5117 = vmatprep.subr.mxu0 %v9463_v58 }
 0x3eb   :  { %5118 = vmatpush1.msra.mxu0 %v6093_v38 }
 0x3ec   :  { %5119 = vmatprep.subr.mxu0 %v9463_v58 }
 0x3ed   :  { %5120 = vmatpush1.msra.mxu0 %v6092_v62 }
 0x3ee   :  { %5121 = vmatprep.subr.mxu0 %v9463_v58 }
 0x3ef   :  { %5122 = vmatpush1.msra.mxu0 %v6091_v40 }
 0x3f0   :  { %5123 = vmatprep.subr.mxu0 %v9463_v58 }
 0x3f1   :  { %5124 = vmatpush1.msra.mxu0 %v6090_v63 }
 0x3f2   :  { %5125 = vmatprep.subr.mxu0 %v9463_v58 }
 0x3f3   :  { %5126 = vmatpush1.msra.mxu0 %v6089_v48 }
 0x3f4   :  { %5127 = vmatprep.subr.mxu0 %v9463_v58 }
 0x3f5   :  { %5128 = vmatpush1.msra.mxu0 %v6088_v51 }
 0x3f6   :  { %5129 = vmatprep.subr.mxu0 %v9463_v58 }
 0x3f7   :  { %5130 = vmatpush1.msra.mxu0 %v6087_v7 }
 0x3f8   :  { %5131 = vmatprep.subr.mxu0 %v9463_v58 }
 0x3f9   :  { %5132 = vmatpush1.msra.mxu0 %v6086_v15 }
 0x3fa   :  { %5133 = vmatprep.subr.mxu0 %v9463_v58 }
 0x3fb   :  { %5134 = vmatpush1.msra.mxu0 %v6085_v29 }
 0x3fc   :  { %5135 = vmatprep.subr.mxu0 %v9463_v58 }
 0x3fd   :  { %5136 = vmatpush1.msra.mxu0 %v6084_v30 }
 0x3fe   :  { %5137 = vmatprep.subr.mxu0 %v9463_v58 }
 0x3ff   :  { %5138 = vmatpush1.msra.mxu0 %v6083_v19 }
 0x400   :  { %5139 = vmatprep.subr.mxu0 %v9463_v58 }
 0x401   :  { %5140 = vmatpush1.msra.mxu0 %v6082_v0 }
 0x402   :  { %5141 = vmatprep.subr.mxu0 %v9463_v58 }
 0x403   :  { %5142 = vmatpush1.msra.mxu0 %v6081_v28 }
 0x404   :  { %5143 = vmatprep.subr.mxu0 %v9463_v58 }
 0x405   :  { %5144 = vmatpush1.msra.mxu0 %v6080_v45 }
 0x406   :  { %5153 = vmatprep.subr.mxu0 %v9463_v58 }
 0x407   :  { %5154 = vmatpush2.msra.mxu0 %v6107_v3 }
 0x408   :  { %5155 = vmatprep.subr.mxu0 %v9463_v58 }
 0x409   :  { %5156 = vmatpush2.msra.mxu0 %v6106_v1 }
 0x40a   :  { %5157 = vmatprep.subr.mxu0 %v9463_v58 }
 0x40b   :  { %5158 = vmatpush2.msra.mxu0 %v6105_v32 }
 0x40c   :  { %5159 = vmatprep.subr.mxu0 %v9463_v58 }
 0x40d   :  { %5160 = vmatpush2.msra.mxu0 %v6104_v34 }
 0x40e   :  { %5161 = vmatprep.subr.mxu0 %v9463_v58 }
 0x40f   :  { %5162 = vmatpush2.msra.mxu0 %v6103_v52 }
 0x410   :  { %5163 = vmatprep.subr.mxu0 %v9463_v58 }
 0x411   :  { %5164 = vmatpush2.msra.mxu0 %v6102_v24 }
 0x412   :  { %5165 = vmatprep.subr.mxu0 %v9463_v58 }
 0x413   :  { %5166 = vmatpush2.msra.mxu0 %v6101_v4 }
 0x414   :  { %5167 = vmatprep.subr.mxu0 %v9463_v58 }
 0x415   :  { %5168 = vmatpush2.msra.mxu0 %v6100_v47 }
 0x416   :  { %5169 = vmatprep.subr.mxu0 %v9463_v58 }
 0x417   :  { %5170 = vmatpush2.msra.mxu0 %v6099_v53 }
 0x418   :  { %5171 = vmatprep.subr.mxu0 %v9463_v58 }
 0x419   :  { %5172 = vmatpush2.msra.mxu0 %v6098_v8 }
 0x41a   :  { %5173 = vmatprep.subr.mxu0 %v9463_v58 }
 0x41b   :  { %5174 = vmatpush2.msra.mxu0 %v6097_v26 }
 0x41c   :  { %5175 = vmatprep.subr.mxu0 %v9463_v58 }
 0x41d   :  { %5176 = vmatpush2.msra.mxu0 %v6096_v61 }
 0x41e   :  { %5178 = vmatmul.mubr.f32.vlgmr.msra.gmra.mxu0 %v5079_v33 }
 0x42e   :  { %v4527_v17 = vpop.f32.mrf.mxu1 }
 0x430   :  { %v4529_v56 = vpop.f32.mrf.mxu1 }
 0x434   :  { %v4454_v16 = vpop.f32.mrf.mxu0 }
 0x435   :  { %v4528_v50 = vadd.f32 %v4527_v17, %v4454_v16 }
 0x436   :  { %v4456_v21 = vpop.f32.mrf.mxu0 }
 0x46a   :  { %v4788_v42 = vpop.f32.mrf.mxu1 }
 0x46c   :  { %v4790_v35 = vpop.f32.mrf.mxu1 }
 0x46d   :  { %v4655_v10 = vpop.f32.mrf.mxu0 }
 0x46e   :  { %v4659_v39 = vadd.f32 %v4655_v10, %v4528_v50 }
 0x46f   :  { %v4657_v44 = vpop.f32.mrf.mxu0 }
 0x470   :  { %v4792_v6 = vadd.f32 %v4788_v42, %v4659_v39 }
 0x4a4   :  { %v5050_v36 = vpop.f32.mrf.mxu1 }
 0x4a6   :  { %v4917_v23 = vpop.f32.mrf.mxu0  ;;  %v5052_v22 = vpop.f32.mrf.mxu1 }
 0x4a7   :  { %v4921_v13 = vadd.f32 %v4917_v23, %v4792_v6 }
 0x4a8   :  { %v4919_v43 = vpop.f32.mrf.mxu0 }
 0x4a9   :  { %v5054_v58 = vadd.f32 %v5050_v36, %v4921_v13 }
 0x4de   :  { %v5179_v57 = vpop.f32.mrf.mxu0 }
 0x4df   :  { %v5183_v60 = vadd.f32 %v5179_v57, %v5054_v58 }
 0x4e0   :  { %v5181_v12 = vpop.f32.mrf.mxu0 }
 0x4e1   :  { %v5191_v18 = vadd.f32 %v6109_v20, %v5183_v60 }
 0x4e3   :  { %5192 = vst [vmem:[#allocation5] sm:$0x3] %v5191_v18 }
 0x4e4   :  { %6641 = shalt.err (!%p6638_p4)
}
 0x4e5   :  { %5202 = dma.vmem_to_hbm [thread:$0]  %s5200_s18, 32, %s9368_s9, [#allocation6]  }
 0x4e6   :  { %6650 = dma.done.wait [#allocation6], 32  }
 0x4e7   :  { %6651 = vsyncadd [#allocation6], 4294967264 }
 0x4e8   :  { %5206 = vsyncpa [#allocation6], 1 }

</bundles_post_ra>
